<compile_context>
chip_gen: v5e
topology: v5e:2x2
jax: 0.10.0
libtpu: 0.0.40
codegen_flags: <defaults>
</compile_context>

<pallas_src>
import functools
import math

import jax
import jax.numpy as jnp
import numpy as np
from jax import lax
from jax.experimental import pallas as pl
from jax.experimental.pallas import tpu as pltpu


# --------------------------------------------------------------------------
# Fully fused Encoder kernel: 8x (1x1 conv -> masked GroupNorm -> ReLU),
# then codes = x (channels-last) * mask.
# One grid step == `bt` batch elements; all layer params are VMEM-resident.
# --------------------------------------------------------------------------
def _encoder_kernel(x_ref, m_ref, w0_ref, wr_ref, b_ref, gamma_ref, beta_ref,
                    gmat_ref, gmatt_ref, o_ref, *, layer_cfg, eps):
    # x_ref:      (bt, L, Cin0)      input activations (channels-last)
    # m_ref:      (bt, L, 1)         mask
    # w0_ref:     (Cin0, Cpad)       layer-0 conv weight (transposed, padded)
    # wr_ref:     (NL-1, Cpad, Cpad) layers 1.. conv weights (transposed, padded)
    # b/gamma/beta_ref: (NL, 1, Cpad)
    # gmat_ref:   (NL, Cpad, Gpad)   one-hot channel->group matrices
    # gmatt_ref:  (NL, Gpad, Cpad)   their transposes
    # o_ref:      (bt, L, dim_neck)  output codes
    bt = x_ref.shape[0]
    dneck = o_ref.shape[-1]

    # Per-element activations / masks, kept in VMEM/vregs across all layers.
    hs = [x_ref[b] for b in range(bt)]                 # each (L, Cin0)
    ms = [m_ref[b] for b in range(bt)]                 # each (L, 1)
    # Mask sum hoisted out of the layer loop (computed once per element).
    # NOTE: an all-zero mask yields inf/NaN -- identical to the PyTorch module.
    inv_msums = [1.0 / jnp.sum(ms[b]) for b in range(bt)]

    for li, (_cin, cout, g) in enumerate(layer_cfg):
        cg = cout // g
        w = w0_ref[...] if li == 0 else wr_ref[li - 1]   # (Cin_pad, Cpad)
        bias = b_ref[li]                                 # (1, Cpad)
        gamma = gamma_ref[li]                            # (1, Cpad)
        beta = beta_ref[li]                              # (1, Cpad)
        gmat = gmat_ref[li]                              # (Cpad, Gpad)
        gmat_t = gmatt_ref[li]                           # (Gpad, Cpad)

        for b in range(bt):
            m = ms[b]
            inv_den = inv_msums[b] * (1.0 / cg)          # 1 / (Cg * sum(mask))

            # 1x1 conv over length == per-position channel matmul (MXU).
            y = jnp.dot(hs[b], w, preferred_element_type=jnp.float32) + bias

            # Masked GroupNorm (matches GroupNorm_Mask.forward exactly):
            # stats from x*mask, normalize x*mask, then affine.
            ym = y * m                                             # (L, Cpad)
            s1 = jnp.sum(ym, axis=0, keepdims=True)                # (1, Cpad)
            mean_g = jnp.dot(s1, gmat,
                             preferred_element_type=jnp.float32) * inv_den
            mean_c = jnp.dot(mean_g, gmat_t,
                             preferred_element_type=jnp.float32)   # (1, Cpad)

            diff = ym - mean_c                                     # (L, Cpad)
            s2 = jnp.sum(diff * diff * m, axis=0, keepdims=True)   # (1, Cpad)
            var_g = jnp.dot(s2, gmat,
                            preferred_element_type=jnp.float32) * inv_den
            var_c = jnp.dot(var_g, gmat_t,
                            preferred_element_type=jnp.float32)    # (1, Cpad)

            xn = diff * lax.rsqrt(var_c + eps)                     # EUP rsqrt
            hs[b] = jnp.maximum(xn * gamma + beta, 0.0)            # ReLU
            # Padded channels stay exactly 0 through every layer.

    # codes = x.permute(0,2,1) * mask  (already channels-last here).
    for b in range(bt):
        o_ref[b] = (hs[b] * ms[b])[:, :dneck]


# --------------------------------------------------------------------------
# Host-side parameter packing (done ONCE, outside the per-call path).
# --------------------------------------------------------------------------
def pack_encoder_params(params, lane=128):
    """Zero-pad every layer's params to a common channel width and stack them."""
    n = len(params)
    couts = [int(p["w"].shape[0]) for p in params]
    cins = [int(p["w"].shape[1]) for p in params]
    gs = [int(p["gmat"].shape[1]) for p in params]
    cpad = int(-(-max(couts + cins[1:]) // lane) * lane)
    gpad = int(-(-max(max(gs), 8) // 8) * 8)
    cin0 = cins[0]

    w0 = np.zeros((cin0, cpad), np.float32)
    wr = np.zeros((max(n - 1, 1), cpad, cpad), np.float32)
    bias = np.zeros((n, 1, cpad), np.float32)
    gamma = np.zeros((n, 1, cpad), np.float32)
    beta = np.zeros((n, 1, cpad), np.float32)
    gmat = np.zeros((n, cpad, gpad), np.float32)
    gmat_t = np.zeros((n, gpad, cpad), np.float32)

    layer_cfg = []
    for i, p in enumerate(params):
        cout, cin, g = couts[i], cins[i], gs[i]
        wt = np.asarray(p["w"], np.float32).T            # (Cin, Cout)
        if i == 0:
            w0[:, :cout] = wt
        else:
            wr[i - 1, :cin, :cout] = wt
        bias[i, 0, :cout] = np.asarray(p["b"], np.float32)
        gamma[i, 0, :cout] = np.asarray(p["gamma"], np.float32)
        beta[i, 0, :cout] = np.asarray(p["beta"], np.float32)
        gm = np.asarray(p["gmat"], np.float32)            # (Cout, G) one-hot
        gmat[i, :cout, :g] = gm
        gmat_t[i, :g, :cout] = gm.T
        layer_cfg.append((cin, cout, g))

    return dict(w0=jnp.asarray(w0), wr=jnp.asarray(wr), bias=jnp.asarray(bias),
                gamma=jnp.asarray(gamma), beta=jnp.asarray(beta),
                gmat=jnp.asarray(gmat), gmat_t=jnp.asarray(gmat_t),
                layer_cfg=tuple(layer_cfg), cpad=cpad, gpad=gpad,
                cin0=cin0, dim_neck=couts[-1])


# --------------------------------------------------------------------------
# Wrapper: Encoder.forward(x, mask) -> codes
# --------------------------------------------------------------------------
def encoder_forward(packed, x_bcl, mask_bl, eps=1e-5):
    """x_bcl: (B, C, L) NCL as in PyTorch; mask_bl: (B, L). Returns (B, L, dim_neck)."""
    B, cin0, L = x_bcl.shape
    assert cin0 == packed["cin0"]
    x = jnp.transpose(x_bcl, (0, 2, 1)).astype(jnp.float32)   # (B, L, Cin0)
    mask3 = mask_bl.astype(jnp.float32)[:, :, None]           # (B, L, 1)

    layer_cfg = packed["layer_cfg"]
    nl = len(layer_cfg)
    cpad, gpad = packed["cpad"], packed["gpad"]
    dneck = packed["dim_neck"]

    bt = math.gcd(B, 4)            # batch elements per grid step
    grid = (B // bt,)

    kernel = functools.partial(_encoder_kernel, layer_cfg=layer_cfg, eps=eps)
    const3 = lambda i: (0, 0, 0)

    return pl.pallas_call(
        kernel,
        out_shape=jax.ShapeDtypeStruct((B, L, dneck), jnp.float32),
        grid=grid,
        in_specs=[
            pl.BlockSpec((bt, L, cin0), lambda i: (i, 0, 0)),
            pl.BlockSpec((bt, L, 1), lambda i: (i, 0, 0)),
            pl.BlockSpec((cin0, cpad), lambda i: (0, 0)),
            pl.BlockSpec((max(nl - 1, 1), cpad, cpad), const3),
            pl.BlockSpec((nl, 1, cpad), const3),
            pl.BlockSpec((nl, 1, cpad), const3),
            pl.BlockSpec((nl, 1, cpad), const3),
            pl.BlockSpec((nl, cpad, gpad), const3),
            pl.BlockSpec((nl, gpad, cpad), const3),
        ],
        out_specs=pl.BlockSpec((bt, L, dneck), lambda i: (i, 0, 0)),
        compiler_params=pltpu.CompilerParams(
            dimension_semantics=("parallel",)),
    )(x, mask3, packed["w0"], packed["wr"], packed["bias"],
      packed["gamma"], packed["beta"], packed["gmat"], packed["gmat_t"])


# --------------------------------------------------------------------------
# Pure-JAX reference (mirrors the PyTorch code) for verification.
# --------------------------------------------------------------------------
def _ref_layer(x_bcl, mask_bl, w, b, gamma, beta, G, eps=1e-5):
    y = jnp.einsum("oc,bcl->bol", w, x_bcl) + b[None, :, None]
    B, C, L = y.shape
    cg = C // G
    yg = y.reshape(B, G, cg, L)
    m = mask_bl.reshape(B, 1, 1, L)
    yg = yg * m
    msum = jnp.sum(m, axis=3, keepdims=True)
    mean = jnp.sum(jnp.mean(yg, axis=2, keepdims=True), axis=3,
                   keepdims=True) / msum
    var = jnp.sum(jnp.mean((yg - mean) ** 2 * m, axis=2, keepdims=True),
                  axis=3, keepdims=True) / msum
    xn = ((yg - mean) / jnp.sqrt(var + eps)).reshape(B, C, L)
    out = xn * gamma[None, :, None] + beta[None, :, None]
    return jnp.maximum(out, 0.0)


def _ref_encoder(params, x_bcl, mask_bl):
    x = x_bcl
    for p in params:
        x = _ref_layer(x, mask_bl, p["w"], p["b"], p["gamma"], p["beta"],
                       p["gmat"].shape[1])
    return jnp.transpose(x, (0, 2, 1)) * mask_bl[:, :, None]


def make_params(key, dim_freq, dim_enc, chs_grp, dim_neck):
    # layer configs: (Cin, Cout, num_groups) — mirrors Encoder.__init__
    cfgs = [(dim_freq, dim_enc, dim_enc // chs_grp)]
    cfgs += [(dim_enc, dim_enc, dim_enc // chs_grp)] * 4
    cfgs += [(dim_enc, 128, 128 // chs_grp),
             (128, 32, 32 // chs_grp),
             (32, dim_neck, 1)]
    params = []
    for (cin, cout, g) in cfgs:
        key, k_w, k_b = jax.random.split(key, 3)
        w = jax.random.normal(k_w, (cout, cin), jnp.float32) * 0.1
        b = jax.random.normal(k_b, (cout,), jnp.float32) * 0.01
        cg = cout // g
        gmat = (jnp.arange(cout)[:, None] // cg ==
                jnp.arange(g)[None, :]).astype(jnp.float32)   # (Cout, G)
        params.append(dict(w=w, b=b, gmat=gmat,
                           gamma=jnp.ones((cout,), jnp.float32),
                           beta=jnp.zeros((cout,), jnp.float32)))
    return params


if __name__ == "__main__":
    # small hparams: dim_freq_sea=16, dim_enc_sea=32, chs_grp=8, dim_neck_sea=8
    B, L = 2, 16
    DIM_FREQ, DIM_ENC, CHS_GRP, DIM_NECK = 16, 32, 8, 8

    key = jax.random.PRNGKey(0)
    params = make_params(key, DIM_FREQ, DIM_ENC, CHS_GRP, DIM_NECK)
    packed = pack_encoder_params(params)                  # packed ONCE

    kx, _ = jax.random.split(jax.random.PRNGKey(0))
    x = jax.random.normal(kx, (B, DIM_FREQ, L), jnp.float32)     # (B, C, L) NCL
    lengths = jnp.array([L, 12])
    mask = (jnp.arange(L)[None, :] < lengths[:, None]).astype(jnp.float32)

    codes = encoder_forward(packed, x, mask)
    codes = jax.block_until_ready(codes)

    ref = jax.block_until_ready(_ref_encoder(params, x, mask))
    np.testing.assert_allclose(np.asarray(codes), np.asarray(ref),
                               rtol=2e-4, atol=2e-4)
    assert codes.shape == (B, L, DIM_NECK)
    print("KERNEL_OK")
</pallas_src>

<mosaic_0001>
module attributes {stable_mosaic.version = 11 : i64} {
  func.func @_encoder_kernel(%arg0: i32, %arg1: memref<2x16x16xf32, #tpu.memory_space<vmem>>, %arg2: memref<2x16x1xf32, #tpu.memory_space<vmem>>, %arg3: memref<16x128xf32, #tpu.memory_space<vmem>>, %arg4: memref<7x128x128xf32, #tpu.memory_space<vmem>>, %arg5: memref<8x1x128xf32, #tpu.memory_space<vmem>>, %arg6: memref<8x1x128xf32, #tpu.memory_space<vmem>>, %arg7: memref<8x1x128xf32, #tpu.memory_space<vmem>>, %arg8: memref<8x128x16xf32, #tpu.memory_space<vmem>>, %arg9: memref<8x16x128xf32, #tpu.memory_space<vmem>>, %arg10: memref<2x16x8xf32, #tpu.memory_space<vmem>>) attributes {dimension_semantics = [#tpu.dimension_semantics<parallel>], iteration_bounds = array<i64: 1>, scalar_prefetch = 0 : i64, scratch_operands = 0 : i64, tpu.core_type = #tpu.core_type<tc>, window_params = [{transform_indices = @transform_0, window_bounds = array<i64: 2, 16, 16>}, {transform_indices = @transform_1, window_bounds = array<i64: 2, 16, 1>}, {pipeline_mode = #tpu.pipeline_mode<synchronous>, transform_indices = @transform_2, window_bounds = array<i64: 16, 128>}, {pipeline_mode = #tpu.pipeline_mode<synchronous>, transform_indices = @transform_3, window_bounds = array<i64: 7, 128, 128>}, {pipeline_mode = #tpu.pipeline_mode<synchronous>, transform_indices = @transform_4, window_bounds = array<i64: 8, 1, 128>}, {pipeline_mode = #tpu.pipeline_mode<synchronous>, transform_indices = @transform_5, window_bounds = array<i64: 8, 1, 128>}, {pipeline_mode = #tpu.pipeline_mode<synchronous>, transform_indices = @transform_6, window_bounds = array<i64: 8, 1, 128>}, {pipeline_mode = #tpu.pipeline_mode<synchronous>, transform_indices = @transform_7, window_bounds = array<i64: 8, 128, 16>}, {pipeline_mode = #tpu.pipeline_mode<synchronous>, transform_indices = @transform_8, window_bounds = array<i64: 8, 16, 128>}, {transform_indices = @transform_9, window_bounds = array<i64: 2, 16, 8>}]} {
    %c0 = arith.constant 0 : index
    %c0_0 = arith.constant 0 : index
    %c0_1 = arith.constant 0 : index
    %0 = vector.load %arg1[%c0, %c0_0, %c0_1] : memref<2x16x16xf32, #tpu.memory_space<vmem>>, vector<1x16x16xf32>
    %1 = vector.shape_cast %0 : vector<1x16x16xf32> to vector<16x16xf32>
    %c1 = arith.constant 1 : index
    %c0_2 = arith.constant 0 : index
    %c0_3 = arith.constant 0 : index
    %2 = vector.load %arg1[%c1, %c0_2, %c0_3] : memref<2x16x16xf32, #tpu.memory_space<vmem>>, vector<1x16x16xf32>
    %3 = vector.shape_cast %2 : vector<1x16x16xf32> to vector<16x16xf32>
    %c0_4 = arith.constant 0 : index
    %c0_5 = arith.constant 0 : index
    %c0_6 = arith.constant 0 : index
    %4 = vector.load %arg2[%c0_4, %c0_5, %c0_6] : memref<2x16x1xf32, #tpu.memory_space<vmem>>, vector<1x16x1xf32>
    %5 = vector.shape_cast %4 : vector<1x16x1xf32> to vector<16x1xf32>
    %c1_7 = arith.constant 1 : index
    %c0_8 = arith.constant 0 : index
    %c0_9 = arith.constant 0 : index
    %6 = vector.load %arg2[%c1_7, %c0_8, %c0_9] : memref<2x16x1xf32, #tpu.memory_space<vmem>>, vector<1x16x1xf32>
    %7 = vector.shape_cast %6 : vector<1x16x1xf32> to vector<16x1xf32>
    %8 = vector.shape_cast %5 : vector<16x1xf32> to vector<1x16x1xf32>
    %cst = arith.constant dense<0.000000e+00> : vector<1xf32>
    %9 = vector.multi_reduction <add>, %8, %cst [1, 2] : vector<1x16x1xf32> to vector<1xf32>
    %10 = vector.shape_cast %9 : vector<1xf32> to vector<1x1x1xf32>
    %11 = vector.extract %10[0, 0, 0] : f32 from vector<1x1x1xf32>
    %cst_10 = arith.constant 1.000000e+00 : f32
    %12 = arith.divf %cst_10, %11 : f32
    %13 = vector.shape_cast %7 : vector<16x1xf32> to vector<1x16x1xf32>
    %cst_11 = arith.constant dense<0.000000e+00> : vector<1xf32>
    %14 = vector.multi_reduction <add>, %13, %cst_11 [1, 2] : vector<1x16x1xf32> to vector<1xf32>
    %15 = vector.shape_cast %14 : vector<1xf32> to vector<1x1x1xf32>
    %16 = vector.extract %15[0, 0, 0] : f32 from vector<1x1x1xf32>
    %cst_12 = arith.constant 1.000000e+00 : f32
    %17 = arith.divf %cst_12, %16 : f32
    %c0_13 = arith.constant 0 : index
    %c0_14 = arith.constant 0 : index
    %18 = vector.load %arg3[%c0_13, %c0_14] : memref<16x128xf32, #tpu.memory_space<vmem>>, vector<16x128xf32>
    %c0_15 = arith.constant 0 : index
    %c0_16 = arith.constant 0 : index
    %c0_17 = arith.constant 0 : index
    %19 = vector.load %arg5[%c0_15, %c0_16, %c0_17] : memref<8x1x128xf32, #tpu.memory_space<vmem>>, vector<1x1x128xf32>
    %20 = vector.shape_cast %19 : vector<1x1x128xf32> to vector<1x128xf32>
    %c0_18 = arith.constant 0 : index
    %c0_19 = arith.constant 0 : index
    %c0_20 = arith.constant 0 : index
    %21 = vector.load %arg6[%c0_18, %c0_19, %c0_20] : memref<8x1x128xf32, #tpu.memory_space<vmem>>, vector<1x1x128xf32>
    %22 = vector.shape_cast %21 : vector<1x1x128xf32> to vector<1x128xf32>
    %c0_21 = arith.constant 0 : index
    %c0_22 = arith.constant 0 : index
    %c0_23 = arith.constant 0 : index
    %23 = vector.load %arg7[%c0_21, %c0_22, %c0_23] : memref<8x1x128xf32, #tpu.memory_space<vmem>>, vector<1x1x128xf32>
    %24 = vector.shape_cast %23 : vector<1x1x128xf32> to vector<1x128xf32>
    %c0_24 = arith.constant 0 : index
    %c0_25 = arith.constant 0 : index
    %c0_26 = arith.constant 0 : index
    %25 = vector.load %arg8[%c0_24, %c0_25, %c0_26] : memref<8x128x16xf32, #tpu.memory_space<vmem>>, vector<1x128x16xf32>
    %26 = vector.shape_cast %25 : vector<1x128x16xf32> to vector<128x16xf32>
    %c0_27 = arith.constant 0 : index
    %c0_28 = arith.constant 0 : index
    %c0_29 = arith.constant 0 : index
    %27 = vector.load %arg9[%c0_27, %c0_28, %c0_29] : memref<8x16x128xf32, #tpu.memory_space<vmem>>, vector<1x16x128xf32>
    %28 = vector.shape_cast %27 : vector<1x16x128xf32> to vector<16x128xf32>
    %cst_30 = arith.constant 1.250000e-01 : f32
    %29 = arith.mulf %12, %cst_30 : f32
    %cst_31 = arith.constant dense<0.000000e+00> : vector<16x128xf32>
    %30 = tpu.matmul %1, %18, %cst_31 {dimension_numbers = #tpu.dot_dimension_numbers<[1], [0], [0], [1], [0, 0, 1, 1], [], []>} : vector<16x16xf32>, vector<16x128xf32>, vector<16x128xf32> -> vector<16x128xf32>
    %31 = vector.broadcast %20 : vector<1x128xf32> to vector<16x128xf32>
    %32 = arith.addf %30, %31 : vector<16x128xf32>
    %33 = vector.broadcast %5 : vector<16x1xf32> to vector<16x128xf32>
    %34 = arith.mulf %32, %33 : vector<16x128xf32>
    %cst_32 = arith.constant dense<0.000000e+00> : vector<128xf32>
    %35 = vector.multi_reduction <add>, %34, %cst_32 [0] : vector<16x128xf32> to vector<128xf32>
    %36 = vector.shape_cast %35 : vector<128xf32> to vector<1x128xf32>
    %cst_33 = arith.constant dense<0.000000e+00> : vector<1x16xf32>
    %37 = tpu.matmul %36, %26, %cst_33 {dimension_numbers = #tpu.dot_dimension_numbers<[1], [0], [0], [1], [0, 0, 1, 1], [], []>} : vector<1x128xf32>, vector<128x16xf32>, vector<1x16xf32> -> vector<1x16xf32>
    %38 = vector.broadcast %29 : f32 to vector<1x16xf32>
    %39 = arith.mulf %37, %38 : vector<1x16xf32>
    %cst_34 = arith.constant dense<0.000000e+00> : vector<1x128xf32>
    %40 = tpu.matmul %39, %28, %cst_34 {dimension_numbers = #tpu.dot_dimension_numbers<[1], [0], [0], [1], [0, 0, 1, 1], [], []>} : vector<1x16xf32>, vector<16x128xf32>, vector<1x128xf32> -> vector<1x128xf32>
    %41 = vector.broadcast %40 : vector<1x128xf32> to vector<16x128xf32>
    %42 = arith.subf %34, %41 : vector<16x128xf32>
    %43 = arith.mulf %42, %42 : vector<16x128xf32>
    %44 = vector.broadcast %5 : vector<16x1xf32> to vector<16x128xf32>
    %45 = arith.mulf %43, %44 : vector<16x128xf32>
    %cst_35 = arith.constant dense<0.000000e+00> : vector<128xf32>
    %46 = vector.multi_reduction <add>, %45, %cst_35 [0] : vector<16x128xf32> to vector<128xf32>
    %47 = vector.shape_cast %46 : vector<128xf32> to vector<1x128xf32>
    %cst_36 = arith.constant dense<0.000000e+00> : vector<1x16xf32>
    %48 = tpu.matmul %47, %26, %cst_36 {dimension_numbers = #tpu.dot_dimension_numbers<[1], [0], [0], [1], [0, 0, 1, 1], [], []>} : vector<1x128xf32>, vector<128x16xf32>, vector<1x16xf32> -> vector<1x16xf32>
    %49 = vector.broadcast %29 : f32 to vector<1x16xf32>
    %50 = arith.mulf %48, %49 : vector<1x16xf32>
    %cst_37 = arith.constant dense<0.000000e+00> : vector<1x128xf32>
    %51 = tpu.matmul %50, %28, %cst_37 {dimension_numbers = #tpu.dot_dimension_numbers<[1], [0], [0], [1], [0, 0, 1, 1], [], []>} : vector<1x16xf32>, vector<16x128xf32>, vector<1x128xf32> -> vector<1x128xf32>
    %cst_38 = arith.constant 9.99999974E-6 : f32
    %52 = vector.broadcast %cst_38 : f32 to vector<1x128xf32>
    %53 = arith.addf %51, %52 : vector<1x128xf32>
    %54 = math.rsqrt %53 : vector<1x128xf32>
    %55 = vector.broadcast %54 : vector<1x128xf32> to vector<16x128xf32>
    %56 = arith.mulf %42, %55 : vector<16x128xf32>
    %57 = vector.broadcast %22 : vector<1x128xf32> to vector<16x128xf32>
    %58 = arith.mulf %56, %57 : vector<16x128xf32>
    %59 = vector.broadcast %24 : vector<1x128xf32> to vector<16x128xf32>
    %60 = arith.addf %58, %59 : vector<16x128xf32>
    %cst_39 = arith.constant 0.000000e+00 : f32
    %61 = vector.broadcast %cst_39 : f32 to vector<16x128xf32>
    %62 = arith.maximumf %60, %61 : vector<16x128xf32>
    %cst_40 = arith.constant 1.250000e-01 : f32
    %63 = arith.mulf %17, %cst_40 : f32
    %cst_41 = arith.constant dense<0.000000e+00> : vector<16x128xf32>
    %64 = tpu.matmul %3, %18, %cst_41 {dimension_numbers = #tpu.dot_dimension_numbers<[1], [0], [0], [1], [0, 0, 1, 1], [], []>} : vector<16x16xf32>, vector<16x128xf32>, vector<16x128xf32> -> vector<16x128xf32>
    %65 = vector.broadcast %20 : vector<1x128xf32> to vector<16x128xf32>
    %66 = arith.addf %64, %65 : vector<16x128xf32>
    %67 = vector.broadcast %7 : vector<16x1xf32> to vector<16x128xf32>
    %68 = arith.mulf %66, %67 : vector<16x128xf32>
    %cst_42 = arith.constant dense<0.000000e+00> : vector<128xf32>
    %69 = vector.multi_reduction <add>, %68, %cst_42 [0] : vector<16x128xf32> to vector<128xf32>
    %70 = vector.shape_cast %69 : vector<128xf32> to vector<1x128xf32>
    %cst_43 = arith.constant dense<0.000000e+00> : vector<1x16xf32>
    %71 = tpu.matmul %70, %26, %cst_43 {dimension_numbers = #tpu.dot_dimension_numbers<[1], [0], [0], [1], [0, 0, 1, 1], [], []>} : vector<1x128xf32>, vector<128x16xf32>, vector<1x16xf32> -> vector<1x16xf32>
    %72 = vector.broadcast %63 : f32 to vector<1x16xf32>
    %73 = arith.mulf %71, %72 : vector<1x16xf32>
    %cst_44 = arith.constant dense<0.000000e+00> : vector<1x128xf32>
    %74 = tpu.matmul %73, %28, %cst_44 {dimension_numbers = #tpu.dot_dimension_numbers<[1], [0], [0], [1], [0, 0, 1, 1], [], []>} : vector<1x16xf32>, vector<16x128xf32>, vector<1x128xf32> -> vector<1x128xf32>
    %75 = vector.broadcast %74 : vector<1x128xf32> to vector<16x128xf32>
    %76 = arith.subf %68, %75 : vector<16x128xf32>
    %77 = arith.mulf %76, %76 : vector<16x128xf32>
    %78 = vector.broadcast %7 : vector<16x1xf32> to vector<16x128xf32>
    %79 = arith.mulf %77, %78 : vector<16x128xf32>
    %cst_45 = arith.constant dense<0.000000e+00> : vector<128xf32>
    %80 = vector.multi_reduction <add>, %79, %cst_45 [0] : vector<16x128xf32> to vector<128xf32>
    %81 = vector.shape_cast %80 : vector<128xf32> to vector<1x128xf32>
    %cst_46 = arith.constant dense<0.000000e+00> : vector<1x16xf32>
    %82 = tpu.matmul %81, %26, %cst_46 {dimension_numbers = #tpu.dot_dimension_numbers<[1], [0], [0], [1], [0, 0, 1, 1], [], []>} : vector<1x128xf32>, vector<128x16xf32>, vector<1x16xf32> -> vector<1x16xf32>
    %83 = vector.broadcast %63 : f32 to vector<1x16xf32>
    %84 = arith.mulf %82, %83 : vector<1x16xf32>
    %cst_47 = arith.constant dense<0.000000e+00> : vector<1x128xf32>
    %85 = tpu.matmul %84, %28, %cst_47 {dimension_numbers = #tpu.dot_dimension_numbers<[1], [0], [0], [1], [0, 0, 1, 1], [], []>} : vector<1x16xf32>, vector<16x128xf32>, vector<1x128xf32> -> vector<1x128xf32>
    %cst_48 = arith.constant 9.99999974E-6 : f32
    %86 = vector.broadcast %cst_48 : f32 to vector<1x128xf32>
    %87 = arith.addf %85, %86 : vector<1x128xf32>
    %88 = math.rsqrt %87 : vector<1x128xf32>
    %89 = vector.broadcast %88 : vector<1x128xf32> to vector<16x128xf32>
    %90 = arith.mulf %76, %89 : vector<16x128xf32>
    %91 = vector.broadcast %22 : vector<1x128xf32> to vector<16x128xf32>
    %92 = arith.mulf %90, %91 : vector<16x128xf32>
    %93 = vector.broadcast %24 : vector<1x128xf32> to vector<16x128xf32>
    %94 = arith.addf %92, %93 : vector<16x128xf32>
    %cst_49 = arith.constant 0.000000e+00 : f32
    %95 = vector.broadcast %cst_49 : f32 to vector<16x128xf32>
    %96 = arith.maximumf %94, %95 : vector<16x128xf32>
    %c0_50 = arith.constant 0 : index
    %c0_51 = arith.constant 0 : index
    %c0_52 = arith.constant 0 : index
    %97 = vector.load %arg4[%c0_50, %c0_51, %c0_52] : memref<7x128x128xf32, #tpu.memory_space<vmem>>, vector<1x128x128xf32>
    %98 = vector.shape_cast %97 : vector<1x128x128xf32> to vector<128x128xf32>
    %c1_53 = arith.constant 1 : index
    %c0_54 = arith.constant 0 : index
    %c0_55 = arith.constant 0 : index
    %99 = vector.load %arg5[%c1_53, %c0_54, %c0_55] : memref<8x1x128xf32, #tpu.memory_space<vmem>>, vector<1x1x128xf32>
    %100 = vector.shape_cast %99 : vector<1x1x128xf32> to vector<1x128xf32>
    %c1_56 = arith.constant 1 : index
    %c0_57 = arith.constant 0 : index
    %c0_58 = arith.constant 0 : index
    %101 = vector.load %arg6[%c1_56, %c0_57, %c0_58] : memref<8x1x128xf32, #tpu.memory_space<vmem>>, vector<1x1x128xf32>
    %102 = vector.shape_cast %101 : vector<1x1x128xf32> to vector<1x128xf32>
    %c1_59 = arith.constant 1 : index
    %c0_60 = arith.constant 0 : index
    %c0_61 = arith.constant 0 : index
    %103 = vector.load %arg7[%c1_59, %c0_60, %c0_61] : memref<8x1x128xf32, #tpu.memory_space<vmem>>, vector<1x1x128xf32>
    %104 = vector.shape_cast %103 : vector<1x1x128xf32> to vector<1x128xf32>
    %c1_62 = arith.constant 1 : index
    %c0_63 = arith.constant 0 : index
    %c0_64 = arith.constant 0 : index
    %105 = vector.load %arg8[%c1_62, %c0_63, %c0_64] : memref<8x128x16xf32, #tpu.memory_space<vmem>>, vector<1x128x16xf32>
    %106 = vector.shape_cast %105 : vector<1x128x16xf32> to vector<128x16xf32>
    %c1_65 = arith.constant 1 : index
    %c0_66 = arith.constant 0 : index
    %c0_67 = arith.constant 0 : index
    %107 = vector.load %arg9[%c1_65, %c0_66, %c0_67] : memref<8x16x128xf32, #tpu.memory_space<vmem>>, vector<1x16x128xf32>
    %108 = vector.shape_cast %107 : vector<1x16x128xf32> to vector<16x128xf32>
    %cst_68 = arith.constant 1.250000e-01 : f32
    %109 = arith.mulf %12, %cst_68 : f32
    %cst_69 = arith.constant dense<0.000000e+00> : vector<16x128xf32>
    %110 = tpu.matmul %62, %98, %cst_69 {dimension_numbers = #tpu.dot_dimension_numbers<[1], [0], [0], [1], [0, 0, 1, 1], [], []>} : vector<16x128xf32>, vector<128x128xf32>, vector<16x128xf32> -> vector<16x128xf32>
    %111 = vector.broadcast %100 : vector<1x128xf32> to vector<16x128xf32>
    %112 = arith.addf %110, %111 : vector<16x128xf32>
    %113 = vector.broadcast %5 : vector<16x1xf32> to vector<16x128xf32>
    %114 = arith.mulf %112, %113 : vector<16x128xf32>
    %cst_70 = arith.constant dense<0.000000e+00> : vector<128xf32>
    %115 = vector.multi_reduction <add>, %114, %cst_70 [0] : vector<16x128xf32> to vector<128xf32>
    %116 = vector.shape_cast %115 : vector<128xf32> to vector<1x128xf32>
    %cst_71 = arith.constant dense<0.000000e+00> : vector<1x16xf32>
    %117 = tpu.matmul %116, %106, %cst_71 {dimension_numbers = #tpu.dot_dimension_numbers<[1], [0], [0], [1], [0, 0, 1, 1], [], []>} : vector<1x128xf32>, vector<128x16xf32>, vector<1x16xf32> -> vector<1x16xf32>
    %118 = vector.broadcast %109 : f32 to vector<1x16xf32>
    %119 = arith.mulf %117, %118 : vector<1x16xf32>
    %cst_72 = arith.constant dense<0.000000e+00> : vector<1x128xf32>
    %120 = tpu.matmul %119, %108, %cst_72 {dimension_numbers = #tpu.dot_dimension_numbers<[1], [0], [0], [1], [0, 0, 1, 1], [], []>} : vector<1x16xf32>, vector<16x128xf32>, vector<1x128xf32> -> vector<1x128xf32>
    %121 = vector.broadcast %120 : vector<1x128xf32> to vector<16x128xf32>
    %122 = arith.subf %114, %121 : vector<16x128xf32>
    %123 = arith.mulf %122, %122 : vector<16x128xf32>
    %124 = vector.broadcast %5 : vector<16x1xf32> to vector<16x128xf32>
    %125 = arith.mulf %123, %124 : vector<16x128xf32>
    %cst_73 = arith.constant dense<0.000000e+00> : vector<128xf32>
    %126 = vector.multi_reduction <add>, %125, %cst_73 [0] : vector<16x128xf32> to vector<128xf32>
    %127 = vector.shape_cast %126 : vector<128xf32> to vector<1x128xf32>
    %cst_74 = arith.constant dense<0.000000e+00> : vector<1x16xf32>
    %128 = tpu.matmul %127, %106, %cst_74 {dimension_numbers = #tpu.dot_dimension_numbers<[1], [0], [0], [1], [0, 0, 1, 1], [], []>} : vector<1x128xf32>, vector<128x16xf32>, vector<1x16xf32> -> vector<1x16xf32>
    %129 = vector.broadcast %109 : f32 to vector<1x16xf32>
    %130 = arith.mulf %128, %129 : vector<1x16xf32>
    %cst_75 = arith.constant dense<0.000000e+00> : vector<1x128xf32>
    %131 = tpu.matmul %130, %108, %cst_75 {dimension_numbers = #tpu.dot_dimension_numbers<[1], [0], [0], [1], [0, 0, 1, 1], [], []>} : vector<1x16xf32>, vector<16x128xf32>, vector<1x128xf32> -> vector<1x128xf32>
    %cst_76 = arith.constant 9.99999974E-6 : f32
    %132 = vector.broadcast %cst_76 : f32 to vector<1x128xf32>
    %133 = arith.addf %131, %132 : vector<1x128xf32>
    %134 = math.rsqrt %133 : vector<1x128xf32>
    %135 = vector.broadcast %134 : vector<1x128xf32> to vector<16x128xf32>
    %136 = arith.mulf %122, %135 : vector<16x128xf32>
    %137 = vector.broadcast %102 : vector<1x128xf32> to vector<16x128xf32>
    %138 = arith.mulf %136, %137 : vector<16x128xf32>
    %139 = vector.broadcast %104 : vector<1x128xf32> to vector<16x128xf32>
    %140 = arith.addf %138, %139 : vector<16x128xf32>
    %cst_77 = arith.constant 0.000000e+00 : f32
    %141 = vector.broadcast %cst_77 : f32 to vector<16x128xf32>
    %142 = arith.maximumf %140, %141 : vector<16x128xf32>
    %cst_78 = arith.constant 1.250000e-01 : f32
    %143 = arith.mulf %17, %cst_78 : f32
    %cst_79 = arith.constant dense<0.000000e+00> : vector<16x128xf32>
    %144 = tpu.matmul %96, %98, %cst_79 {dimension_numbers = #tpu.dot_dimension_numbers<[1], [0], [0], [1], [0, 0, 1, 1], [], []>} : vector<16x128xf32>, vector<128x128xf32>, vector<16x128xf32> -> vector<16x128xf32>
    %145 = vector.broadcast %100 : vector<1x128xf32> to vector<16x128xf32>
    %146 = arith.addf %144, %145 : vector<16x128xf32>
    %147 = vector.broadcast %7 : vector<16x1xf32> to vector<16x128xf32>
    %148 = arith.mulf %146, %147 : vector<16x128xf32>
    %cst_80 = arith.constant dense<0.000000e+00> : vector<128xf32>
    %149 = vector.multi_reduction <add>, %148, %cst_80 [0] : vector<16x128xf32> to vector<128xf32>
    %150 = vector.shape_cast %149 : vector<128xf32> to vector<1x128xf32>
    %cst_81 = arith.constant dense<0.000000e+00> : vector<1x16xf32>
    %151 = tpu.matmul %150, %106, %cst_81 {dimension_numbers = #tpu.dot_dimension_numbers<[1], [0], [0], [1], [0, 0, 1, 1], [], []>} : vector<1x128xf32>, vector<128x16xf32>, vector<1x16xf32> -> vector<1x16xf32>
    %152 = vector.broadcast %143 : f32 to vector<1x16xf32>
    %153 = arith.mulf %151, %152 : vector<1x16xf32>
    %cst_82 = arith.constant dense<0.000000e+00> : vector<1x128xf32>
    %154 = tpu.matmul %153, %108, %cst_82 {dimension_numbers = #tpu.dot_dimension_numbers<[1], [0], [0], [1], [0, 0, 1, 1], [], []>} : vector<1x16xf32>, vector<16x128xf32>, vector<1x128xf32> -> vector<1x128xf32>
    %155 = vector.broadcast %154 : vector<1x128xf32> to vector<16x128xf32>
    %156 = arith.subf %148, %155 : vector<16x128xf32>
    %157 = arith.mulf %156, %156 : vector<16x128xf32>
    %158 = vector.broadcast %7 : vector<16x1xf32> to vector<16x128xf32>
    %159 = arith.mulf %157, %158 : vector<16x128xf32>
    %cst_83 = arith.constant dense<0.000000e+00> : vector<128xf32>
    %160 = vector.multi_reduction <add>, %159, %cst_83 [0] : vector<16x128xf32> to vector<128xf32>
    %161 = vector.shape_cast %160 : vector<128xf32> to vector<1x128xf32>
    %cst_84 = arith.constant dense<0.000000e+00> : vector<1x16xf32>
    %162 = tpu.matmul %161, %106, %cst_84 {dimension_numbers = #tpu.dot_dimension_numbers<[1], [0], [0], [1], [0, 0, 1, 1], [], []>} : vector<1x128xf32>, vector<128x16xf32>, vector<1x16xf32> -> vector<1x16xf32>
    %163 = vector.broadcast %143 : f32 to vector<1x16xf32>
    %164 = arith.mulf %162, %163 : vector<1x16xf32>
    %cst_85 = arith.constant dense<0.000000e+00> : vector<1x128xf32>
    %165 = tpu.matmul %164, %108, %cst_85 {dimension_numbers = #tpu.dot_dimension_numbers<[1], [0], [0], [1], [0, 0, 1, 1], [], []>} : vector<1x16xf32>, vector<16x128xf32>, vector<1x128xf32> -> vector<1x128xf32>
    %cst_86 = arith.constant 9.99999974E-6 : f32
    %166 = vector.broadcast %cst_86 : f32 to vector<1x128xf32>
    %167 = arith.addf %165, %166 : vector<1x128xf32>
    %168 = math.rsqrt %167 : vector<1x128xf32>
    %169 = vector.broadcast %168 : vector<1x128xf32> to vector<16x128xf32>
    %170 = arith.mulf %156, %169 : vector<16x128xf32>
    %171 = vector.broadcast %102 : vector<1x128xf32> to vector<16x128xf32>
    %172 = arith.mulf %170, %171 : vector<16x128xf32>
    %173 = vector.broadcast %104 : vector<1x128xf32> to vector<16x128xf32>
    %174 = arith.addf %172, %173 : vector<16x128xf32>
    %cst_87 = arith.constant 0.000000e+00 : f32
    %175 = vector.broadcast %cst_87 : f32 to vector<16x128xf32>
    %176 = arith.maximumf %174, %175 : vector<16x128xf32>
    %c1_88 = arith.constant 1 : index
    %c0_89 = arith.constant 0 : index
    %c0_90 = arith.constant 0 : index
    %177 = vector.load %arg4[%c1_88, %c0_89, %c0_90] : memref<7x128x128xf32, #tpu.memory_space<vmem>>, vector<1x128x128xf32>
    %178 = vector.shape_cast %177 : vector<1x128x128xf32> to vector<128x128xf32>
    %c2 = arith.constant 2 : index
    %c0_91 = arith.constant 0 : index
    %c0_92 = arith.constant 0 : index
    %179 = vector.load %arg5[%c2, %c0_91, %c0_92] : memref<8x1x128xf32, #tpu.memory_space<vmem>>, vector<1x1x128xf32>
    %180 = vector.shape_cast %179 : vector<1x1x128xf32> to vector<1x128xf32>
    %c2_93 = arith.constant 2 : index
    %c0_94 = arith.constant 0 : index
    %c0_95 = arith.constant 0 : index
    %181 = vector.load %arg6[%c2_93, %c0_94, %c0_95] : memref<8x1x128xf32, #tpu.memory_space<vmem>>, vector<1x1x128xf32>
    %182 = vector.shape_cast %181 : vector<1x1x128xf32> to vector<1x128xf32>
    %c2_96 = arith.constant 2 : index
    %c0_97 = arith.constant 0 : index
    %c0_98 = arith.constant 0 : index
    %183 = vector.load %arg7[%c2_96, %c0_97, %c0_98] : memref<8x1x128xf32, #tpu.memory_space<vmem>>, vector<1x1x128xf32>
    %184 = vector.shape_cast %183 : vector<1x1x128xf32> to vector<1x128xf32>
    %c2_99 = arith.constant 2 : index
    %c0_100 = arith.constant 0 : index
    %c0_101 = arith.constant 0 : index
    %185 = vector.load %arg8[%c2_99, %c0_100, %c0_101] : memref<8x128x16xf32, #tpu.memory_space<vmem>>, vector<1x128x16xf32>
    %186 = vector.shape_cast %185 : vector<1x128x16xf32> to vector<128x16xf32>
    %c2_102 = arith.constant 2 : index
    %c0_103 = arith.constant 0 : index
    %c0_104 = arith.constant 0 : index
    %187 = vector.load %arg9[%c2_102, %c0_103, %c0_104] : memref<8x16x128xf32, #tpu.memory_space<vmem>>, vector<1x16x128xf32>
    %188 = vector.shape_cast %187 : vector<1x16x128xf32> to vector<16x128xf32>
    %cst_105 = arith.constant 1.250000e-01 : f32
    %189 = arith.mulf %12, %cst_105 : f32
    %cst_106 = arith.constant dense<0.000000e+00> : vector<16x128xf32>
    %190 = tpu.matmul %142, %178, %cst_106 {dimension_numbers = #tpu.dot_dimension_numbers<[1], [0], [0], [1], [0, 0, 1, 1], [], []>} : vector<16x128xf32>, vector<128x128xf32>, vector<16x128xf32> -> vector<16x128xf32>
    %191 = vector.broadcast %180 : vector<1x128xf32> to vector<16x128xf32>
    %192 = arith.addf %190, %191 : vector<16x128xf32>
    %193 = vector.broadcast %5 : vector<16x1xf32> to vector<16x128xf32>
    %194 = arith.mulf %192, %193 : vector<16x128xf32>
    %cst_107 = arith.constant dense<0.000000e+00> : vector<128xf32>
    %195 = vector.multi_reduction <add>, %194, %cst_107 [0] : vector<16x128xf32> to vector<128xf32>
    %196 = vector.shape_cast %195 : vector<128xf32> to vector<1x128xf32>
    %cst_108 = arith.constant dense<0.000000e+00> : vector<1x16xf32>
    %197 = tpu.matmul %196, %186, %cst_108 {dimension_numbers = #tpu.dot_dimension_numbers<[1], [0], [0], [1], [0, 0, 1, 1], [], []>} : vector<1x128xf32>, vector<128x16xf32>, vector<1x16xf32> -> vector<1x16xf32>
    %198 = vector.broadcast %189 : f32 to vector<1x16xf32>
    %199 = arith.mulf %197, %198 : vector<1x16xf32>
    %cst_109 = arith.constant dense<0.000000e+00> : vector<1x128xf32>
    %200 = tpu.matmul %199, %188, %cst_109 {dimension_numbers = #tpu.dot_dimension_numbers<[1], [0], [0], [1], [0, 0, 1, 1], [], []>} : vector<1x16xf32>, vector<16x128xf32>, vector<1x128xf32> -> vector<1x128xf32>
    %201 = vector.broadcast %200 : vector<1x128xf32> to vector<16x128xf32>
    %202 = arith.subf %194, %201 : vector<16x128xf32>
    %203 = arith.mulf %202, %202 : vector<16x128xf32>
    %204 = vector.broadcast %5 : vector<16x1xf32> to vector<16x128xf32>
    %205 = arith.mulf %203, %204 : vector<16x128xf32>
    %cst_110 = arith.constant dense<0.000000e+00> : vector<128xf32>
    %206 = vector.multi_reduction <add>, %205, %cst_110 [0] : vector<16x128xf32> to vector<128xf32>
    %207 = vector.shape_cast %206 : vector<128xf32> to vector<1x128xf32>
    %cst_111 = arith.constant dense<0.000000e+00> : vector<1x16xf32>
    %208 = tpu.matmul %207, %186, %cst_111 {dimension_numbers = #tpu.dot_dimension_numbers<[1], [0], [0], [1], [0, 0, 1, 1], [], []>} : vector<1x128xf32>, vector<128x16xf32>, vector<1x16xf32> -> vector<1x16xf32>
    %209 = vector.broadcast %189 : f32 to vector<1x16xf32>
    %210 = arith.mulf %208, %209 : vector<1x16xf32>
    %cst_112 = arith.constant dense<0.000000e+00> : vector<1x128xf32>
    %211 = tpu.matmul %210, %188, %cst_112 {dimension_numbers = #tpu.dot_dimension_numbers<[1], [0], [0], [1], [0, 0, 1, 1], [], []>} : vector<1x16xf32>, vector<16x128xf32>, vector<1x128xf32> -> vector<1x128xf32>
    %cst_113 = arith.constant 9.99999974E-6 : f32
    %212 = vector.broadcast %cst_113 : f32 to vector<1x128xf32>
    %213 = arith.addf %211, %212 : vector<1x128xf32>
    %214 = math.rsqrt %213 : vector<1x128xf32>
    %215 = vector.broadcast %214 : vector<1x128xf32> to vector<16x128xf32>
    %216 = arith.mulf %202, %215 : vector<16x128xf32>
    %217 = vector.broadcast %182 : vector<1x128xf32> to vector<16x128xf32>
    %218 = arith.mulf %216, %217 : vector<16x128xf32>
    %219 = vector.broadcast %184 : vector<1x128xf32> to vector<16x128xf32>
    %220 = arith.addf %218, %219 : vector<16x128xf32>
    %cst_114 = arith.constant 0.000000e+00 : f32
    %221 = vector.broadcast %cst_114 : f32 to vector<16x128xf32>
    %222 = arith.maximumf %220, %221 : vector<16x128xf32>
    %cst_115 = arith.constant 1.250000e-01 : f32
    %223 = arith.mulf %17, %cst_115 : f32
    %cst_116 = arith.constant dense<0.000000e+00> : vector<16x128xf32>
    %224 = tpu.matmul %176, %178, %cst_116 {dimension_numbers = #tpu.dot_dimension_numbers<[1], [0], [0], [1], [0, 0, 1, 1], [], []>} : vector<16x128xf32>, vector<128x128xf32>, vector<16x128xf32> -> vector<16x128xf32>
    %225 = vector.broadcast %180 : vector<1x128xf32> to vector<16x128xf32>
    %226 = arith.addf %224, %225 : vector<16x128xf32>
    %227 = vector.broadcast %7 : vector<16x1xf32> to vector<16x128xf32>
    %228 = arith.mulf %226, %227 : vector<16x128xf32>
    %cst_117 = arith.constant dense<0.000000e+00> : vector<128xf32>
    %229 = vector.multi_reduction <add>, %228, %cst_117 [0] : vector<16x128xf32> to vector<128xf32>
    %230 = vector.shape_cast %229 : vector<128xf32> to vector<1x128xf32>
    %cst_118 = arith.constant dense<0.000000e+00> : vector<1x16xf32>
    %231 = tpu.matmul %230, %186, %cst_118 {dimension_numbers = #tpu.dot_dimension_numbers<[1], [0], [0], [1], [0, 0, 1, 1], [], []>} : vector<1x128xf32>, vector<128x16xf32>, vector<1x16xf32> -> vector<1x16xf32>
    %232 = vector.broadcast %223 : f32 to vector<1x16xf32>
    %233 = arith.mulf %231, %232 : vector<1x16xf32>
    %cst_119 = arith.constant dense<0.000000e+00> : vector<1x128xf32>
    %234 = tpu.matmul %233, %188, %cst_119 {dimension_numbers = #tpu.dot_dimension_numbers<[1], [0], [0], [1], [0, 0, 1, 1], [], []>} : vector<1x16xf32>, vector<16x128xf32>, vector<1x128xf32> -> vector<1x128xf32>
    %235 = vector.broadcast %234 : vector<1x128xf32> to vector<16x128xf32>
    %236 = arith.subf %228, %235 : vector<16x128xf32>
    %237 = arith.mulf %236, %236 : vector<16x128xf32>
    %238 = vector.broadcast %7 : vector<16x1xf32> to vector<16x128xf32>
    %239 = arith.mulf %237, %238 : vector<16x128xf32>
    %cst_120 = arith.constant dense<0.000000e+00> : vector<128xf32>
    %240 = vector.multi_reduction <add>, %239, %cst_120 [0] : vector<16x128xf32> to vector<128xf32>
    %241 = vector.shape_cast %240 : vector<128xf32> to vector<1x128xf32>
    %cst_121 = arith.constant dense<0.000000e+00> : vector<1x16xf32>
    %242 = tpu.matmul %241, %186, %cst_121 {dimension_numbers = #tpu.dot_dimension_numbers<[1], [0], [0], [1], [0, 0, 1, 1], [], []>} : vector<1x128xf32>, vector<128x16xf32>, vector<1x16xf32> -> vector<1x16xf32>
    %243 = vector.broadcast %223 : f32 to vector<1x16xf32>
    %244 = arith.mulf %242, %243 : vector<1x16xf32>
    %cst_122 = arith.constant dense<0.000000e+00> : vector<1x128xf32>
    %245 = tpu.matmul %244, %188, %cst_122 {dimension_numbers = #tpu.dot_dimension_numbers<[1], [0], [0], [1], [0, 0, 1, 1], [], []>} : vector<1x16xf32>, vector<16x128xf32>, vector<1x128xf32> -> vector<1x128xf32>
    %cst_123 = arith.constant 9.99999974E-6 : f32
    %246 = vector.broadcast %cst_123 : f32 to vector<1x128xf32>
    %247 = arith.addf %245, %246 : vector<1x128xf32>
    %248 = math.rsqrt %247 : vector<1x128xf32>
    %249 = vector.broadcast %248 : vector<1x128xf32> to vector<16x128xf32>
    %250 = arith.mulf %236, %249 : vector<16x128xf32>
    %251 = vector.broadcast %182 : vector<1x128xf32> to vector<16x128xf32>
    %252 = arith.mulf %250, %251 : vector<16x128xf32>
    %253 = vector.broadcast %184 : vector<1x128xf32> to vector<16x128xf32>
    %254 = arith.addf %252, %253 : vector<16x128xf32>
    %cst_124 = arith.constant 0.000000e+00 : f32
    %255 = vector.broadcast %cst_124 : f32 to vector<16x128xf32>
    %256 = arith.maximumf %254, %255 : vector<16x128xf32>
    %c2_125 = arith.constant 2 : index
    %c0_126 = arith.constant 0 : index
    %c0_127 = arith.constant 0 : index
    %257 = vector.load %arg4[%c2_125, %c0_126, %c0_127] : memref<7x128x128xf32, #tpu.memory_space<vmem>>, vector<1x128x128xf32>
    %258 = vector.shape_cast %257 : vector<1x128x128xf32> to vector<128x128xf32>
    %c3 = arith.constant 3 : index
    %c0_128 = arith.constant 0 : index
    %c0_129 = arith.constant 0 : index
    %259 = vector.load %arg5[%c3, %c0_128, %c0_129] : memref<8x1x128xf32, #tpu.memory_space<vmem>>, vector<1x1x128xf32>
    %260 = vector.shape_cast %259 : vector<1x1x128xf32> to vector<1x128xf32>
    %c3_130 = arith.constant 3 : index
    %c0_131 = arith.constant 0 : index
    %c0_132 = arith.constant 0 : index
    %261 = vector.load %arg6[%c3_130, %c0_131, %c0_132] : memref<8x1x128xf32, #tpu.memory_space<vmem>>, vector<1x1x128xf32>
    %262 = vector.shape_cast %261 : vector<1x1x128xf32> to vector<1x128xf32>
    %c3_133 = arith.constant 3 : index
    %c0_134 = arith.constant 0 : index
    %c0_135 = arith.constant 0 : index
    %263 = vector.load %arg7[%c3_133, %c0_134, %c0_135] : memref<8x1x128xf32, #tpu.memory_space<vmem>>, vector<1x1x128xf32>
    %264 = vector.shape_cast %263 : vector<1x1x128xf32> to vector<1x128xf32>
    %c3_136 = arith.constant 3 : index
    %c0_137 = arith.constant 0 : index
    %c0_138 = arith.constant 0 : index
    %265 = vector.load %arg8[%c3_136, %c0_137, %c0_138] : memref<8x128x16xf32, #tpu.memory_space<vmem>>, vector<1x128x16xf32>
    %266 = vector.shape_cast %265 : vector<1x128x16xf32> to vector<128x16xf32>
    %c3_139 = arith.constant 3 : index
    %c0_140 = arith.constant 0 : index
    %c0_141 = arith.constant 0 : index
    %267 = vector.load %arg9[%c3_139, %c0_140, %c0_141] : memref<8x16x128xf32, #tpu.memory_space<vmem>>, vector<1x16x128xf32>
    %268 = vector.shape_cast %267 : vector<1x16x128xf32> to vector<16x128xf32>
    %cst_142 = arith.constant 1.250000e-01 : f32
    %269 = arith.mulf %12, %cst_142 : f32
    %cst_143 = arith.constant dense<0.000000e+00> : vector<16x128xf32>
    %270 = tpu.matmul %222, %258, %cst_143 {dimension_numbers = #tpu.dot_dimension_numbers<[1], [0], [0], [1], [0, 0, 1, 1], [], []>} : vector<16x128xf32>, vector<128x128xf32>, vector<16x128xf32> -> vector<16x128xf32>
    %271 = vector.broadcast %260 : vector<1x128xf32> to vector<16x128xf32>
    %272 = arith.addf %270, %271 : vector<16x128xf32>
    %273 = vector.broadcast %5 : vector<16x1xf32> to vector<16x128xf32>
    %274 = arith.mulf %272, %273 : vector<16x128xf32>
    %cst_144 = arith.constant dense<0.000000e+00> : vector<128xf32>
    %275 = vector.multi_reduction <add>, %274, %cst_144 [0] : vector<16x128xf32> to vector<128xf32>
    %276 = vector.shape_cast %275 : vector<128xf32> to vector<1x128xf32>
    %cst_145 = arith.constant dense<0.000000e+00> : vector<1x16xf32>
    %277 = tpu.matmul %276, %266, %cst_145 {dimension_numbers = #tpu.dot_dimension_numbers<[1], [0], [0], [1], [0, 0, 1, 1], [], []>} : vector<1x128xf32>, vector<128x16xf32>, vector<1x16xf32> -> vector<1x16xf32>
    %278 = vector.broadcast %269 : f32 to vector<1x16xf32>
    %279 = arith.mulf %277, %278 : vector<1x16xf32>
    %cst_146 = arith.constant dense<0.000000e+00> : vector<1x128xf32>
    %280 = tpu.matmul %279, %268, %cst_146 {dimension_numbers = #tpu.dot_dimension_numbers<[1], [0], [0], [1], [0, 0, 1, 1], [], []>} : vector<1x16xf32>, vector<16x128xf32>, vector<1x128xf32> -> vector<1x128xf32>
    %281 = vector.broadcast %280 : vector<1x128xf32> to vector<16x128xf32>
    %282 = arith.subf %274, %281 : vector<16x128xf32>
    %283 = arith.mulf %282, %282 : vector<16x128xf32>
    %284 = vector.broadcast %5 : vector<16x1xf32> to vector<16x128xf32>
    %285 = arith.mulf %283, %284 : vector<16x128xf32>
    %cst_147 = arith.constant dense<0.000000e+00> : vector<128xf32>
    %286 = vector.multi_reduction <add>, %285, %cst_147 [0] : vector<16x128xf32> to vector<128xf32>
    %287 = vector.shape_cast %286 : vector<128xf32> to vector<1x128xf32>
    %cst_148 = arith.constant dense<0.000000e+00> : vector<1x16xf32>
    %288 = tpu.matmul %287, %266, %cst_148 {dimension_numbers = #tpu.dot_dimension_numbers<[1], [0], [0], [1], [0, 0, 1, 1], [], []>} : vector<1x128xf32>, vector<128x16xf32>, vector<1x16xf32> -> vector<1x16xf32>
    %289 = vector.broadcast %269 : f32 to vector<1x16xf32>
    %290 = arith.mulf %288, %289 : vector<1x16xf32>
    %cst_149 = arith.constant dense<0.000000e+00> : vector<1x128xf32>
    %291 = tpu.matmul %290, %268, %cst_149 {dimension_numbers = #tpu.dot_dimension_numbers<[1], [0], [0], [1], [0, 0, 1, 1], [], []>} : vector<1x16xf32>, vector<16x128xf32>, vector<1x128xf32> -> vector<1x128xf32>
    %cst_150 = arith.constant 9.99999974E-6 : f32
    %292 = vector.broadcast %cst_150 : f32 to vector<1x128xf32>
    %293 = arith.addf %291, %292 : vector<1x128xf32>
    %294 = math.rsqrt %293 : vector<1x128xf32>
    %295 = vector.broadcast %294 : vector<1x128xf32> to vector<16x128xf32>
    %296 = arith.mulf %282, %295 : vector<16x128xf32>
    %297 = vector.broadcast %262 : vector<1x128xf32> to vector<16x128xf32>
    %298 = arith.mulf %296, %297 : vector<16x128xf32>
    %299 = vector.broadcast %264 : vector<1x128xf32> to vector<16x128xf32>
    %300 = arith.addf %298, %299 : vector<16x128xf32>
    %cst_151 = arith.constant 0.000000e+00 : f32
    %301 = vector.broadcast %cst_151 : f32 to vector<16x128xf32>
    %302 = arith.maximumf %300, %301 : vector<16x128xf32>
    %cst_152 = arith.constant 1.250000e-01 : f32
    %303 = arith.mulf %17, %cst_152 : f32
    %cst_153 = arith.constant dense<0.000000e+00> : vector<16x128xf32>
    %304 = tpu.matmul %256, %258, %cst_153 {dimension_numbers = #tpu.dot_dimension_numbers<[1], [0], [0], [1], [0, 0, 1, 1], [], []>} : vector<16x128xf32>, vector<128x128xf32>, vector<16x128xf32> -> vector<16x128xf32>
    %305 = vector.broadcast %260 : vector<1x128xf32> to vector<16x128xf32>
    %306 = arith.addf %304, %305 : vector<16x128xf32>
    %307 = vector.broadcast %7 : vector<16x1xf32> to vector<16x128xf32>
    %308 = arith.mulf %306, %307 : vector<16x128xf32>
    %cst_154 = arith.constant dense<0.000000e+00> : vector<128xf32>
    %309 = vector.multi_reduction <add>, %308, %cst_154 [0] : vector<16x128xf32> to vector<128xf32>
    %310 = vector.shape_cast %309 : vector<128xf32> to vector<1x128xf32>
    %cst_155 = arith.constant dense<0.000000e+00> : vector<1x16xf32>
    %311 = tpu.matmul %310, %266, %cst_155 {dimension_numbers = #tpu.dot_dimension_numbers<[1], [0], [0], [1], [0, 0, 1, 1], [], []>} : vector<1x128xf32>, vector<128x16xf32>, vector<1x16xf32> -> vector<1x16xf32>
    %312 = vector.broadcast %303 : f32 to vector<1x16xf32>
    %313 = arith.mulf %311, %312 : vector<1x16xf32>
    %cst_156 = arith.constant dense<0.000000e+00> : vector<1x128xf32>
    %314 = tpu.matmul %313, %268, %cst_156 {dimension_numbers = #tpu.dot_dimension_numbers<[1], [0], [0], [1], [0, 0, 1, 1], [], []>} : vector<1x16xf32>, vector<16x128xf32>, vector<1x128xf32> -> vector<1x128xf32>
    %315 = vector.broadcast %314 : vector<1x128xf32> to vector<16x128xf32>
    %316 = arith.subf %308, %315 : vector<16x128xf32>
    %317 = arith.mulf %316, %316 : vector<16x128xf32>
    %318 = vector.broadcast %7 : vector<16x1xf32> to vector<16x128xf32>
    %319 = arith.mulf %317, %318 : vector<16x128xf32>
    %cst_157 = arith.constant dense<0.000000e+00> : vector<128xf32>
    %320 = vector.multi_reduction <add>, %319, %cst_157 [0] : vector<16x128xf32> to vector<128xf32>
    %321 = vector.shape_cast %320 : vector<128xf32> to vector<1x128xf32>
    %cst_158 = arith.constant dense<0.000000e+00> : vector<1x16xf32>
    %322 = tpu.matmul %321, %266, %cst_158 {dimension_numbers = #tpu.dot_dimension_numbers<[1], [0], [0], [1], [0, 0, 1, 1], [], []>} : vector<1x128xf32>, vector<128x16xf32>, vector<1x16xf32> -> vector<1x16xf32>
    %323 = vector.broadcast %303 : f32 to vector<1x16xf32>
    %324 = arith.mulf %322, %323 : vector<1x16xf32>
    %cst_159 = arith.constant dense<0.000000e+00> : vector<1x128xf32>
    %325 = tpu.matmul %324, %268, %cst_159 {dimension_numbers = #tpu.dot_dimension_numbers<[1], [0], [0], [1], [0, 0, 1, 1], [], []>} : vector<1x16xf32>, vector<16x128xf32>, vector<1x128xf32> -> vector<1x128xf32>
    %cst_160 = arith.constant 9.99999974E-6 : f32
    %326 = vector.broadcast %cst_160 : f32 to vector<1x128xf32>
    %327 = arith.addf %325, %326 : vector<1x128xf32>
    %328 = math.rsqrt %327 : vector<1x128xf32>
    %329 = vector.broadcast %328 : vector<1x128xf32> to vector<16x128xf32>
    %330 = arith.mulf %316, %329 : vector<16x128xf32>
    %331 = vector.broadcast %262 : vector<1x128xf32> to vector<16x128xf32>
    %332 = arith.mulf %330, %331 : vector<16x128xf32>
    %333 = vector.broadcast %264 : vector<1x128xf32> to vector<16x128xf32>
    %334 = arith.addf %332, %333 : vector<16x128xf32>
    %cst_161 = arith.constant 0.000000e+00 : f32
    %335 = vector.broadcast %cst_161 : f32 to vector<16x128xf32>
    %336 = arith.maximumf %334, %335 : vector<16x128xf32>
    %c3_162 = arith.constant 3 : index
    %c0_163 = arith.constant 0 : index
    %c0_164 = arith.constant 0 : index
    %337 = vector.load %arg4[%c3_162, %c0_163, %c0_164] : memref<7x128x128xf32, #tpu.memory_space<vmem>>, vector<1x128x128xf32>
    %338 = vector.shape_cast %337 : vector<1x128x128xf32> to vector<128x128xf32>
    %c4 = arith.constant 4 : index
    %c0_165 = arith.constant 0 : index
    %c0_166 = arith.constant 0 : index
    %339 = vector.load %arg5[%c4, %c0_165, %c0_166] : memref<8x1x128xf32, #tpu.memory_space<vmem>>, vector<1x1x128xf32>
    %340 = vector.shape_cast %339 : vector<1x1x128xf32> to vector<1x128xf32>
    %c4_167 = arith.constant 4 : index
    %c0_168 = arith.constant 0 : index
    %c0_169 = arith.constant 0 : index
    %341 = vector.load %arg6[%c4_167, %c0_168, %c0_169] : memref<8x1x128xf32, #tpu.memory_space<vmem>>, vector<1x1x128xf32>
    %342 = vector.shape_cast %341 : vector<1x1x128xf32> to vector<1x128xf32>
    %c4_170 = arith.constant 4 : index
    %c0_171 = arith.constant 0 : index
    %c0_172 = arith.constant 0 : index
    %343 = vector.load %arg7[%c4_170, %c0_171, %c0_172] : memref<8x1x128xf32, #tpu.memory_space<vmem>>, vector<1x1x128xf32>
    %344 = vector.shape_cast %343 : vector<1x1x128xf32> to vector<1x128xf32>
    %c4_173 = arith.constant 4 : index
    %c0_174 = arith.constant 0 : index
    %c0_175 = arith.constant 0 : index
    %345 = vector.load %arg8[%c4_173, %c0_174, %c0_175] : memref<8x128x16xf32, #tpu.memory_space<vmem>>, vector<1x128x16xf32>
    %346 = vector.shape_cast %345 : vector<1x128x16xf32> to vector<128x16xf32>
    %c4_176 = arith.constant 4 : index
    %c0_177 = arith.constant 0 : index
    %c0_178 = arith.constant 0 : index
    %347 = vector.load %arg9[%c4_176, %c0_177, %c0_178] : memref<8x16x128xf32, #tpu.memory_space<vmem>>, vector<1x16x128xf32>
    %348 = vector.shape_cast %347 : vector<1x16x128xf32> to vector<16x128xf32>
    %cst_179 = arith.constant 1.250000e-01 : f32
    %349 = arith.mulf %12, %cst_179 : f32
    %cst_180 = arith.constant dense<0.000000e+00> : vector<16x128xf32>
    %350 = tpu.matmul %302, %338, %cst_180 {dimension_numbers = #tpu.dot_dimension_numbers<[1], [0], [0], [1], [0, 0, 1, 1], [], []>} : vector<16x128xf32>, vector<128x128xf32>, vector<16x128xf32> -> vector<16x128xf32>
    %351 = vector.broadcast %340 : vector<1x128xf32> to vector<16x128xf32>
    %352 = arith.addf %350, %351 : vector<16x128xf32>
    %353 = vector.broadcast %5 : vector<16x1xf32> to vector<16x128xf32>
    %354 = arith.mulf %352, %353 : vector<16x128xf32>
    %cst_181 = arith.constant dense<0.000000e+00> : vector<128xf32>
    %355 = vector.multi_reduction <add>, %354, %cst_181 [0] : vector<16x128xf32> to vector<128xf32>
    %356 = vector.shape_cast %355 : vector<128xf32> to vector<1x128xf32>
    %cst_182 = arith.constant dense<0.000000e+00> : vector<1x16xf32>
    %357 = tpu.matmul %356, %346, %cst_182 {dimension_numbers = #tpu.dot_dimension_numbers<[1], [0], [0], [1], [0, 0, 1, 1], [], []>} : vector<1x128xf32>, vector<128x16xf32>, vector<1x16xf32> -> vector<1x16xf32>
    %358 = vector.broadcast %349 : f32 to vector<1x16xf32>
    %359 = arith.mulf %357, %358 : vector<1x16xf32>
    %cst_183 = arith.constant dense<0.000000e+00> : vector<1x128xf32>
    %360 = tpu.matmul %359, %348, %cst_183 {dimension_numbers = #tpu.dot_dimension_numbers<[1], [0], [0], [1], [0, 0, 1, 1], [], []>} : vector<1x16xf32>, vector<16x128xf32>, vector<1x128xf32> -> vector<1x128xf32>
    %361 = vector.broadcast %360 : vector<1x128xf32> to vector<16x128xf32>
    %362 = arith.subf %354, %361 : vector<16x128xf32>
    %363 = arith.mulf %362, %362 : vector<16x128xf32>
    %364 = vector.broadcast %5 : vector<16x1xf32> to vector<16x128xf32>
    %365 = arith.mulf %363, %364 : vector<16x128xf32>
    %cst_184 = arith.constant dense<0.000000e+00> : vector<128xf32>
    %366 = vector.multi_reduction <add>, %365, %cst_184 [0] : vector<16x128xf32> to vector<128xf32>
    %367 = vector.shape_cast %366 : vector<128xf32> to vector<1x128xf32>
    %cst_185 = arith.constant dense<0.000000e+00> : vector<1x16xf32>
    %368 = tpu.matmul %367, %346, %cst_185 {dimension_numbers = #tpu.dot_dimension_numbers<[1], [0], [0], [1], [0, 0, 1, 1], [], []>} : vector<1x128xf32>, vector<128x16xf32>, vector<1x16xf32> -> vector<1x16xf32>
    %369 = vector.broadcast %349 : f32 to vector<1x16xf32>
    %370 = arith.mulf %368, %369 : vector<1x16xf32>
    %cst_186 = arith.constant dense<0.000000e+00> : vector<1x128xf32>
    %371 = tpu.matmul %370, %348, %cst_186 {dimension_numbers = #tpu.dot_dimension_numbers<[1], [0], [0], [1], [0, 0, 1, 1], [], []>} : vector<1x16xf32>, vector<16x128xf32>, vector<1x128xf32> -> vector<1x128xf32>
    %cst_187 = arith.constant 9.99999974E-6 : f32
    %372 = vector.broadcast %cst_187 : f32 to vector<1x128xf32>
    %373 = arith.addf %371, %372 : vector<1x128xf32>
    %374 = math.rsqrt %373 : vector<1x128xf32>
    %375 = vector.broadcast %374 : vector<1x128xf32> to vector<16x128xf32>
    %376 = arith.mulf %362, %375 : vector<16x128xf32>
    %377 = vector.broadcast %342 : vector<1x128xf32> to vector<16x128xf32>
    %378 = arith.mulf %376, %377 : vector<16x128xf32>
    %379 = vector.broadcast %344 : vector<1x128xf32> to vector<16x128xf32>
    %380 = arith.addf %378, %379 : vector<16x128xf32>
    %cst_188 = arith.constant 0.000000e+00 : f32
    %381 = vector.broadcast %cst_188 : f32 to vector<16x128xf32>
    %382 = arith.maximumf %380, %381 : vector<16x128xf32>
    %cst_189 = arith.constant 1.250000e-01 : f32
    %383 = arith.mulf %17, %cst_189 : f32
    %cst_190 = arith.constant dense<0.000000e+00> : vector<16x128xf32>
    %384 = tpu.matmul %336, %338, %cst_190 {dimension_numbers = #tpu.dot_dimension_numbers<[1], [0], [0], [1], [0, 0, 1, 1], [], []>} : vector<16x128xf32>, vector<128x128xf32>, vector<16x128xf32> -> vector<16x128xf32>
    %385 = vector.broadcast %340 : vector<1x128xf32> to vector<16x128xf32>
    %386 = arith.addf %384, %385 : vector<16x128xf32>
    %387 = vector.broadcast %7 : vector<16x1xf32> to vector<16x128xf32>
    %388 = arith.mulf %386, %387 : vector<16x128xf32>
    %cst_191 = arith.constant dense<0.000000e+00> : vector<128xf32>
    %389 = vector.multi_reduction <add>, %388, %cst_191 [0] : vector<16x128xf32> to vector<128xf32>
    %390 = vector.shape_cast %389 : vector<128xf32> to vector<1x128xf32>
    %cst_192 = arith.constant dense<0.000000e+00> : vector<1x16xf32>
    %391 = tpu.matmul %390, %346, %cst_192 {dimension_numbers = #tpu.dot_dimension_numbers<[1], [0], [0], [1], [0, 0, 1, 1], [], []>} : vector<1x128xf32>, vector<128x16xf32>, vector<1x16xf32> -> vector<1x16xf32>
    %392 = vector.broadcast %383 : f32 to vector<1x16xf32>
    %393 = arith.mulf %391, %392 : vector<1x16xf32>
    %cst_193 = arith.constant dense<0.000000e+00> : vector<1x128xf32>
    %394 = tpu.matmul %393, %348, %cst_193 {dimension_numbers = #tpu.dot_dimension_numbers<[1], [0], [0], [1], [0, 0, 1, 1], [], []>} : vector<1x16xf32>, vector<16x128xf32>, vector<1x128xf32> -> vector<1x128xf32>
    %395 = vector.broadcast %394 : vector<1x128xf32> to vector<16x128xf32>
    %396 = arith.subf %388, %395 : vector<16x128xf32>
    %397 = arith.mulf %396, %396 : vector<16x128xf32>
    %398 = vector.broadcast %7 : vector<16x1xf32> to vector<16x128xf32>
    %399 = arith.mulf %397, %398 : vector<16x128xf32>
    %cst_194 = arith.constant dense<0.000000e+00> : vector<128xf32>
    %400 = vector.multi_reduction <add>, %399, %cst_194 [0] : vector<16x128xf32> to vector<128xf32>
    %401 = vector.shape_cast %400 : vector<128xf32> to vector<1x128xf32>
    %cst_195 = arith.constant dense<0.000000e+00> : vector<1x16xf32>
    %402 = tpu.matmul %401, %346, %cst_195 {dimension_numbers = #tpu.dot_dimension_numbers<[1], [0], [0], [1], [0, 0, 1, 1], [], []>} : vector<1x128xf32>, vector<128x16xf32>, vector<1x16xf32> -> vector<1x16xf32>
    %403 = vector.broadcast %383 : f32 to vector<1x16xf32>
    %404 = arith.mulf %402, %403 : vector<1x16xf32>
    %cst_196 = arith.constant dense<0.000000e+00> : vector<1x128xf32>
    %405 = tpu.matmul %404, %348, %cst_196 {dimension_numbers = #tpu.dot_dimension_numbers<[1], [0], [0], [1], [0, 0, 1, 1], [], []>} : vector<1x16xf32>, vector<16x128xf32>, vector<1x128xf32> -> vector<1x128xf32>
    %cst_197 = arith.constant 9.99999974E-6 : f32
    %406 = vector.broadcast %cst_197 : f32 to vector<1x128xf32>
    %407 = arith.addf %405, %406 : vector<1x128xf32>
    %408 = math.rsqrt %407 : vector<1x128xf32>
    %409 = vector.broadcast %408 : vector<1x128xf32> to vector<16x128xf32>
    %410 = arith.mulf %396, %409 : vector<16x128xf32>
    %411 = vector.broadcast %342 : vector<1x128xf32> to vector<16x128xf32>
    %412 = arith.mulf %410, %411 : vector<16x128xf32>
    %413 = vector.broadcast %344 : vector<1x128xf32> to vector<16x128xf32>
    %414 = arith.addf %412, %413 : vector<16x128xf32>
    %cst_198 = arith.constant 0.000000e+00 : f32
    %415 = vector.broadcast %cst_198 : f32 to vector<16x128xf32>
    %416 = arith.maximumf %414, %415 : vector<16x128xf32>
    %c4_199 = arith.constant 4 : index
    %c0_200 = arith.constant 0 : index
    %c0_201 = arith.constant 0 : index
    %417 = vector.load %arg4[%c4_199, %c0_200, %c0_201] : memref<7x128x128xf32, #tpu.memory_space<vmem>>, vector<1x128x128xf32>
    %418 = vector.shape_cast %417 : vector<1x128x128xf32> to vector<128x128xf32>
    %c5 = arith.constant 5 : index
    %c0_202 = arith.constant 0 : index
    %c0_203 = arith.constant 0 : index
    %419 = vector.load %arg5[%c5, %c0_202, %c0_203] : memref<8x1x128xf32, #tpu.memory_space<vmem>>, vector<1x1x128xf32>
    %420 = vector.shape_cast %419 : vector<1x1x128xf32> to vector<1x128xf32>
    %c5_204 = arith.constant 5 : index
    %c0_205 = arith.constant 0 : index
    %c0_206 = arith.constant 0 : index
    %421 = vector.load %arg6[%c5_204, %c0_205, %c0_206] : memref<8x1x128xf32, #tpu.memory_space<vmem>>, vector<1x1x128xf32>
    %422 = vector.shape_cast %421 : vector<1x1x128xf32> to vector<1x128xf32>
    %c5_207 = arith.constant 5 : index
    %c0_208 = arith.constant 0 : index
    %c0_209 = arith.constant 0 : index
    %423 = vector.load %arg7[%c5_207, %c0_208, %c0_209] : memref<8x1x128xf32, #tpu.memory_space<vmem>>, vector<1x1x128xf32>
    %424 = vector.shape_cast %423 : vector<1x1x128xf32> to vector<1x128xf32>
    %c5_210 = arith.constant 5 : index
    %c0_211 = arith.constant 0 : index
    %c0_212 = arith.constant 0 : index
    %425 = vector.load %arg8[%c5_210, %c0_211, %c0_212] : memref<8x128x16xf32, #tpu.memory_space<vmem>>, vector<1x128x16xf32>
    %426 = vector.shape_cast %425 : vector<1x128x16xf32> to vector<128x16xf32>
    %c5_213 = arith.constant 5 : index
    %c0_214 = arith.constant 0 : index
    %c0_215 = arith.constant 0 : index
    %427 = vector.load %arg9[%c5_213, %c0_214, %c0_215] : memref<8x16x128xf32, #tpu.memory_space<vmem>>, vector<1x16x128xf32>
    %428 = vector.shape_cast %427 : vector<1x16x128xf32> to vector<16x128xf32>
    %cst_216 = arith.constant 1.250000e-01 : f32
    %429 = arith.mulf %12, %cst_216 : f32
    %cst_217 = arith.constant dense<0.000000e+00> : vector<16x128xf32>
    %430 = tpu.matmul %382, %418, %cst_217 {dimension_numbers = #tpu.dot_dimension_numbers<[1], [0], [0], [1], [0, 0, 1, 1], [], []>} : vector<16x128xf32>, vector<128x128xf32>, vector<16x128xf32> -> vector<16x128xf32>
    %431 = vector.broadcast %420 : vector<1x128xf32> to vector<16x128xf32>
    %432 = arith.addf %430, %431 : vector<16x128xf32>
    %433 = vector.broadcast %5 : vector<16x1xf32> to vector<16x128xf32>
    %434 = arith.mulf %432, %433 : vector<16x128xf32>
    %cst_218 = arith.constant dense<0.000000e+00> : vector<128xf32>
    %435 = vector.multi_reduction <add>, %434, %cst_218 [0] : vector<16x128xf32> to vector<128xf32>
    %436 = vector.shape_cast %435 : vector<128xf32> to vector<1x128xf32>
    %cst_219 = arith.constant dense<0.000000e+00> : vector<1x16xf32>
    %437 = tpu.matmul %436, %426, %cst_219 {dimension_numbers = #tpu.dot_dimension_numbers<[1], [0], [0], [1], [0, 0, 1, 1], [], []>} : vector<1x128xf32>, vector<128x16xf32>, vector<1x16xf32> -> vector<1x16xf32>
    %438 = vector.broadcast %429 : f32 to vector<1x16xf32>
    %439 = arith.mulf %437, %438 : vector<1x16xf32>
    %cst_220 = arith.constant dense<0.000000e+00> : vector<1x128xf32>
    %440 = tpu.matmul %439, %428, %cst_220 {dimension_numbers = #tpu.dot_dimension_numbers<[1], [0], [0], [1], [0, 0, 1, 1], [], []>} : vector<1x16xf32>, vector<16x128xf32>, vector<1x128xf32> -> vector<1x128xf32>
    %441 = vector.broadcast %440 : vector<1x128xf32> to vector<16x128xf32>
    %442 = arith.subf %434, %441 : vector<16x128xf32>
    %443 = arith.mulf %442, %442 : vector<16x128xf32>
    %444 = vector.broadcast %5 : vector<16x1xf32> to vector<16x128xf32>
    %445 = arith.mulf %443, %444 : vector<16x128xf32>
    %cst_221 = arith.constant dense<0.000000e+00> : vector<128xf32>
    %446 = vector.multi_reduction <add>, %445, %cst_221 [0] : vector<16x128xf32> to vector<128xf32>
    %447 = vector.shape_cast %446 : vector<128xf32> to vector<1x128xf32>
    %cst_222 = arith.constant dense<0.000000e+00> : vector<1x16xf32>
    %448 = tpu.matmul %447, %426, %cst_222 {dimension_numbers = #tpu.dot_dimension_numbers<[1], [0], [0], [1], [0, 0, 1, 1], [], []>} : vector<1x128xf32>, vector<128x16xf32>, vector<1x16xf32> -> vector<1x16xf32>
    %449 = vector.broadcast %429 : f32 to vector<1x16xf32>
    %450 = arith.mulf %448, %449 : vector<1x16xf32>
    %cst_223 = arith.constant dense<0.000000e+00> : vector<1x128xf32>
    %451 = tpu.matmul %450, %428, %cst_223 {dimension_numbers = #tpu.dot_dimension_numbers<[1], [0], [0], [1], [0, 0, 1, 1], [], []>} : vector<1x16xf32>, vector<16x128xf32>, vector<1x128xf32> -> vector<1x128xf32>
    %cst_224 = arith.constant 9.99999974E-6 : f32
    %452 = vector.broadcast %cst_224 : f32 to vector<1x128xf32>
    %453 = arith.addf %451, %452 : vector<1x128xf32>
    %454 = math.rsqrt %453 : vector<1x128xf32>
    %455 = vector.broadcast %454 : vector<1x128xf32> to vector<16x128xf32>
    %456 = arith.mulf %442, %455 : vector<16x128xf32>
    %457 = vector.broadcast %422 : vector<1x128xf32> to vector<16x128xf32>
    %458 = arith.mulf %456, %457 : vector<16x128xf32>
    %459 = vector.broadcast %424 : vector<1x128xf32> to vector<16x128xf32>
    %460 = arith.addf %458, %459 : vector<16x128xf32>
    %cst_225 = arith.constant 0.000000e+00 : f32
    %461 = vector.broadcast %cst_225 : f32 to vector<16x128xf32>
    %462 = arith.maximumf %460, %461 : vector<16x128xf32>
    %cst_226 = arith.constant 1.250000e-01 : f32
    %463 = arith.mulf %17, %cst_226 : f32
    %cst_227 = arith.constant dense<0.000000e+00> : vector<16x128xf32>
    %464 = tpu.matmul %416, %418, %cst_227 {dimension_numbers = #tpu.dot_dimension_numbers<[1], [0], [0], [1], [0, 0, 1, 1], [], []>} : vector<16x128xf32>, vector<128x128xf32>, vector<16x128xf32> -> vector<16x128xf32>
    %465 = vector.broadcast %420 : vector<1x128xf32> to vector<16x128xf32>
    %466 = arith.addf %464, %465 : vector<16x128xf32>
    %467 = vector.broadcast %7 : vector<16x1xf32> to vector<16x128xf32>
    %468 = arith.mulf %466, %467 : vector<16x128xf32>
    %cst_228 = arith.constant dense<0.000000e+00> : vector<128xf32>
    %469 = vector.multi_reduction <add>, %468, %cst_228 [0] : vector<16x128xf32> to vector<128xf32>
    %470 = vector.shape_cast %469 : vector<128xf32> to vector<1x128xf32>
    %cst_229 = arith.constant dense<0.000000e+00> : vector<1x16xf32>
    %471 = tpu.matmul %470, %426, %cst_229 {dimension_numbers = #tpu.dot_dimension_numbers<[1], [0], [0], [1], [0, 0, 1, 1], [], []>} : vector<1x128xf32>, vector<128x16xf32>, vector<1x16xf32> -> vector<1x16xf32>
    %472 = vector.broadcast %463 : f32 to vector<1x16xf32>
    %473 = arith.mulf %471, %472 : vector<1x16xf32>
    %cst_230 = arith.constant dense<0.000000e+00> : vector<1x128xf32>
    %474 = tpu.matmul %473, %428, %cst_230 {dimension_numbers = #tpu.dot_dimension_numbers<[1], [0], [0], [1], [0, 0, 1, 1], [], []>} : vector<1x16xf32>, vector<16x128xf32>, vector<1x128xf32> -> vector<1x128xf32>
    %475 = vector.broadcast %474 : vector<1x128xf32> to vector<16x128xf32>
    %476 = arith.subf %468, %475 : vector<16x128xf32>
    %477 = arith.mulf %476, %476 : vector<16x128xf32>
    %478 = vector.broadcast %7 : vector<16x1xf32> to vector<16x128xf32>
    %479 = arith.mulf %477, %478 : vector<16x128xf32>
    %cst_231 = arith.constant dense<0.000000e+00> : vector<128xf32>
    %480 = vector.multi_reduction <add>, %479, %cst_231 [0] : vector<16x128xf32> to vector<128xf32>
    %481 = vector.shape_cast %480 : vector<128xf32> to vector<1x128xf32>
    %cst_232 = arith.constant dense<0.000000e+00> : vector<1x16xf32>
    %482 = tpu.matmul %481, %426, %cst_232 {dimension_numbers = #tpu.dot_dimension_numbers<[1], [0], [0], [1], [0, 0, 1, 1], [], []>} : vector<1x128xf32>, vector<128x16xf32>, vector<1x16xf32> -> vector<1x16xf32>
    %483 = vector.broadcast %463 : f32 to vector<1x16xf32>
    %484 = arith.mulf %482, %483 : vector<1x16xf32>
    %cst_233 = arith.constant dense<0.000000e+00> : vector<1x128xf32>
    %485 = tpu.matmul %484, %428, %cst_233 {dimension_numbers = #tpu.dot_dimension_numbers<[1], [0], [0], [1], [0, 0, 1, 1], [], []>} : vector<1x16xf32>, vector<16x128xf32>, vector<1x128xf32> -> vector<1x128xf32>
    %cst_234 = arith.constant 9.99999974E-6 : f32
    %486 = vector.broadcast %cst_234 : f32 to vector<1x128xf32>
    %487 = arith.addf %485, %486 : vector<1x128xf32>
    %488 = math.rsqrt %487 : vector<1x128xf32>
    %489 = vector.broadcast %488 : vector<1x128xf32> to vector<16x128xf32>
    %490 = arith.mulf %476, %489 : vector<16x128xf32>
    %491 = vector.broadcast %422 : vector<1x128xf32> to vector<16x128xf32>
    %492 = arith.mulf %490, %491 : vector<16x128xf32>
    %493 = vector.broadcast %424 : vector<1x128xf32> to vector<16x128xf32>
    %494 = arith.addf %492, %493 : vector<16x128xf32>
    %cst_235 = arith.constant 0.000000e+00 : f32
    %495 = vector.broadcast %cst_235 : f32 to vector<16x128xf32>
    %496 = arith.maximumf %494, %495 : vector<16x128xf32>
    %c5_236 = arith.constant 5 : index
    %c0_237 = arith.constant 0 : index
    %c0_238 = arith.constant 0 : index
    %497 = vector.load %arg4[%c5_236, %c0_237, %c0_238] : memref<7x128x128xf32, #tpu.memory_space<vmem>>, vector<1x128x128xf32>
    %498 = vector.shape_cast %497 : vector<1x128x128xf32> to vector<128x128xf32>
    %c6 = arith.constant 6 : index
    %c0_239 = arith.constant 0 : index
    %c0_240 = arith.constant 0 : index
    %499 = vector.load %arg5[%c6, %c0_239, %c0_240] : memref<8x1x128xf32, #tpu.memory_space<vmem>>, vector<1x1x128xf32>
    %500 = vector.shape_cast %499 : vector<1x1x128xf32> to vector<1x128xf32>
    %c6_241 = arith.constant 6 : index
    %c0_242 = arith.constant 0 : index
    %c0_243 = arith.constant 0 : index
    %501 = vector.load %arg6[%c6_241, %c0_242, %c0_243] : memref<8x1x128xf32, #tpu.memory_space<vmem>>, vector<1x1x128xf32>
    %502 = vector.shape_cast %501 : vector<1x1x128xf32> to vector<1x128xf32>
    %c6_244 = arith.constant 6 : index
    %c0_245 = arith.constant 0 : index
    %c0_246 = arith.constant 0 : index
    %503 = vector.load %arg7[%c6_244, %c0_245, %c0_246] : memref<8x1x128xf32, #tpu.memory_space<vmem>>, vector<1x1x128xf32>
    %504 = vector.shape_cast %503 : vector<1x1x128xf32> to vector<1x128xf32>
    %c6_247 = arith.constant 6 : index
    %c0_248 = arith.constant 0 : index
    %c0_249 = arith.constant 0 : index
    %505 = vector.load %arg8[%c6_247, %c0_248, %c0_249] : memref<8x128x16xf32, #tpu.memory_space<vmem>>, vector<1x128x16xf32>
    %506 = vector.shape_cast %505 : vector<1x128x16xf32> to vector<128x16xf32>
    %c6_250 = arith.constant 6 : index
    %c0_251 = arith.constant 0 : index
    %c0_252 = arith.constant 0 : index
    %507 = vector.load %arg9[%c6_250, %c0_251, %c0_252] : memref<8x16x128xf32, #tpu.memory_space<vmem>>, vector<1x16x128xf32>
    %508 = vector.shape_cast %507 : vector<1x16x128xf32> to vector<16x128xf32>
    %cst_253 = arith.constant 1.250000e-01 : f32
    %509 = arith.mulf %12, %cst_253 : f32
    %cst_254 = arith.constant dense<0.000000e+00> : vector<16x128xf32>
    %510 = tpu.matmul %462, %498, %cst_254 {dimension_numbers = #tpu.dot_dimension_numbers<[1], [0], [0], [1], [0, 0, 1, 1], [], []>} : vector<16x128xf32>, vector<128x128xf32>, vector<16x128xf32> -> vector<16x128xf32>
    %511 = vector.broadcast %500 : vector<1x128xf32> to vector<16x128xf32>
    %512 = arith.addf %510, %511 : vector<16x128xf32>
    %513 = vector.broadcast %5 : vector<16x1xf32> to vector<16x128xf32>
    %514 = arith.mulf %512, %513 : vector<16x128xf32>
    %cst_255 = arith.constant dense<0.000000e+00> : vector<128xf32>
    %515 = vector.multi_reduction <add>, %514, %cst_255 [0] : vector<16x128xf32> to vector<128xf32>
    %516 = vector.shape_cast %515 : vector<128xf32> to vector<1x128xf32>
    %cst_256 = arith.constant dense<0.000000e+00> : vector<1x16xf32>
    %517 = tpu.matmul %516, %506, %cst_256 {dimension_numbers = #tpu.dot_dimension_numbers<[1], [0], [0], [1], [0, 0, 1, 1], [], []>} : vector<1x128xf32>, vector<128x16xf32>, vector<1x16xf32> -> vector<1x16xf32>
    %518 = vector.broadcast %509 : f32 to vector<1x16xf32>
    %519 = arith.mulf %517, %518 : vector<1x16xf32>
    %cst_257 = arith.constant dense<0.000000e+00> : vector<1x128xf32>
    %520 = tpu.matmul %519, %508, %cst_257 {dimension_numbers = #tpu.dot_dimension_numbers<[1], [0], [0], [1], [0, 0, 1, 1], [], []>} : vector<1x16xf32>, vector<16x128xf32>, vector<1x128xf32> -> vector<1x128xf32>
    %521 = vector.broadcast %520 : vector<1x128xf32> to vector<16x128xf32>
    %522 = arith.subf %514, %521 : vector<16x128xf32>
    %523 = arith.mulf %522, %522 : vector<16x128xf32>
    %524 = vector.broadcast %5 : vector<16x1xf32> to vector<16x128xf32>
    %525 = arith.mulf %523, %524 : vector<16x128xf32>
    %cst_258 = arith.constant dense<0.000000e+00> : vector<128xf32>
    %526 = vector.multi_reduction <add>, %525, %cst_258 [0] : vector<16x128xf32> to vector<128xf32>
    %527 = vector.shape_cast %526 : vector<128xf32> to vector<1x128xf32>
    %cst_259 = arith.constant dense<0.000000e+00> : vector<1x16xf32>
    %528 = tpu.matmul %527, %506, %cst_259 {dimension_numbers = #tpu.dot_dimension_numbers<[1], [0], [0], [1], [0, 0, 1, 1], [], []>} : vector<1x128xf32>, vector<128x16xf32>, vector<1x16xf32> -> vector<1x16xf32>
    %529 = vector.broadcast %509 : f32 to vector<1x16xf32>
    %530 = arith.mulf %528, %529 : vector<1x16xf32>
    %cst_260 = arith.constant dense<0.000000e+00> : vector<1x128xf32>
    %531 = tpu.matmul %530, %508, %cst_260 {dimension_numbers = #tpu.dot_dimension_numbers<[1], [0], [0], [1], [0, 0, 1, 1], [], []>} : vector<1x16xf32>, vector<16x128xf32>, vector<1x128xf32> -> vector<1x128xf32>
    %cst_261 = arith.constant 9.99999974E-6 : f32
    %532 = vector.broadcast %cst_261 : f32 to vector<1x128xf32>
    %533 = arith.addf %531, %532 : vector<1x128xf32>
    %534 = math.rsqrt %533 : vector<1x128xf32>
    %535 = vector.broadcast %534 : vector<1x128xf32> to vector<16x128xf32>
    %536 = arith.mulf %522, %535 : vector<16x128xf32>
    %537 = vector.broadcast %502 : vector<1x128xf32> to vector<16x128xf32>
    %538 = arith.mulf %536, %537 : vector<16x128xf32>
    %539 = vector.broadcast %504 : vector<1x128xf32> to vector<16x128xf32>
    %540 = arith.addf %538, %539 : vector<16x128xf32>
    %cst_262 = arith.constant 0.000000e+00 : f32
    %541 = vector.broadcast %cst_262 : f32 to vector<16x128xf32>
    %542 = arith.maximumf %540, %541 : vector<16x128xf32>
    %cst_263 = arith.constant 1.250000e-01 : f32
    %543 = arith.mulf %17, %cst_263 : f32
    %cst_264 = arith.constant dense<0.000000e+00> : vector<16x128xf32>
    %544 = tpu.matmul %496, %498, %cst_264 {dimension_numbers = #tpu.dot_dimension_numbers<[1], [0], [0], [1], [0, 0, 1, 1], [], []>} : vector<16x128xf32>, vector<128x128xf32>, vector<16x128xf32> -> vector<16x128xf32>
    %545 = vector.broadcast %500 : vector<1x128xf32> to vector<16x128xf32>
    %546 = arith.addf %544, %545 : vector<16x128xf32>
    %547 = vector.broadcast %7 : vector<16x1xf32> to vector<16x128xf32>
    %548 = arith.mulf %546, %547 : vector<16x128xf32>
    %cst_265 = arith.constant dense<0.000000e+00> : vector<128xf32>
    %549 = vector.multi_reduction <add>, %548, %cst_265 [0] : vector<16x128xf32> to vector<128xf32>
    %550 = vector.shape_cast %549 : vector<128xf32> to vector<1x128xf32>
    %cst_266 = arith.constant dense<0.000000e+00> : vector<1x16xf32>
    %551 = tpu.matmul %550, %506, %cst_266 {dimension_numbers = #tpu.dot_dimension_numbers<[1], [0], [0], [1], [0, 0, 1, 1], [], []>} : vector<1x128xf32>, vector<128x16xf32>, vector<1x16xf32> -> vector<1x16xf32>
    %552 = vector.broadcast %543 : f32 to vector<1x16xf32>
    %553 = arith.mulf %551, %552 : vector<1x16xf32>
    %cst_267 = arith.constant dense<0.000000e+00> : vector<1x128xf32>
    %554 = tpu.matmul %553, %508, %cst_267 {dimension_numbers = #tpu.dot_dimension_numbers<[1], [0], [0], [1], [0, 0, 1, 1], [], []>} : vector<1x16xf32>, vector<16x128xf32>, vector<1x128xf32> -> vector<1x128xf32>
    %555 = vector.broadcast %554 : vector<1x128xf32> to vector<16x128xf32>
    %556 = arith.subf %548, %555 : vector<16x128xf32>
    %557 = arith.mulf %556, %556 : vector<16x128xf32>
    %558 = vector.broadcast %7 : vector<16x1xf32> to vector<16x128xf32>
    %559 = arith.mulf %557, %558 : vector<16x128xf32>
    %cst_268 = arith.constant dense<0.000000e+00> : vector<128xf32>
    %560 = vector.multi_reduction <add>, %559, %cst_268 [0] : vector<16x128xf32> to vector<128xf32>
    %561 = vector.shape_cast %560 : vector<128xf32> to vector<1x128xf32>
    %cst_269 = arith.constant dense<0.000000e+00> : vector<1x16xf32>
    %562 = tpu.matmul %561, %506, %cst_269 {dimension_numbers = #tpu.dot_dimension_numbers<[1], [0], [0], [1], [0, 0, 1, 1], [], []>} : vector<1x128xf32>, vector<128x16xf32>, vector<1x16xf32> -> vector<1x16xf32>
    %563 = vector.broadcast %543 : f32 to vector<1x16xf32>
    %564 = arith.mulf %562, %563 : vector<1x16xf32>
    %cst_270 = arith.constant dense<0.000000e+00> : vector<1x128xf32>
    %565 = tpu.matmul %564, %508, %cst_270 {dimension_numbers = #tpu.dot_dimension_numbers<[1], [0], [0], [1], [0, 0, 1, 1], [], []>} : vector<1x16xf32>, vector<16x128xf32>, vector<1x128xf32> -> vector<1x128xf32>
    %cst_271 = arith.constant 9.99999974E-6 : f32
    %566 = vector.broadcast %cst_271 : f32 to vector<1x128xf32>
    %567 = arith.addf %565, %566 : vector<1x128xf32>
    %568 = math.rsqrt %567 : vector<1x128xf32>
    %569 = vector.broadcast %568 : vector<1x128xf32> to vector<16x128xf32>
    %570 = arith.mulf %556, %569 : vector<16x128xf32>
    %571 = vector.broadcast %502 : vector<1x128xf32> to vector<16x128xf32>
    %572 = arith.mulf %570, %571 : vector<16x128xf32>
    %573 = vector.broadcast %504 : vector<1x128xf32> to vector<16x128xf32>
    %574 = arith.addf %572, %573 : vector<16x128xf32>
    %cst_272 = arith.constant 0.000000e+00 : f32
    %575 = vector.broadcast %cst_272 : f32 to vector<16x128xf32>
    %576 = arith.maximumf %574, %575 : vector<16x128xf32>
    %c6_273 = arith.constant 6 : index
    %c0_274 = arith.constant 0 : index
    %c0_275 = arith.constant 0 : index
    %577 = vector.load %arg4[%c6_273, %c0_274, %c0_275] : memref<7x128x128xf32, #tpu.memory_space<vmem>>, vector<1x128x128xf32>
    %578 = vector.shape_cast %577 : vector<1x128x128xf32> to vector<128x128xf32>
    %c7 = arith.constant 7 : index
    %c0_276 = arith.constant 0 : index
    %c0_277 = arith.constant 0 : index
    %579 = vector.load %arg5[%c7, %c0_276, %c0_277] : memref<8x1x128xf32, #tpu.memory_space<vmem>>, vector<1x1x128xf32>
    %580 = vector.shape_cast %579 : vector<1x1x128xf32> to vector<1x128xf32>
    %c7_278 = arith.constant 7 : index
    %c0_279 = arith.constant 0 : index
    %c0_280 = arith.constant 0 : index
    %581 = vector.load %arg6[%c7_278, %c0_279, %c0_280] : memref<8x1x128xf32, #tpu.memory_space<vmem>>, vector<1x1x128xf32>
    %582 = vector.shape_cast %581 : vector<1x1x128xf32> to vector<1x128xf32>
    %c7_281 = arith.constant 7 : index
    %c0_282 = arith.constant 0 : index
    %c0_283 = arith.constant 0 : index
    %583 = vector.load %arg7[%c7_281, %c0_282, %c0_283] : memref<8x1x128xf32, #tpu.memory_space<vmem>>, vector<1x1x128xf32>
    %584 = vector.shape_cast %583 : vector<1x1x128xf32> to vector<1x128xf32>
    %c7_284 = arith.constant 7 : index
    %c0_285 = arith.constant 0 : index
    %c0_286 = arith.constant 0 : index
    %585 = vector.load %arg8[%c7_284, %c0_285, %c0_286] : memref<8x128x16xf32, #tpu.memory_space<vmem>>, vector<1x128x16xf32>
    %586 = vector.shape_cast %585 : vector<1x128x16xf32> to vector<128x16xf32>
    %c7_287 = arith.constant 7 : index
    %c0_288 = arith.constant 0 : index
    %c0_289 = arith.constant 0 : index
    %587 = vector.load %arg9[%c7_287, %c0_288, %c0_289] : memref<8x16x128xf32, #tpu.memory_space<vmem>>, vector<1x16x128xf32>
    %588 = vector.shape_cast %587 : vector<1x16x128xf32> to vector<16x128xf32>
    %cst_290 = arith.constant 1.250000e-01 : f32
    %589 = arith.mulf %12, %cst_290 : f32
    %cst_291 = arith.constant dense<0.000000e+00> : vector<16x128xf32>
    %590 = tpu.matmul %542, %578, %cst_291 {dimension_numbers = #tpu.dot_dimension_numbers<[1], [0], [0], [1], [0, 0, 1, 1], [], []>} : vector<16x128xf32>, vector<128x128xf32>, vector<16x128xf32> -> vector<16x128xf32>
    %591 = vector.broadcast %580 : vector<1x128xf32> to vector<16x128xf32>
    %592 = arith.addf %590, %591 : vector<16x128xf32>
    %593 = vector.broadcast %5 : vector<16x1xf32> to vector<16x128xf32>
    %594 = arith.mulf %592, %593 : vector<16x128xf32>
    %cst_292 = arith.constant dense<0.000000e+00> : vector<128xf32>
    %595 = vector.multi_reduction <add>, %594, %cst_292 [0] : vector<16x128xf32> to vector<128xf32>
    %596 = vector.shape_cast %595 : vector<128xf32> to vector<1x128xf32>
    %cst_293 = arith.constant dense<0.000000e+00> : vector<1x16xf32>
    %597 = tpu.matmul %596, %586, %cst_293 {dimension_numbers = #tpu.dot_dimension_numbers<[1], [0], [0], [1], [0, 0, 1, 1], [], []>} : vector<1x128xf32>, vector<128x16xf32>, vector<1x16xf32> -> vector<1x16xf32>
    %598 = vector.broadcast %589 : f32 to vector<1x16xf32>
    %599 = arith.mulf %597, %598 : vector<1x16xf32>
    %cst_294 = arith.constant dense<0.000000e+00> : vector<1x128xf32>
    %600 = tpu.matmul %599, %588, %cst_294 {dimension_numbers = #tpu.dot_dimension_numbers<[1], [0], [0], [1], [0, 0, 1, 1], [], []>} : vector<1x16xf32>, vector<16x128xf32>, vector<1x128xf32> -> vector<1x128xf32>
    %601 = vector.broadcast %600 : vector<1x128xf32> to vector<16x128xf32>
    %602 = arith.subf %594, %601 : vector<16x128xf32>
    %603 = arith.mulf %602, %602 : vector<16x128xf32>
    %604 = vector.broadcast %5 : vector<16x1xf32> to vector<16x128xf32>
    %605 = arith.mulf %603, %604 : vector<16x128xf32>
    %cst_295 = arith.constant dense<0.000000e+00> : vector<128xf32>
    %606 = vector.multi_reduction <add>, %605, %cst_295 [0] : vector<16x128xf32> to vector<128xf32>
    %607 = vector.shape_cast %606 : vector<128xf32> to vector<1x128xf32>
    %cst_296 = arith.constant dense<0.000000e+00> : vector<1x16xf32>
    %608 = tpu.matmul %607, %586, %cst_296 {dimension_numbers = #tpu.dot_dimension_numbers<[1], [0], [0], [1], [0, 0, 1, 1], [], []>} : vector<1x128xf32>, vector<128x16xf32>, vector<1x16xf32> -> vector<1x16xf32>
    %609 = vector.broadcast %589 : f32 to vector<1x16xf32>
    %610 = arith.mulf %608, %609 : vector<1x16xf32>
    %cst_297 = arith.constant dense<0.000000e+00> : vector<1x128xf32>
    %611 = tpu.matmul %610, %588, %cst_297 {dimension_numbers = #tpu.dot_dimension_numbers<[1], [0], [0], [1], [0, 0, 1, 1], [], []>} : vector<1x16xf32>, vector<16x128xf32>, vector<1x128xf32> -> vector<1x128xf32>
    %cst_298 = arith.constant 9.99999974E-6 : f32
    %612 = vector.broadcast %cst_298 : f32 to vector<1x128xf32>
    %613 = arith.addf %611, %612 : vector<1x128xf32>
    %614 = math.rsqrt %613 : vector<1x128xf32>
    %615 = vector.broadcast %614 : vector<1x128xf32> to vector<16x128xf32>
    %616 = arith.mulf %602, %615 : vector<16x128xf32>
    %617 = vector.broadcast %582 : vector<1x128xf32> to vector<16x128xf32>
    %618 = arith.mulf %616, %617 : vector<16x128xf32>
    %619 = vector.broadcast %584 : vector<1x128xf32> to vector<16x128xf32>
    %620 = arith.addf %618, %619 : vector<16x128xf32>
    %cst_299 = arith.constant 0.000000e+00 : f32
    %621 = vector.broadcast %cst_299 : f32 to vector<16x128xf32>
    %622 = arith.maximumf %620, %621 : vector<16x128xf32>
    %cst_300 = arith.constant 1.250000e-01 : f32
    %623 = arith.mulf %17, %cst_300 : f32
    %cst_301 = arith.constant dense<0.000000e+00> : vector<16x128xf32>
    %624 = tpu.matmul %576, %578, %cst_301 {dimension_numbers = #tpu.dot_dimension_numbers<[1], [0], [0], [1], [0, 0, 1, 1], [], []>} : vector<16x128xf32>, vector<128x128xf32>, vector<16x128xf32> -> vector<16x128xf32>
    %625 = vector.broadcast %580 : vector<1x128xf32> to vector<16x128xf32>
    %626 = arith.addf %624, %625 : vector<16x128xf32>
    %627 = vector.broadcast %7 : vector<16x1xf32> to vector<16x128xf32>
    %628 = arith.mulf %626, %627 : vector<16x128xf32>
    %cst_302 = arith.constant dense<0.000000e+00> : vector<128xf32>
    %629 = vector.multi_reduction <add>, %628, %cst_302 [0] : vector<16x128xf32> to vector<128xf32>
    %630 = vector.shape_cast %629 : vector<128xf32> to vector<1x128xf32>
    %cst_303 = arith.constant dense<0.000000e+00> : vector<1x16xf32>
    %631 = tpu.matmul %630, %586, %cst_303 {dimension_numbers = #tpu.dot_dimension_numbers<[1], [0], [0], [1], [0, 0, 1, 1], [], []>} : vector<1x128xf32>, vector<128x16xf32>, vector<1x16xf32> -> vector<1x16xf32>
    %632 = vector.broadcast %623 : f32 to vector<1x16xf32>
    %633 = arith.mulf %631, %632 : vector<1x16xf32>
    %cst_304 = arith.constant dense<0.000000e+00> : vector<1x128xf32>
    %634 = tpu.matmul %633, %588, %cst_304 {dimension_numbers = #tpu.dot_dimension_numbers<[1], [0], [0], [1], [0, 0, 1, 1], [], []>} : vector<1x16xf32>, vector<16x128xf32>, vector<1x128xf32> -> vector<1x128xf32>
    %635 = vector.broadcast %634 : vector<1x128xf32> to vector<16x128xf32>
    %636 = arith.subf %628, %635 : vector<16x128xf32>
    %637 = arith.mulf %636, %636 : vector<16x128xf32>
    %638 = vector.broadcast %7 : vector<16x1xf32> to vector<16x128xf32>
    %639 = arith.mulf %637, %638 : vector<16x128xf32>
    %cst_305 = arith.constant dense<0.000000e+00> : vector<128xf32>
    %640 = vector.multi_reduction <add>, %639, %cst_305 [0] : vector<16x128xf32> to vector<128xf32>
    %641 = vector.shape_cast %640 : vector<128xf32> to vector<1x128xf32>
    %cst_306 = arith.constant dense<0.000000e+00> : vector<1x16xf32>
    %642 = tpu.matmul %641, %586, %cst_306 {dimension_numbers = #tpu.dot_dimension_numbers<[1], [0], [0], [1], [0, 0, 1, 1], [], []>} : vector<1x128xf32>, vector<128x16xf32>, vector<1x16xf32> -> vector<1x16xf32>
    %643 = vector.broadcast %623 : f32 to vector<1x16xf32>
    %644 = arith.mulf %642, %643 : vector<1x16xf32>
    %cst_307 = arith.constant dense<0.000000e+00> : vector<1x128xf32>
    %645 = tpu.matmul %644, %588, %cst_307 {dimension_numbers = #tpu.dot_dimension_numbers<[1], [0], [0], [1], [0, 0, 1, 1], [], []>} : vector<1x16xf32>, vector<16x128xf32>, vector<1x128xf32> -> vector<1x128xf32>
    %cst_308 = arith.constant 9.99999974E-6 : f32
    %646 = vector.broadcast %cst_308 : f32 to vector<1x128xf32>
    %647 = arith.addf %645, %646 : vector<1x128xf32>
    %648 = math.rsqrt %647 : vector<1x128xf32>
    %649 = vector.broadcast %648 : vector<1x128xf32> to vector<16x128xf32>
    %650 = arith.mulf %636, %649 : vector<16x128xf32>
    %651 = vector.broadcast %582 : vector<1x128xf32> to vector<16x128xf32>
    %652 = arith.mulf %650, %651 : vector<16x128xf32>
    %653 = vector.broadcast %584 : vector<1x128xf32> to vector<16x128xf32>
    %654 = arith.addf %652, %653 : vector<16x128xf32>
    %cst_309 = arith.constant 0.000000e+00 : f32
    %655 = vector.broadcast %cst_309 : f32 to vector<16x128xf32>
    %656 = arith.maximumf %654, %655 : vector<16x128xf32>
    %657 = vector.broadcast %5 : vector<16x1xf32> to vector<16x128xf32>
    %658 = arith.mulf %622, %657 : vector<16x128xf32>
    %659 = vector.extract_strided_slice %658 {offsets = [0, 0], sizes = [16, 8], strides = [1, 1]} : vector<16x128xf32> to vector<16x8xf32>
    %c0_310 = arith.constant 0 : index
    %c0_311 = arith.constant 0 : index
    %c0_312 = arith.constant 0 : index
    %660 = vector.load %arg10[%c0_310, %c0_311, %c0_312] : memref<2x16x8xf32, #tpu.memory_space<vmem>>, vector<1x16x8xf32>
    %661 = vector.shape_cast %660 : vector<1x16x8xf32> to vector<16x8xf32>
    %662 = vector.shape_cast %659 : vector<16x8xf32> to vector<1x16x8xf32>
    tpu.vector_store %arg10[%c0_310, %c0_311, %c0_312], %662 {strides = array<i32>} : memref<2x16x8xf32, #tpu.memory_space<vmem>>, vector<1x16x8xf32>,
    %663 = vector.broadcast %7 : vector<16x1xf32> to vector<16x128xf32>
    %664 = arith.mulf %656, %663 : vector<16x128xf32>
    %665 = vector.extract_strided_slice %664 {offsets = [0, 0], sizes = [16, 8], strides = [1, 1]} : vector<16x128xf32> to vector<16x8xf32>
    %c1_313 = arith.constant 1 : index
    %c0_314 = arith.constant 0 : index
    %c0_315 = arith.constant 0 : index
    %666 = vector.load %arg10[%c1_313, %c0_314, %c0_315] : memref<2x16x8xf32, #tpu.memory_space<vmem>>, vector<1x16x8xf32>
    %667 = vector.shape_cast %666 : vector<1x16x8xf32> to vector<16x8xf32>
    %668 = vector.shape_cast %665 : vector<16x8xf32> to vector<1x16x8xf32>
    tpu.vector_store %arg10[%c1_313, %c0_314, %c0_315], %668 {strides = array<i32>} : memref<2x16x8xf32, #tpu.memory_space<vmem>>, vector<1x16x8xf32>,
    return
  }
  func.func @transform_0(%arg0: i32) -> (i32, i32, i32) {
    %c0_i32 = arith.constant 0 : i32
    %c0_i32_0 = arith.constant 0 : i32
    %c0_i32_1 = arith.constant 0 : i32
    return %arg0, %c0_i32, %c0_i32_0 : i32, i32, i32
  }
  func.func @transform_1(%arg0: i32) -> (i32, i32, i32) {
    %c0_i32 = arith.constant 0 : i32
    %c0_i32_0 = arith.constant 0 : i32
    %c0_i32_1 = arith.constant 0 : i32
    return %arg0, %c0_i32, %c0_i32_0 : i32, i32, i32
  }
  func.func @transform_2(%arg0: i32) -> (i32, i32) {
    %c0_i32 = arith.constant 0 : i32
    %c0_i32_0 = arith.constant 0 : i32
    %c0_i32_1 = arith.constant 0 : i32
    return %c0_i32, %c0_i32_0 : i32, i32
  }
  func.func @transform_3(%arg0: i32) -> (i32, i32, i32) {
    %c0_i32 = arith.constant 0 : i32
    %c0_i32_0 = arith.constant 0 : i32
    %c0_i32_1 = arith.constant 0 : i32
    %c0_i32_2 = arith.constant 0 : i32
    return %c0_i32, %c0_i32_0, %c0_i32_1 : i32, i32, i32
  }
  func.func @transform_4(%arg0: i32) -> (i32, i32, i32) {
    %c0_i32 = arith.constant 0 : i32
    %c0_i32_0 = arith.constant 0 : i32
    %c0_i32_1 = arith.constant 0 : i32
    %c0_i32_2 = arith.constant 0 : i32
    return %c0_i32, %c0_i32_0, %c0_i32_1 : i32, i32, i32
  }
  func.func @transform_5(%arg0: i32) -> (i32, i32, i32) {
    %c0_i32 = arith.constant 0 : i32
    %c0_i32_0 = arith.constant 0 : i32
    %c0_i32_1 = arith.constant 0 : i32
    %c0_i32_2 = arith.constant 0 : i32
    return %c0_i32, %c0_i32_0, %c0_i32_1 : i32, i32, i32
  }
  func.func @transform_6(%arg0: i32) -> (i32, i32, i32) {
    %c0_i32 = arith.constant 0 : i32
    %c0_i32_0 = arith.constant 0 : i32
    %c0_i32_1 = arith.constant 0 : i32
    %c0_i32_2 = arith.constant 0 : i32
    return %c0_i32, %c0_i32_0, %c0_i32_1 : i32, i32, i32
  }
  func.func @transform_7(%arg0: i32) -> (i32, i32, i32) {
    %c0_i32 = arith.constant 0 : i32
    %c0_i32_0 = arith.constant 0 : i32
    %c0_i32_1 = arith.constant 0 : i32
    %c0_i32_2 = arith.constant 0 : i32
    return %c0_i32, %c0_i32_0, %c0_i32_1 : i32, i32, i32
  }
  func.func @transform_8(%arg0: i32) -> (i32, i32, i32) {
    %c0_i32 = arith.constant 0 : i32
    %c0_i32_0 = arith.constant 0 : i32
    %c0_i32_1 = arith.constant 0 : i32
    %c0_i32_2 = arith.constant 0 : i32
    return %c0_i32, %c0_i32_0, %c0_i32_1 : i32, i32, i32
  }
  func.func @transform_9(%arg0: i32) -> (i32, i32, i32) {
    %c0_i32 = arith.constant 0 : i32
    %c0_i32_0 = arith.constant 0 : i32
    %c0_i32_1 = arith.constant 0 : i32
    return %arg0, %c0_i32, %c0_i32_0 : i32, i32, i32
  }
}

</mosaic_0001>

<bundles_post_ra>
// kernel: tpu_custom_call.1
= control target key start
LH: loop header
LB: loop body
LE: loop exit
PB: predicated region body
PF: predicated region fallthrough
CT: control target
= control target key end

     0   :  { %vm42_vm0 = vcmask 7168   ;;  %v3350_v2 = vmov 0   ;;  %vm126_vm1 = vcmask 130048   ;;  %s5995_s2 = inlined_call_operand.vmem [shape: f32[16,128], index: 2, kind: input, shape index: {}]   ;;  %s5996_s0 = inlined_call_operand.vmem [shape: f32[2,16,16], index: 0, kind: input, shape index: {}]   ;;  %s5997_s1 = inlined_call_operand.vmem [shape: f32[2,16,1], index: 1, kind: input, shape index: {}]   ;;  %s5998_s4 = inlined_call_operand.vmem [shape: f32[8,1,128], index: 4, kind: input, shape index: {}]   ;;  %s5999_s7 = inlined_call_operand.vmem [shape: f32[8,128,16], index: 7, kind: input, shape index: {}]   ;;  %s6000_s8 = inlined_call_operand.vmem [shape: f32[8,16,128], index: 8, kind: input, shape index: {}]   ;;  %s6001_s5 = inlined_call_operand.vmem [shape: f32[8,1,128], index: 5, kind: input, shape index: {}]   ;;  %s6002_s6 = inlined_call_operand.vmem [shape: f32[8,1,128], index: 6, kind: input, shape index: {}]   ;;  %s6003_s3 = inlined_call_operand.vmem [shape: f32[7,128,128], index: 3, kind: input, shape index: {}]   ;;  %s6004_s9 = inlined_call_operand.vmem [shape: f32[2,16,8], index: 9, kind: output, shape index: {}]  }
   0x1   :  { %v100_v0 = vld [vmem:[%s5995_s2 + $0x8] sm:$0xff]  ;;  %v99_v1 = vld [vmem:[%s5995_s2] sm:$0xff]  ;;  %3287 = vset.pattern.permute.xlu0 %v3350_v2  ;;  %3288 = vset.pattern.permute.xlu1 %v3350_v2  ;;  %v3426_v10 = vld [vmem:[%s5999_s7 + $0x78] sm:$0xff] }
   0x2   :  { %147 = vmatpush.msra.mxu0 %v100_v0  ;;  %v32_v3 = vld [vmem:[%s5996_s0] sm:$0xff]  ;;  %v38_v5 = vld [vmem:[%s5997_s1 + $0x8] sm:$0xff]  ;;  %3289 = vset.pattern.permute.xlu2 %v3350_v2  ;;  %v3431_v11 = vld [vmem:[%s5999_s7 + $0x70] sm:$0xff] }
   0x3   :  { %v37_v4 = vld [vmem:[%s5997_s1] sm:$0xff]  ;;  %v44_v7 = vsel %vm42_vm0, %v38_v5, 0.0  ;;  %v33_v9 = vld [vmem:[%s5996_s0 + $0x8] sm:$0xff]  ;;  %175 = vmatpush.msra.mxu1 %v3426_v10  ;;  %234 = vmatpush.msra.mxu3 %v3426_v10  ;;  %v3454_v14 = vld [vmem:[%s5999_s7 + $0x58] sm:$0xff] }
   0x4   :  { %158 = vperm.xlu0 %3287, %v37_v4   ;;  %v43_v6 = vsel %vm42_vm0, %v37_v4, 0.0  ;;  %148 = vmatpush.msra.mxu0 %v99_v1  ;;  %v3438_v12 = vld [vmem:[%s5999_s7 + $0x68] sm:$0xff]  ;;  %v3447_v13 = vld [vmem:[%s5999_s7 + $0x60] sm:$0xff]  ;;  %v3459_v15 = vld [vmem:[%s5999_s7 + $0x50] sm:$0xff] }
   0x5   :  { %v45_v8 = vadd.f32 %v44_v7, %v43_v6  ;;  %2997 = vmatmul.msk.f32.vlgmr.msra.gmra.mxu0 %vm126_vm1, %v32_v3  ;;  %176 = vmatpush.msra.mxu1 %v3431_v11  ;;  %v3468_v16 = vld [vmem:[%s5999_s7 + $0x48] sm:$0xff]  ;;  %v3475_v17 = vld [vmem:[%s5999_s7 + $0x40] sm:$0xff]  ;;  %v3482_v18 = vld [vmem:[%s5999_s7 + $0x38] sm:$0xff] }
   0x6   :  { %324 = vmatpush.msrb.mxu0 %v100_v0  ;;  %235 = vmatpush.msra.mxu3 %v3431_v11  ;;  %v3489_v19 = vld [vmem:[%s5999_s7 + $0x30] sm:$0xff]  ;;  %v3494_v20 = vld [vmem:[%s5999_s7 + $0x28] sm:$0xff]  ;;  %v3501_v21 = vld [vmem:[%s5999_s7 + $0x20] sm:$0xff] }
   0x7   :  { %46 = vadd.xlane.f32.xlu1 %v45_v8  ;;  %177 = vmatpush.msra.mxu1 %v3438_v12  ;;  %v3508_v22 = vld [vmem:[%s5999_s7 + $0x18] sm:$0xff]  ;;  %v3515_v23 = vld [vmem:[%s5999_s7 + $0x10] sm:$0xff]  ;;  %v3522_v24 = vld [vmem:[%s5999_s7 + $0x8] sm:$0xff] }
   0x8   :  { %325 = vmatpush.msrb.mxu0 %v99_v1  ;;  %236 = vmatpush.msra.mxu3 %v3438_v12  ;;  %v3529_v26 = vld [vmem:[%s5999_s7] sm:$0xff]  ;;  %v3573_v60 = vld [vmem:[%s6000_s8 + $0x8] sm:$0xff]  ;;  %v2993_v62 = vld [vmem:[%s5996_s0 + $0x10] sm:$0xff] }
   0x9   :  { %178 = vmatpush.msra.mxu1 %v3447_v13  ;;  %v3544_v35 = vld [vmem:[%s5998_s4] ss:$0 sm:$0xff]  ;;  %214 = vmatpush.msra.mxu2 %v3573_v60  ;;  %v2995_v63 = vld [vmem:[%s5997_s1 + $0x10] sm:$0xff]  ;;  %v2996_v0 = vld [vmem:[%s5997_s1 + $0x18] sm:$0xff] }
   0xa   :  { %237 = vmatpush.msra.mxu3 %v3447_v13  ;;  %391 = vmatpush.msra.mxu0 %v3573_v60  ;;  %v3580_v61 = vld [vmem:[%s6000_s8] sm:$0xff]  ;;  %v2994_v1 = vld [vmem:[%s5996_s0 + $0x18] sm:$0xff]  ;;  %v71_v6 = vsel %vm42_vm0, %v2995_v63, 0.0 }
   0xb   :  { %179 = vmatpush.msra.mxu1 %v3454_v14  ;;  %215 = vmatpush.msra.mxu2 %v3580_v61 }
   0xc   :  { %163 = vperm.xlu0 %3287, %v38_v5   ;;  %238 = vmatpush.msra.mxu3 %v3454_v14  ;;  %v72_v5 = vsel %vm42_vm0, %v2996_v0, 0.0 }
   0xd   :  { %2998 = vmatmul.msk.f32.gmra.mxu0 %vm126_vm1, %v33_v9  ;;  %180 = vmatpush.msra.mxu1 %v3459_v15  ;;  %v73_v7 = vadd.f32 %v72_v5, %v71_v6  ;;  %v481_v5 = vld [vmem:[%s6003_s3 + $0x38] sm:$0xff]  ;;  %v480_v6 = vld [vmem:[%s6003_s3 + $0x30] sm:$0xff] }
   0xe   :  { %239 = vmatpush.msra.mxu3 %v3459_v15  ;;  %392 = vmatpush.msra.mxu0 %v3580_v61 }
   0xf   :  { %181 = vmatpush.msra.mxu1 %v3468_v16  ;;  %272 = vmatpush.msrb.mxu2 %v3573_v60 }
  0x10   :  { %240 = vmatpush.msra.mxu3 %v3468_v16  ;;  %340 = vperm.xlu2 %3289, %v2996_v0   ;;  %v485_v0 = vld [vmem:[%s6003_s3 + $0x58] sm:$0xff] }
  0x11   :  { %182 = vmatpush.msra.mxu1 %v3475_v17  ;;  %273 = vmatpush.msrb.mxu2 %v3580_v61 }
  0x12   :  { %241 = vmatpush.msra.mxu3 %v3475_v17 }
  0x13   :  { %183 = vmatpush.msra.mxu1 %v3482_v18 }
  0x14   :  { %242 = vmatpush.msra.mxu3 %v3482_v18 }
  0x15   :  { %184 = vmatpush.msra.mxu1 %v3489_v19  ;;  %3001 = vmatmul.msk.f32.vlgmr.msrb.gmra.mxu0 %vm126_vm1, %v2993_v62  ;;  %v487_v62 = vld [vmem:[%s6003_s3 + $0x68] sm:$0xff] }
  0x16   :  { %243 = vmatpush.msra.mxu3 %v3489_v19 }
  0x17   :  { %185 = vmatpush.msra.mxu1 %v3494_v20 }
  0x18   :  { %244 = vmatpush.msra.mxu3 %v3494_v20 }
  0x19   :  { %186 = vmatpush.msra.mxu1 %v3501_v21 }
  0x1a   :  { %245 = vmatpush.msra.mxu3 %v3501_v21 }
  0x1b   :  { %187 = vmatpush.msra.mxu1 %v3508_v22 }
  0x1c   :  { %246 = vmatpush.msra.mxu3 %v3508_v22 }
  0x1d   :  { %188 = vmatpush.msra.mxu1 %v3515_v23  ;;  %3002 = vmatmul.msk.f32.gmra.mxu0 %vm126_vm1, %v2994_v1  ;;  %v484_v1 = vld [vmem:[%s6003_s3 + $0x50] sm:$0xff] }
  0x1e   :  { %247 = vmatpush.msra.mxu3 %v3515_v23 }
  0x1f   :  { %189 = vmatpush.msra.mxu1 %v3522_v24 }
  0x20   :  { %248 = vmatpush.msra.mxu3 %v3522_v24  ;;  %335 = vperm.xlu1 %3288, %v2995_v63   ;;  %v486_v63 = vld [vmem:[%s6003_s3 + $0x60] sm:$0xff] }
  0x21   :  { %190 = vmatpush.msra.mxu1 %v3529_v26 }
  0x22   :  { %249 = vmatpush.msra.mxu3 %v3529_v26 }
  0x23   :  { %411 = vmatpush.msrb.mxu1 %v3426_v10 }
  0x25   :  { %412 = vmatpush.msrb.mxu1 %v3431_v11 }
  0x27   :  { %413 = vmatpush.msrb.mxu1 %v3438_v12 }
  0x29   :  { %414 = vmatpush.msrb.mxu1 %v3447_v13 }
  0x2b   :  { %415 = vmatpush.msrb.mxu1 %v3454_v14 }
  0x2d   :  { %416 = vmatpush.msrb.mxu1 %v3459_v15 }
  0x2f   :  { %417 = vmatpush.msrb.mxu1 %v3468_v16 }
  0x31   :  { %418 = vmatpush.msrb.mxu1 %v3475_v17 }
  0x33   :  { %419 = vmatpush.msrb.mxu1 %v3482_v18 }
  0x35   :  { %420 = vmatpush.msrb.mxu1 %v3489_v19 }
  0x37   :  { %421 = vmatpush.msrb.mxu1 %v3494_v20 }
  0x39   :  { %422 = vmatpush.msrb.mxu1 %v3501_v21  ;;  %74 = vadd.xlane.f32.xlu2 %v73_v7  ;;  %v479_v7 = vld [vmem:[%s6003_s3 + $0x28] sm:$0xff] }
  0x3b   :  { %423 = vmatpush.msrb.mxu1 %v3508_v22 }
  0x3d   :  { %424 = vmatpush.msrb.mxu1 %v3515_v23 }
  0x3f   :  { %425 = vmatpush.msrb.mxu1 %v3522_v24 }
  0x41   :  { %426 = vmatpush.msrb.mxu1 %v3529_v26 }
  0x76   :  { %v3538_v31 = vpop.permute.xlu0 %158 }
  0x7a   :  { %v47_v25 = vpop.xlane.xlu1 %46 }
  0x7b   :  { %v48_v27 = vrot.slane %v47_v25, 4 }
  0x7d   :  { %v49_v28 = vadd.f32 %v48_v27, %v47_v25 }
  0x7e   :  { %v3552_v39 = vpop.permute.xlu0 %163 }
  0x7f   :  { %v50_v29 = vrot.slane %v49_v28, 2 }
  0x81   :  { %v51_v30 = vadd.f32 %v50_v29, %v49_v28 }
  0x82   :  { %v150_v32 = vpop.f32.mrf.mxu0 }
  0x83   :  { %v52_v33 = vrot.slane %v51_v30, 1  ;;  %v151_v36 = vadd.f32 %v3544_v35, %v150_v32 }
  0x85   :  { %v53_v34 = vadd.f32 %v52_v33, %v51_v30  ;;  %v3555_v40 = vmul.f32 %v3538_v31, %v151_v36 }
  0x87   :  { %3278 = vpush %v53_v34 }
  0x8a   :  { %v153_v37 = vpop.f32.mrf.mxu0 }
  0x8b   :  { %v154_v38 = vadd.f32 %v3544_v35, %v153_v37 }
  0x8d   :  { %v3558_v41 = vmul.f32 %v3552_v39, %v154_v38 }
  0x8f   :  { %v168_v42 = vadd.f32 %v3558_v41, %v3555_v40 }
  0x91   :  { %v169_v43 = vrot.slane %v168_v42, 4 }
  0x92   :  { %v3638_v34 = vpop.permute.xlu1 %335 }
  0x93   :  { %v170_v44 = vadd.f32 %v169_v43, %v168_v42 }
  0x95   :  { %v171_v45 = vrot.slane %v170_v44, 2 }
  0x97   :  { %v172_v46 = vadd.f32 %v171_v45, %v170_v44 }
  0x99   :  { %v173_v47 = vrot.slane %v172_v46, 1 }
  0x9b   :  { %v174_v48 = vadd.f32 %v173_v47, %v172_v46 }
  0x9d   :  { %191 = vmatmul.f32.vlgmr.msra.gmra.mxu1 %v174_v48 }
  0xb8   :  { %s3279_s11 = spop %3278 }
  0xb9   :  { %v55_v49 = vstv %s3279_s11 }
  0xba   :  { %3314 = vrcp.f32 %v55_v49  ;;  %v67_v52 = vand.u32 2147483648, %v55_v49  ;;  %vm61_vm2 = vweird.f32 %v55_v49  ;;  %v65_v54 = vand.u32 2147483647, %v55_v49 }
  0xbc   :  { %v68_v56 = vor.u32 1.1754944e-38, %v67_v52  ;;  %vm66_vm5 = vcmp.eq.f32.partialorder %v65_v54, 8.507059e+37 }
  0xc0   :  { %v3315_v50 = vpop.eup %3314 }
  0xc1   :  { %v57_v51 = vmul.f32 %v3315_v50, %v55_v49  ;;  %vm62_vm3 = vweird.f32 %v3315_v50 }
  0xc2   :  { %vm63_vm4 = vmor %vm61_vm2, %vm62_vm3 }
  0xc3   :  { %v58_v53 = vsub.f32 1.0, %v57_v51 }
  0xc5   :  { %v59_v55 = vmul.f32 %v3315_v50, %v58_v53 }
  0xc7   :  { %v60_v57 = vadd.f32 %v3315_v50, %v59_v55 }
  0xc9   :  { %v64_v58 = vsel %vm63_vm4, %v3315_v50, %v60_v57 }
  0xca   :  { %v69_v59 = vsel %vm66_vm5, %v68_v56, %v64_v58 }
  0xcb   :  { %3280 = vpush %v69_v59 }
  0xfc   :  { %s3281_s23 = spop %3280 }
  0xfd   :  { %s122_s24 = smul.f32 0.125, %s3281_s23 }
  0xff   :  { %v3600_v2 = vstv %s122_s24 }
 0x11a   :  { %v192_v3 = vpop.f32.mrf.mxu1 }
 0x11b   :  { %v196_v4 = vmul.f32 %v3600_v2, %v192_v3  ;;  %v483_v3 = vld [vmem:[%s6003_s3 + $0x48] sm:$0xff] }
 0x11d   :  { %2999 = vmatmul.msk.f32.vlgmr.msra.gmra.mxu2 %vm126_vm1, %v196_v4  ;;  %v482_v4 = vld [vmem:[%s6003_s3 + $0x40] sm:$0xff] }
 0x11e   :  { %352 = vmatpush.msra.mxu2 %v3426_v10 }
 0x120   :  { %353 = vmatpush.msra.mxu2 %v3431_v11 }
 0x122   :  { %354 = vmatpush.msra.mxu2 %v3438_v12 }
 0x124   :  { %355 = vmatpush.msra.mxu2 %v3447_v13 }
 0x126   :  { %356 = vmatpush.msra.mxu2 %v3454_v14 }
 0x128   :  { %357 = vmatpush.msra.mxu2 %v3459_v15 }
 0x12a   :  { %358 = vmatpush.msra.mxu2 %v3468_v16 }
 0x12c   :  { %359 = vmatpush.msra.mxu2 %v3475_v17 }
 0x12e   :  { %360 = vmatpush.msra.mxu2 %v3482_v18 }
 0x130   :  { %361 = vmatpush.msra.mxu2 %v3489_v19 }
 0x132   :  { %362 = vmatpush.msra.mxu2 %v3494_v20 }
 0x134   :  { %363 = vmatpush.msra.mxu2 %v3501_v21 }
 0x136   :  { %364 = vmatpush.msra.mxu2 %v3508_v22 }
 0x138   :  { %365 = vmatpush.msra.mxu2 %v3515_v23  ;;  %v3634_v23 = vpop.permute.xlu2 %340 }
 0x13a   :  { %366 = vmatpush.msra.mxu2 %v3522_v24  ;;  %v327_v24 = vpop.f32.mrf.mxu0 }
 0x13b   :  { %v328_v32 = vadd.f32 %v3544_v35, %v327_v24 }
 0x13c   :  { %367 = vmatpush.msra.mxu2 %v3529_v26 }
 0x13d   :  { %v3641_v37 = vmul.f32 %v3638_v34, %v328_v32  ;;  %v3713_v32 = vld [vmem:[%s6002_s6] ss:$0 sm:$0xff] }
 0x140   :  { %v75_v25 = vpop.xlane.xlu2 %74 }
 0x141   :  { %v76_v26 = vrot.slane %v75_v25, 4 }
 0x142   :  { %v330_v28 = vpop.f32.mrf.mxu0 }
 0x143   :  { %v77_v27 = vadd.f32 %v76_v26, %v75_v25  ;;  %v331_v33 = vadd.f32 %v3544_v35, %v330_v28 }
 0x145   :  { %v78_v29 = vrot.slane %v77_v27, 2  ;;  %v3644_v38 = vmul.f32 %v3634_v23, %v331_v33 }
 0x147   :  { %v79_v30 = vadd.f32 %v78_v29, %v77_v27  ;;  %v3707_v29 = vld [vmem:[%s6001_s5] ss:$0 sm:$0xff] }
 0x149   :  { %v80_v36 = vrot.slane %v79_v30, 1 }
 0x1a0   :  { %v217_v8 = vpop.f32.mrf.mxu2 }
 0x1a1   :  { %v220_v9 = vperm.slane %v217_v8, 0  ;;  %v478_v8 = vld [vmem:[%s6003_s3 + $0x20] sm:$0xff] }
 0x1a3   :  { %v3623_v10 = vsub.f32 %v3555_v40, %v220_v9  ;;  %v3626_v11 = vsub.f32 %v3558_v41, %v220_v9  ;;  %v81_v40 = vadd.f32 %v80_v36, %v79_v30  ;;  %v345_v41 = vadd.f32 %v3644_v38, %v3641_v37  ;;  %v477_v9 = vld [vmem:[%s6003_s3 + $0x18] sm:$0xff] }
 0x1a5   :  { %v223_v12 = vmul.f32 %v3623_v10, %v3623_v10  ;;  %v224_v13 = vmul.f32 %v3626_v11, %v3626_v11  ;;  %3282 = vpush %v81_v40  ;;  %v346_v42 = vrot.slane %v345_v41, 4 }
 0x1a7   :  { %v225_v14 = vmul.f32 %v223_v12, %v3538_v31  ;;  %v226_v15 = vmul.f32 %v224_v13, %v3552_v39  ;;  %v347_v43 = vadd.f32 %v346_v42, %v345_v41  ;;  %v476_v12 = vld [vmem:[%s6003_s3 + $0x10] sm:$0xff]  ;;  %v475_v13 = vld [vmem:[%s6003_s3 + $0x8] sm:$0xff] }
 0x1a9   :  { %v227_v16 = vadd.f32 %v226_v15, %v225_v14  ;;  %v348_v44 = vrot.slane %v347_v43, 2  ;;  %v474_v14 = vld [vmem:[%s6003_s3] sm:$0xff] }
 0x1ab   :  { %v228_v17 = vrot.slane %v227_v16, 4  ;;  %v349_v46 = vadd.f32 %v348_v44, %v347_v43  ;;  %v3728_v44 = vld [vmem:[%s5999_s7 + $0xf0] sm:$0xff] }
 0x1ad   :  { %v229_v18 = vadd.f32 %v228_v17, %v227_v16  ;;  %v350_v47 = vrot.slane %v349_v46, 1 }
 0x1af   :  { %v230_v19 = vrot.slane %v229_v18, 2  ;;  %v351_v48 = vadd.f32 %v350_v47, %v349_v46  ;;  %v3747_v46 = vld [vmem:[%s5999_s7 + $0xd8] sm:$0xff]  ;;  %v3752_v47 = vld [vmem:[%s5999_s7 + $0xd0] sm:$0xff] }
 0x1b1   :  { %v231_v20 = vadd.f32 %v230_v19, %v229_v18 }
 0x1b3   :  { %v232_v21 = vrot.slane %v231_v20, 1 }
 0x1b5   :  { %v233_v22 = vadd.f32 %v232_v21, %v231_v20 }
 0x1b7   :  { %250 = vmatmul.f32.vlgmr.msra.gmra.mxu3 %v233_v22 }
 0x1d6   :  { %s3283_s0 = spop %3282 }
 0x1d7   :  { %v83_v49 = vstv %s3283_s0 }
 0x1d8   :  { %3316 = vrcp.f32 %v83_v49  ;;  %v95_v52 = vand.u32 2147483648, %v83_v49  ;;  %vm89_vm6 = vweird.f32 %v83_v49  ;;  %v93_v54 = vand.u32 2147483647, %v83_v49 }
 0x1da   :  { %v96_v56 = vor.u32 1.1754944e-38, %v95_v52  ;;  %vm94_vm9 = vcmp.eq.f32.partialorder %v93_v54, 8.507059e+37 }
 0x1de   :  { %v3317_v50 = vpop.eup %3316 }
 0x1df   :  { %v85_v51 = vmul.f32 %v3317_v50, %v83_v49  ;;  %vm90_vm7 = vweird.f32 %v3317_v50  ;;  %v3765_v49 = vld [vmem:[%s5999_s7 + $0xc0] sm:$0xff] }
 0x1e0   :  { %vm91_vm8 = vmor %vm89_vm6, %vm90_vm7 }
 0x1e1   :  { %v86_v53 = vsub.f32 1.0, %v85_v51 }
 0x1e3   :  { %v87_v55 = vmul.f32 %v3317_v50, %v86_v53  ;;  %v3777_v53 = vld [vmem:[%s5999_s7 + $0xb0] sm:$0xff] }
 0x1e5   :  { %v88_v57 = vadd.f32 %v3317_v50, %v87_v55 }
 0x1e7   :  { %v92_v58 = vsel %vm91_vm8, %v3317_v50, %v88_v57  ;;  %v3771_v50 = vld [vmem:[%s5999_s7 + $0xb8] sm:$0xff] }
 0x1e8   :  { %v97_v59 = vsel %vm94_vm9, %v96_v56, %v92_v58  ;;  %v3789_v56 = vld [vmem:[%s5999_s7 + $0xa8] sm:$0xff] }
 0x1e9   :  { %3284 = vpush %v97_v59 }
 0x21a   :  { %s3285_s11 = spop %3284 }
 0x21b   :  { %s303_s12 = smul.f32 0.125, %s3285_s11 }
 0x21d   :  { %v3700_v17 = vstv %s303_s12 }
 0x23a   :  { %v251_v45 = vpop.f32.mrf.mxu3 }
 0x23b   :  { %v254_v35 = vmul.f32 %v251_v45, %v3600_v2  ;;  %v3735_v45 = vld [vmem:[%s5999_s7 + $0xe8] sm:$0xff] }
 0x23d   :  { %3000 = vmatmul.msk.f32.vlgmr.msrb.gmra.mxu2 %vm126_vm1, %v254_v35  ;;  %v3741_v35 = vld [vmem:[%s5999_s7 + $0xe0] sm:$0xff] }
 0x23e   :  { %449 = vmatpush.msrb.mxu2 %v3573_v60  ;;  %v489_v60 = vld [vmem:[%s6003_s3 + $0x78] sm:$0xff] }
 0x23f   :  { %519 = vmatpush.msrb.mxu0 %v489_v60 }
 0x240   :  { %450 = vmatpush.msrb.mxu2 %v3580_v61  ;;  %v488_v61 = vld [vmem:[%s6003_s3 + $0x70] sm:$0xff] }
 0x241   :  { %520 = vmatpush.msrb.mxu0 %v488_v61 }
 0x243   :  { %521 = vmatpush.msrb.mxu0 %v487_v62 }
 0x245   :  { %368 = vmatmul.f32.vlgmr.msra.gmra.mxu2 %v351_v48  ;;  %522 = vmatpush.msrb.mxu0 %v486_v63  ;;  %v3759_v48 = vld [vmem:[%s5999_s7 + $0xc8] sm:$0xff] }
 0x247   :  { %523 = vmatpush.msrb.mxu0 %v485_v0 }
 0x249   :  { %524 = vmatpush.msrb.mxu0 %v484_v1 }
 0x24b   :  { %525 = vmatpush.msrb.mxu0 %v483_v3 }
 0x24d   :  { %526 = vmatpush.msrb.mxu0 %v482_v4 }
 0x24f   :  { %527 = vmatpush.msrb.mxu0 %v481_v5 }
 0x251   :  { %528 = vmatpush.msrb.mxu0 %v480_v6 }
 0x253   :  { %529 = vmatpush.msrb.mxu0 %v479_v7 }
 0x255   :  { %530 = vmatpush.msrb.mxu0 %v478_v8 }
 0x257   :  { %531 = vmatpush.msrb.mxu0 %v477_v9 }
 0x259   :  { %532 = vmatpush.msrb.mxu0 %v476_v12 }
 0x25b   :  { %533 = vmatpush.msrb.mxu0 %v475_v13 }
 0x25d   :  { %534 = vmatpush.msrb.mxu0 %v474_v14 }
 0x2c0   :  { %v275_v15 = vpop.f32.mrf.mxu2 }
 0x2c1   :  { %v276_v16 = vadd.f32 1e-05, %v275_v15 }
 0x2c3   :  { %3318 = vrsqrt.f32 %v276_v16  ;;  %vm284_vm11 = vweird.f32 %v276_v16 }
 0x2c8   :  { %v369_v18 = vpop.f32.mrf.mxu2 }
 0x2c9   :  { %v3319_v19 = vpop.eup %3318  ;;  %v373_v20 = vmul.f32 %v3700_v17, %v369_v18 }
 0x2ca   :  { %v279_v21 = vmul.f32 %v3319_v19, %v276_v16  ;;  %vm285_vm10 = vweird.f32 %v3319_v19 }
 0x2cb   :  { %3003 = vmatmul.msk.f32.vlgmr.msra.gmra.mxu0 %vm126_vm1, %v373_v20  ;;  %vm286_vm12 = vmor %vm284_vm11, %vm285_vm10 }
 0x2cc   :  { %v280_v22 = vmul.f32 %v3319_v19, %v279_v21  ;;  %678 = vmatpush.msra.mxu0 %v489_v60 }
 0x2ce   :  { %v281_v24 = vmul.f32 0.5, %v280_v22  ;;  %679 = vmatpush.msra.mxu0 %v488_v61  ;;  %v3812_v61 = vld [vmem:[%s5999_s7 + $0x90] sm:$0xff] }
 0x2d0   :  { %v282_v25 = vsub.f32 1.5, %v281_v24  ;;  %680 = vmatpush.msra.mxu0 %v487_v62 }
 0x2d2   :  { %v283_v26 = vmul.f32 %v3319_v19, %v282_v25  ;;  %681 = vmatpush.msra.mxu0 %v486_v63  ;;  %v3818_v63 = vld [vmem:[%s5999_s7 + $0x88] sm:$0xff] }
 0x2d4   :  { %v287_v27 = vsel %vm286_vm12, %v3319_v19, %v283_v26  ;;  %682 = vmatpush.msra.mxu0 %v485_v0  ;;  %v3025_v26 = vld [vmem:[%s6000_s8 + $0x18] sm:$0xff] }
 0x2d5   :  { %v288_v28 = vperm.slane %v287_v27, 0  ;;  %v3024_v27 = vld [vmem:[%s6000_s8 + $0x10] sm:$0xff]  ;;  %589 = vmatpush.msra.mxu2 %v3025_v26  ;;  %647 = vmatpush.msra.mxu1 %v3025_v26 }
 0x2d6   :  { %683 = vmatpush.msra.mxu0 %v484_v1  ;;  %v3824_v1 = vld [vmem:[%s5999_s7 + $0x80] sm:$0xff] }
 0x2d7   :  { %v289_v30 = vmul.f32 %v288_v28, %v3623_v10  ;;  %v290_v36 = vmul.f32 %v288_v28, %v3626_v11  ;;  %v3723_v11 = vld [vmem:[%s5999_s7 + $0xf8] sm:$0xff]  ;;  %590 = vmatpush.msra.mxu2 %v3024_v27  ;;  %648 = vmatpush.msra.mxu1 %v3024_v27 }
 0x2d8   :  { %684 = vmatpush.msra.mxu0 %v483_v3  ;;  %551 = vmatpush.msrb.mxu3 %v3723_v11 }
 0x2d9   :  { %v294_v33 = vmul.f32 %v3707_v29, %v289_v30  ;;  %v295_v42 = vmul.f32 %v3707_v29, %v290_v36 }
 0x2da   :  { %685 = vmatpush.msra.mxu0 %v482_v4  ;;  %552 = vmatpush.msrb.mxu3 %v3728_v44 }
 0x2db   :  { %v299_v40 = vadd.f32 %v3713_v32, %v294_v33  ;;  %v300_v10 = vadd.f32 %v3713_v32, %v295_v42 }
 0x2dc   :  { %686 = vmatpush.msra.mxu0 %v481_v5  ;;  %553 = vmatpush.msrb.mxu3 %v3735_v45 }
 0x2dd   :  { %v301_v41 = vmax.f32 %v299_v40, 0.0  ;;  %v302_v43 = vmax.f32 %v300_v10, 0.0 }
 0x2de   :  { %687 = vmatpush.msra.mxu0 %v480_v6  ;;  %554 = vmatpush.msrb.mxu3 %v3741_v35 }
 0x2df   :  { %535 = vmatmul.f32.vlgmr.msrb.gmra.mxu0 %v301_v41 }
 0x2e0   :  { %688 = vmatpush.msra.mxu0 %v479_v7  ;;  %555 = vmatpush.msrb.mxu3 %v3747_v46 }
 0x2e2   :  { %689 = vmatpush.msra.mxu0 %v478_v8  ;;  %556 = vmatpush.msrb.mxu3 %v3752_v47 }
 0x2e4   :  { %690 = vmatpush.msra.mxu0 %v477_v9  ;;  %557 = vmatpush.msrb.mxu3 %v3759_v48  ;;  %v3831_v9 = vld [vmem:[%s5998_s4 + $0x1] ss:$0 sm:$0xff] }
 0x2e6   :  { %691 = vmatpush.msra.mxu0 %v476_v12  ;;  %558 = vmatpush.msrb.mxu3 %v3765_v49 }
 0x2e7   :  { %538 = vmatmul.f32.gmra.mxu0 %v302_v43 }
 0x2e8   :  { %692 = vmatpush.msra.mxu0 %v475_v13  ;;  %559 = vmatpush.msrb.mxu3 %v3771_v50 }
 0x2ea   :  { %693 = vmatpush.msra.mxu0 %v474_v14  ;;  %560 = vmatpush.msrb.mxu3 %v3777_v53 }
 0x2ec   :  { %561 = vmatpush.msrb.mxu3 %v3789_v56 }
 0x348   :  { %v394_v51 = vpop.f32.mrf.mxu0 }
 0x349   :  { %v397_v52 = vperm.slane %v394_v51, 0 }
 0x34b   :  { %v3781_v54 = vsub.f32 %v3641_v37, %v397_v52  ;;  %v3784_v55 = vsub.f32 %v3644_v38, %v397_v52  ;;  %v3799_v37 = vld [vmem:[%s5999_s7 + $0xa0] sm:$0xff]  ;;  %v3804_v38 = vld [vmem:[%s5999_s7 + $0x98] sm:$0xff] }
 0x34c   :  { %562 = vmatpush.msrb.mxu3 %v3799_v37 }
 0x34d   :  { %v400_v57 = vmul.f32 %v3781_v54, %v3781_v54  ;;  %v401_v58 = vmul.f32 %v3784_v55, %v3784_v55 }
 0x34e   :  { %563 = vmatpush.msrb.mxu3 %v3804_v38 }
 0x34f   :  { %v402_v59 = vmul.f32 %v400_v57, %v3638_v34  ;;  %v403_v60 = vmul.f32 %v401_v58, %v3634_v23 }
 0x350   :  { %564 = vmatpush.msrb.mxu3 %v3812_v61 }
 0x351   :  { %v404_v62 = vadd.f32 %v403_v60, %v402_v59 }
 0x352   :  { %565 = vmatpush.msrb.mxu3 %v3818_v63 }
 0x353   :  { %v405_v0 = vrot.slane %v404_v62, 4 }
 0x354   :  { %566 = vmatpush.msrb.mxu3 %v3824_v1 }
 0x355   :  { %v406_v3 = vadd.f32 %v405_v0, %v404_v62 }
 0x356   :  { %748 = vmatpush.msra.mxu3 %v3025_v26 }
 0x357   :  { %v407_v4 = vrot.slane %v406_v3, 2 }
 0x358   :  { %749 = vmatpush.msra.mxu3 %v3024_v27 }
 0x359   :  { %v408_v5 = vadd.f32 %v407_v4, %v406_v3 }
 0x35b   :  { %v409_v6 = vrot.slane %v408_v5, 1 }
 0x35c   :  { %v536_v7 = vpop.f32.mrf.mxu0 }
 0x35d   :  { %v410_v8 = vadd.f32 %v409_v6, %v408_v5  ;;  %v537_v12 = vadd.f32 %v3831_v9, %v536_v7 }
 0x35f   :  { %427 = vmatmul.f32.vlgmr.msrb.gmra.mxu1 %v410_v8  ;;  %v3836_v15 = vmul.f32 %v537_v12, %v3538_v31 }
 0x360   :  { %710 = vmatpush.msrb.mxu1 %v3723_v11 }
 0x362   :  { %711 = vmatpush.msrb.mxu1 %v3728_v44 }
 0x364   :  { %v539_v13 = vpop.f32.mrf.mxu0  ;;  %712 = vmatpush.msrb.mxu1 %v3735_v45 }
 0x365   :  { %v540_v14 = vadd.f32 %v3831_v9, %v539_v13 }
 0x366   :  { %713 = vmatpush.msrb.mxu1 %v3741_v35 }
 0x367   :  { %v3839_v16 = vmul.f32 %v540_v14, %v3552_v39 }
 0x368   :  { %714 = vmatpush.msrb.mxu1 %v3747_v46 }
 0x369   :  { %v544_v18 = vadd.f32 %v3839_v16, %v3836_v15 }
 0x36a   :  { %715 = vmatpush.msrb.mxu1 %v3752_v47 }
 0x36b   :  { %v545_v19 = vrot.slane %v544_v18, 4 }
 0x36c   :  { %716 = vmatpush.msrb.mxu1 %v3759_v48 }
 0x36d   :  { %v546_v20 = vadd.f32 %v545_v19, %v544_v18 }
 0x36e   :  { %717 = vmatpush.msrb.mxu1 %v3765_v49 }
 0x36f   :  { %v547_v21 = vrot.slane %v546_v20, 2 }
 0x370   :  { %718 = vmatpush.msrb.mxu1 %v3771_v50 }
 0x371   :  { %v548_v22 = vadd.f32 %v547_v21, %v546_v20 }
 0x372   :  { %719 = vmatpush.msrb.mxu1 %v3777_v53 }
 0x373   :  { %v549_v24 = vrot.slane %v548_v22, 1 }
 0x374   :  { %720 = vmatpush.msrb.mxu1 %v3789_v56 }
 0x375   :  { %v550_v25 = vadd.f32 %v549_v24, %v548_v22 }
 0x376   :  { %721 = vmatpush.msrb.mxu1 %v3799_v37 }
 0x377   :  { %567 = vmatmul.f32.vlgmr.msrb.gmra.mxu3 %v550_v25  ;;  %v3930_v25 = vld [vmem:[%s6003_s3 + $0xf8] sm:$0xff] }
 0x378   :  { %768 = vmatpush.msrb.mxu3 %v3723_v11  ;;  %722 = vmatpush.msrb.mxu1 %v3804_v38 }
 0x37a   :  { %769 = vmatpush.msrb.mxu3 %v3728_v44  ;;  %723 = vmatpush.msrb.mxu1 %v3812_v61 }
 0x37c   :  { %770 = vmatpush.msrb.mxu3 %v3735_v45  ;;  %724 = vmatpush.msrb.mxu1 %v3818_v63 }
 0x37e   :  { %771 = vmatpush.msrb.mxu3 %v3741_v35  ;;  %725 = vmatpush.msrb.mxu1 %v3824_v1 }
 0x380   :  { %772 = vmatpush.msrb.mxu3 %v3747_v46 }
 0x382   :  { %773 = vmatpush.msrb.mxu3 %v3752_v47 }
 0x384   :  { %774 = vmatpush.msrb.mxu3 %v3759_v48 }
 0x386   :  { %775 = vmatpush.msrb.mxu3 %v3765_v49 }
 0x388   :  { %776 = vmatpush.msrb.mxu3 %v3771_v50 }
 0x38a   :  { %777 = vmatpush.msrb.mxu3 %v3777_v53 }
 0x38c   :  { %778 = vmatpush.msrb.mxu3 %v3789_v56 }
 0x38e   :  { %779 = vmatpush.msrb.mxu3 %v3799_v37 }
 0x390   :  { %780 = vmatpush.msrb.mxu3 %v3804_v38 }
 0x392   :  { %781 = vmatpush.msrb.mxu3 %v3812_v61 }
 0x394   :  { %782 = vmatpush.msrb.mxu3 %v3818_v63 }
 0x396   :  { %783 = vmatpush.msrb.mxu3 %v3824_v1 }
 0x3dc   :  { %v428_v28 = vpop.f32.mrf.mxu1 }
 0x3dd   :  { %v431_v30 = vmul.f32 %v428_v28, %v3700_v17  ;;  %v3947_v28 = vld [vmem:[%s6003_s3 + $0xe0] sm:$0xff] }
 0x3df   :  { %3004 = vmatmul.msk.f32.vlgmr.msrb.gmra.mxu2 %vm126_vm1, %v431_v30  ;;  %v3953_v30 = vld [vmem:[%s6003_s3 + $0xd8] sm:$0xff] }
 0x3e0   :  { %609 = vmatpush.msrb.mxu2 %v3723_v11 }
 0x3e2   :  { %610 = vmatpush.msrb.mxu2 %v3728_v44 }
 0x3e4   :  { %611 = vmatpush.msrb.mxu2 %v3735_v45 }
 0x3e6   :  { %612 = vmatpush.msrb.mxu2 %v3741_v35 }
 0x3e8   :  { %613 = vmatpush.msrb.mxu2 %v3747_v46 }
 0x3ea   :  { %614 = vmatpush.msrb.mxu2 %v3752_v47 }
 0x3ec   :  { %615 = vmatpush.msrb.mxu2 %v3759_v48 }
 0x3ee   :  { %616 = vmatpush.msrb.mxu2 %v3765_v49 }
 0x3f0   :  { %617 = vmatpush.msrb.mxu2 %v3771_v50 }
 0x3f2   :  { %618 = vmatpush.msrb.mxu2 %v3777_v53 }
 0x3f4   :  { %619 = vmatpush.msrb.mxu2 %v3789_v56 }
 0x3f6   :  { %620 = vmatpush.msrb.mxu2 %v3799_v37 }
 0x3f8   :  { %621 = vmatpush.msrb.mxu2 %v3804_v38 }
 0x3fa   :  { %v568_v33 = vpop.f32.mrf.mxu3  ;;  %622 = vmatpush.msrb.mxu2 %v3812_v61 }
 0x3fb   :  { %v571_v36 = vmul.f32 %v568_v33, %v3600_v2  ;;  %v3959_v33 = vld [vmem:[%s6003_s3 + $0xd0] sm:$0xff] }
 0x3fc   :  { %623 = vmatpush.msrb.mxu2 %v3818_v63 }
 0x3fd   :  { %3026 = vmatmul.msk.f32.vlgmr.msra.gmra.mxu2 %vm126_vm1, %v571_v36 }
 0x3fe   :  { %624 = vmatpush.msrb.mxu2 %v3824_v1 }
 0x400   :  { %806 = vmatpush.msra.mxu2 %v3025_v26  ;;  %v3935_v26 = vld [vmem:[%s6003_s3 + $0xf0] sm:$0xff] }
 0x402   :  { %807 = vmatpush.msra.mxu2 %v3024_v27  ;;  %v3941_v27 = vld [vmem:[%s6003_s3 + $0xe8] sm:$0xff] }
 0x462   :  { %v452_v40 = vpop.f32.mrf.mxu2 }
 0x463   :  { %v453_v41 = vadd.f32 1e-05, %v452_v40 }
 0x465   :  { %3320 = vrsqrt.f32 %v453_v41  ;;  %vm461_vm14 = vweird.f32 %v453_v41 }
 0x46b   :  { %v3321_v42 = vpop.eup %3320 }
 0x46c   :  { %v456_v10 = vmul.f32 %v3321_v42, %v453_v41  ;;  %vm462_vm13 = vweird.f32 %v3321_v42  ;;  %v3965_v41 = vld [vmem:[%s6003_s3 + $0xc8] sm:$0xff] }
 0x46d   :  { %vm463_vm15 = vmor %vm461_vm14, %vm462_vm13 }
 0x46e   :  { %v457_v43 = vmul.f32 %v3321_v42, %v456_v10 }
 0x470   :  { %v458_v11 = vmul.f32 0.5, %v457_v43  ;;  %v3975_v43 = vld [vmem:[%s6003_s3 + $0xc0] sm:$0xff] }
 0x472   :  { %v459_v44 = vsub.f32 1.5, %v458_v11 }
 0x474   :  { %v460_v45 = vmul.f32 %v3321_v42, %v459_v44 }
 0x476   :  { %v464_v35 = vsel %vm463_vm15, %v3321_v42, %v460_v45  ;;  %v3985_v45 = vld [vmem:[%s6003_s3 + $0xb8] sm:$0xff] }
 0x477   :  { %v465_v46 = vperm.slane %v464_v35, 0 }
 0x479   :  { %v466_v47 = vmul.f32 %v465_v46, %v3781_v54  ;;  %v467_v49 = vmul.f32 %v465_v46, %v3784_v55 }
 0x47b   :  { %v468_v48 = vmul.f32 %v3707_v29, %v466_v47  ;;  %v469_v52 = vmul.f32 %v3707_v29, %v467_v49  ;;  %v3993_v47 = vld [vmem:[%s6003_s3 + $0xb0] sm:$0xff] }
 0x47d   :  { %v470_v50 = vadd.f32 %v3713_v32, %v468_v48  ;;  %v471_v54 = vadd.f32 %v3713_v32, %v469_v52 }
 0x47f   :  { %v472_v51 = vmax.f32 %v470_v50, 0.0  ;;  %v473_v59 = vmax.f32 %v471_v54, 0.0 }
 0x480   :  { %v592_v53 = vpop.f32.mrf.mxu2 }
 0x481   :  { %v595_v56 = vperm.slane %v592_v53, 0  ;;  %694 = vmatmul.f32.vlgmr.msra.gmra.mxu0 %v472_v51 }
 0x483   :  { %v3907_v57 = vsub.f32 %v3836_v15, %v595_v56  ;;  %v3910_v58 = vsub.f32 %v3839_v16, %v595_v56 }
 0x485   :  { %v598_v37 = vmul.f32 %v3907_v57, %v3907_v57  ;;  %v599_v55 = vmul.f32 %v3910_v58, %v3910_v58 }
 0x487   :  { %v600_v38 = vmul.f32 %v598_v37, %v3538_v31  ;;  %v601_v29 = vmul.f32 %v599_v55, %v3552_v39  ;;  %v4000_v55 = vld [vmem:[%s6003_s3 + $0xa8] sm:$0xff] }
 0x489   :  { %v602_v60 = vadd.f32 %v601_v29, %v600_v38  ;;  %697 = vmatmul.f32.gmra.mxu0 %v473_v59  ;;  %v4006_v38 = vld [vmem:[%s6003_s3 + $0xa0] sm:$0xff]  ;;  %v4012_v59 = vld [vmem:[%s6003_s3 + $0x98] sm:$0xff] }
 0x48b   :  { %v603_v61 = vrot.slane %v602_v60, 4 }
 0x48d   :  { %v604_v62 = vadd.f32 %v603_v61, %v602_v60  ;;  %v4017_v60 = vld [vmem:[%s6003_s3 + $0x90] sm:$0xff]  ;;  %v4023_v61 = vld [vmem:[%s6003_s3 + $0x88] sm:$0xff] }
 0x48f   :  { %v605_v63 = vrot.slane %v604_v62, 2 }
 0x491   :  { %v606_v0 = vadd.f32 %v605_v63, %v604_v62  ;;  %v4029_v63 = vld [vmem:[%s6003_s3 + $0x80] sm:$0xff] }
 0x493   :  { %v607_v1 = vrot.slane %v606_v0, 1 }
 0x495   :  { %v608_v3 = vadd.f32 %v607_v1, %v606_v0 }
 0x497   :  { %625 = vmatmul.f32.vlgmr.msrb.gmra.mxu2 %v608_v3 }
 0x498   :  { %877 = vmatpush.msrb.mxu2 %v3930_v25 }
 0x49a   :  { %878 = vmatpush.msrb.mxu2 %v3935_v26 }
 0x49c   :  { %879 = vmatpush.msrb.mxu2 %v3941_v27 }
 0x49e   :  { %880 = vmatpush.msrb.mxu2 %v3947_v28 }
 0x4a0   :  { %881 = vmatpush.msrb.mxu2 %v3953_v30 }
 0x4a2   :  { %882 = vmatpush.msrb.mxu2 %v3959_v33 }
 0x4a4   :  { %883 = vmatpush.msrb.mxu2 %v3965_v41 }
 0x4a6   :  { %884 = vmatpush.msrb.mxu2 %v3975_v43 }
 0x4a8   :  { %885 = vmatpush.msrb.mxu2 %v3985_v45 }
 0x4aa   :  { %886 = vmatpush.msrb.mxu2 %v3993_v47 }
 0x4ac   :  { %887 = vmatpush.msrb.mxu2 %v4000_v55 }
 0x4ae   :  { %888 = vmatpush.msrb.mxu2 %v4006_v38 }
 0x4b0   :  { %889 = vmatpush.msrb.mxu2 %v4012_v59 }
 0x4b2   :  { %890 = vmatpush.msrb.mxu2 %v4017_v60 }
 0x4b4   :  { %891 = vmatpush.msrb.mxu2 %v4023_v61 }
 0x4b6   :  { %892 = vmatpush.msrb.mxu2 %v4029_v63 }
 0x4fe   :  { %v695_v32 = vpop.f32.mrf.mxu0 }
 0x4ff   :  { %v696_v4 = vadd.f32 %v3831_v9, %v695_v32 }
 0x501   :  { %v701_v7 = vmul.f32 %v696_v4, %v3638_v34 }
 0x506   :  { %v698_v5 = vpop.f32.mrf.mxu0 }
 0x507   :  { %v699_v6 = vadd.f32 %v3831_v9, %v698_v5 }
 0x509   :  { %v702_v8 = vmul.f32 %v699_v6, %v3634_v23  ;;  %v4037_v6 = vld [vmem:[%s6001_s5 + $0x1] ss:$0 sm:$0xff] }
 0x50b   :  { %v703_v12 = vadd.f32 %v702_v8, %v701_v7 }
 0x50d   :  { %v704_v13 = vrot.slane %v703_v12, 4 }
 0x50f   :  { %v705_v14 = vadd.f32 %v704_v13, %v703_v12  ;;  %v4044_v13 = vld [vmem:[%s6002_s6 + $0x1] ss:$0 sm:$0xff] }
 0x511   :  { %v706_v15 = vrot.slane %v705_v14, 2 }
 0x513   :  { %v707_v18 = vadd.f32 %v706_v15, %v705_v14 }
 0x515   :  { %v708_v20 = vrot.slane %v707_v18, 1 }
 0x517   :  { %v709_v21 = vadd.f32 %v708_v20, %v707_v18  ;;  %v4054_v20 = vld [vmem:[%s5999_s7 + $0x178] sm:$0xff] }
 0x518   :  { %909 = vmatpush.msrb.mxu0 %v4054_v20 }
 0x51a   :  { %v626_v16 = vpop.f32.mrf.mxu2 }
 0x51b   :  { %v629_v19 = vmul.f32 %v626_v16, %v3600_v2 }
 0x51d   :  { %3027 = vmatmul.msk.f32.vlgmr.msra.gmra.mxu1 %vm126_vm1, %v629_v19 }
 0x525   :  { %726 = vmatmul.f32.vlgmr.msrb.gmra.mxu1 %v709_v21  ;;  %v4068_v21 = vld [vmem:[%s5999_s7 + $0x168] sm:$0xff] }
 0x59a   :  { %v650_v22 = vpop.f32.mrf.mxu1 }
 0x59b   :  { %v651_v54 = vadd.f32 1e-05, %v650_v22  ;;  %v4075_v22 = vld [vmem:[%s5999_s7 + $0x160] sm:$0xff] }
 0x59d   :  { %3322 = vrsqrt.f32 %v651_v54  ;;  %vm659_vm2 = vweird.f32 %v651_v54 }
 0x5a2   :  { %v727_v24 = vpop.f32.mrf.mxu1 }
 0x5a3   :  { %v730_v9 = vmul.f32 %v727_v24, %v3700_v17  ;;  %v3323_v37 = vpop.eup %3322  ;;  %v4082_v24 = vld [vmem:[%s5999_s7 + $0x158] sm:$0xff] }
 0x5a4   :  { %v654_v29 = vmul.f32 %v3323_v37, %v651_v54  ;;  %vm660_vm0 = vweird.f32 %v3323_v37 }
 0x5a5   :  { %3028 = vmatmul.msk.f32.vlgmr.msra.gmra.mxu3 %vm126_vm1, %v730_v9  ;;  %vm661_vm3 = vmor %vm659_vm2, %vm660_vm0  ;;  %v4089_v9 = vld [vmem:[%s5999_s7 + $0x150] sm:$0xff] }
 0x5a6   :  { %v655_v62 = vmul.f32 %v3323_v37, %v654_v29 }
 0x5a8   :  { %v656_v0 = vmul.f32 0.5, %v655_v62 }
 0x5aa   :  { %v657_v1 = vsub.f32 1.5, %v656_v0 }
 0x5ac   :  { %v658_v3 = vmul.f32 %v3323_v37, %v657_v1 }
 0x5ae   :  { %v662_v32 = vsel %vm661_vm3, %v3323_v37, %v658_v3  ;;  %v4188_v37 = vld [vmem:[%s5998_s4 + $0x2] ss:$0 sm:$0xff] }
 0x5af   :  { %v663_v4 = vperm.slane %v662_v32, 0 }
 0x5b1   :  { %v664_v5 = vmul.f32 %v663_v4, %v3907_v57  ;;  %v665_v57 = vmul.f32 %v663_v4, %v3910_v58  ;;  %v4061_v58 = vld [vmem:[%s5999_s7 + $0x170] sm:$0xff] }
 0x5b2   :  { %910 = vmatpush.msrb.mxu0 %v4061_v58 }
 0x5b3   :  { %v669_v12 = vmul.f32 %v4037_v6, %v664_v5  ;;  %v670_v16 = vmul.f32 %v4037_v6, %v665_v57 }
 0x5b4   :  { %911 = vmatpush.msrb.mxu0 %v4068_v21 }
 0x5b5   :  { %v674_v14 = vadd.f32 %v4044_v13, %v669_v12  ;;  %v675_v18 = vadd.f32 %v4044_v13, %v670_v16 }
 0x5b6   :  { %912 = vmatpush.msrb.mxu0 %v4075_v22 }
 0x5b7   :  { %v676_v15 = vmax.f32 %v674_v14, 0.0  ;;  %v677_v19 = vmax.f32 %v675_v18, 0.0 }
 0x5b8   :  { %913 = vmatpush.msrb.mxu0 %v4082_v24 }
 0x5ba   :  { %914 = vmatpush.msrb.mxu0 %v4089_v9 }
 0x628   :  { %v751_v36 = vpop.f32.mrf.mxu3 }
 0x629   :  { %v754_v40 = vperm.slane %v751_v36, 0  ;;  %v4096_v36 = vld [vmem:[%s5999_s7 + $0x148] sm:$0xff] }
 0x62a   :  { %915 = vmatpush.msrb.mxu0 %v4096_v36 }
 0x62b   :  { %v3968_v42 = vsub.f32 %v701_v7, %v754_v40  ;;  %v3970_v10 = vsub.f32 %v702_v8, %v754_v40  ;;  %v4103_v40 = vld [vmem:[%s5999_s7 + $0x140] sm:$0xff] }
 0x62c   :  { %916 = vmatpush.msrb.mxu0 %v4103_v40 }
 0x62d   :  { %v757_v11 = vmul.f32 %v3968_v42, %v3968_v42  ;;  %v758_v44 = vmul.f32 %v3970_v10, %v3970_v10 }
 0x62f   :  { %v759_v35 = vmul.f32 %v757_v11, %v3638_v34  ;;  %v760_v46 = vmul.f32 %v758_v44, %v3634_v23  ;;  %v4110_v11 = vld [vmem:[%s5999_s7 + $0x138] sm:$0xff]  ;;  %v4117_v44 = vld [vmem:[%s5999_s7 + $0x130] sm:$0xff] }
 0x630   :  { %917 = vmatpush.msrb.mxu0 %v4110_v11 }
 0x631   :  { %v761_v48 = vadd.f32 %v760_v46, %v759_v35  ;;  %v4124_v35 = vld [vmem:[%s5999_s7 + $0x128] sm:$0xff]  ;;  %v4131_v46 = vld [vmem:[%s5999_s7 + $0x120] sm:$0xff] }
 0x632   :  { %918 = vmatpush.msrb.mxu0 %v4117_v44 }
 0x633   :  { %v762_v49 = vrot.slane %v761_v48, 4 }
 0x634   :  { %919 = vmatpush.msrb.mxu0 %v4124_v35 }
 0x635   :  { %v763_v50 = vadd.f32 %v762_v49, %v761_v48  ;;  %v4138_v48 = vld [vmem:[%s5999_s7 + $0x118] sm:$0xff]  ;;  %v4145_v49 = vld [vmem:[%s5999_s7 + $0x110] sm:$0xff] }
 0x636   :  { %920 = vmatpush.msrb.mxu0 %v4131_v46 }
 0x637   :  { %v764_v51 = vrot.slane %v763_v50, 2 }
 0x638   :  { %921 = vmatpush.msrb.mxu0 %v4138_v48 }
 0x639   :  { %v765_v52 = vadd.f32 %v764_v51, %v763_v50  ;;  %v4150_v50 = vld [vmem:[%s5999_s7 + $0x108] sm:$0xff]  ;;  %v4157_v51 = vld [vmem:[%s5999_s7 + $0x100] sm:$0xff] }
 0x63a   :  { %922 = vmatpush.msrb.mxu0 %v4145_v49 }
 0x63b   :  { %v766_v53 = vrot.slane %v765_v52, 1 }
 0x63c   :  { %923 = vmatpush.msrb.mxu0 %v4150_v50 }
 0x63d   :  { %v767_v56 = vadd.f32 %v766_v53, %v765_v52  ;;  %v4168_v53 = vld [vmem:[%s6000_s8 + $0x28] sm:$0xff] }
 0x63e   :  { %924 = vmatpush.msrb.mxu0 %v4157_v51  ;;  %947 = vmatpush.msra.mxu1 %v4168_v53 }
 0x63f   :  { %784 = vmatmul.f32.vlgmr.msrb.gmra.mxu3 %v767_v56  ;;  %v4173_v56 = vld [vmem:[%s6000_s8 + $0x20] sm:$0xff] }
 0x640   :  { %1005 = vmatpush.msra.mxu3 %v4168_v53  ;;  %1106 = vmatpush.msra.mxu0 %v4168_v53 }
 0x641   :  { %948 = vmatpush.msra.mxu1 %v4173_v56 }
 0x642   :  { %1006 = vmatpush.msra.mxu3 %v4173_v56  ;;  %1107 = vmatpush.msra.mxu0 %v4173_v56 }
 0x643   :  { %967 = vmatpush.msrb.mxu1 %v4054_v20 }
 0x644   :  { %1036 = vmatpush.msrb.mxu3 %v3930_v25 }
 0x645   :  { %968 = vmatpush.msrb.mxu1 %v4061_v58 }
 0x646   :  { %1037 = vmatpush.msrb.mxu3 %v3935_v26 }
 0x647   :  { %969 = vmatpush.msrb.mxu1 %v4068_v21 }
 0x648   :  { %1038 = vmatpush.msrb.mxu3 %v3941_v27 }
 0x649   :  { %970 = vmatpush.msrb.mxu1 %v4075_v22 }
 0x64a   :  { %1039 = vmatpush.msrb.mxu3 %v3947_v28 }
 0x64b   :  { %971 = vmatpush.msrb.mxu1 %v4082_v24 }
 0x64c   :  { %1040 = vmatpush.msrb.mxu3 %v3953_v30 }
 0x64d   :  { %972 = vmatpush.msrb.mxu1 %v4089_v9 }
 0x64e   :  { %1041 = vmatpush.msrb.mxu3 %v3959_v33 }
 0x64f   :  { %973 = vmatpush.msrb.mxu1 %v4096_v36 }
 0x650   :  { %1042 = vmatpush.msrb.mxu3 %v3965_v41 }
 0x651   :  { %974 = vmatpush.msrb.mxu1 %v4103_v40 }
 0x652   :  { %1043 = vmatpush.msrb.mxu3 %v3975_v43 }
 0x653   :  { %975 = vmatpush.msrb.mxu1 %v4110_v11 }
 0x654   :  { %1044 = vmatpush.msrb.mxu3 %v3985_v45 }
 0x655   :  { %976 = vmatpush.msrb.mxu1 %v4117_v44 }
 0x656   :  { %1045 = vmatpush.msrb.mxu3 %v3993_v47 }
 0x657   :  { %977 = vmatpush.msrb.mxu1 %v4124_v35 }
 0x658   :  { %1046 = vmatpush.msrb.mxu3 %v4000_v55 }
 0x659   :  { %978 = vmatpush.msrb.mxu1 %v4131_v46 }
 0x65a   :  { %1047 = vmatpush.msrb.mxu3 %v4006_v38 }
 0x65b   :  { %979 = vmatpush.msrb.mxu1 %v4138_v48 }
 0x65c   :  { %1048 = vmatpush.msrb.mxu3 %v4012_v59 }
 0x65d   :  { %980 = vmatpush.msrb.mxu1 %v4145_v49 }
 0x65e   :  { %1049 = vmatpush.msrb.mxu3 %v4017_v60 }
 0x65f   :  { %981 = vmatpush.msrb.mxu1 %v4150_v50 }
 0x660   :  { %1050 = vmatpush.msrb.mxu3 %v4023_v61 }
 0x661   :  { %982 = vmatpush.msrb.mxu1 %v4157_v51 }
 0x662   :  { %1051 = vmatpush.msrb.mxu3 %v4029_v63 }
 0x6c2   :  { %v785_v7 = vpop.f32.mrf.mxu3 }
 0x6c3   :  { %v788_v8 = vmul.f32 %v785_v7, %v3700_v17 }
 0x6c5   :  { %3029 = vmatmul.msk.f32.vlgmr.msra.gmra.mxu2 %vm126_vm1, %v788_v8 }
 0x6c6   :  { %1068 = vmatpush.msra.mxu2 %v4054_v20 }
 0x6c8   :  { %1069 = vmatpush.msra.mxu2 %v4061_v58 }
 0x6ca   :  { %1070 = vmatpush.msra.mxu2 %v4068_v21 }
 0x6cc   :  { %1071 = vmatpush.msra.mxu2 %v4075_v22 }
 0x6cd   :  { %893 = vmatmul.f32.vlgmr.msrb.gmra.mxu2 %v676_v15 }
 0x6ce   :  { %1072 = vmatpush.msra.mxu2 %v4082_v24 }
 0x6d0   :  { %1073 = vmatpush.msra.mxu2 %v4089_v9 }
 0x6d2   :  { %1074 = vmatpush.msra.mxu2 %v4096_v36 }
 0x6d4   :  { %1075 = vmatpush.msra.mxu2 %v4103_v40 }
 0x6d5   :  { %896 = vmatmul.f32.gmra.mxu2 %v677_v19 }
 0x6d6   :  { %1076 = vmatpush.msra.mxu2 %v4110_v11 }
 0x6d8   :  { %1077 = vmatpush.msra.mxu2 %v4117_v44 }
 0x6da   :  { %1078 = vmatpush.msra.mxu2 %v4124_v35 }
 0x6dc   :  { %1079 = vmatpush.msra.mxu2 %v4131_v46 }
 0x6de   :  { %1080 = vmatpush.msra.mxu2 %v4138_v48 }
 0x6e0   :  { %1081 = vmatpush.msra.mxu2 %v4145_v49 }
 0x6e2   :  { %1082 = vmatpush.msra.mxu2 %v4150_v50 }
 0x6e4   :  { %1083 = vmatpush.msra.mxu2 %v4157_v51 }
 0x748   :  { %v4159_v52 = vpop.f32.mrf.mxu2 }
 0x749   :  { %v810_v15 = vadd.f32 1e-05, %v4159_v52 }
 0x74b   :  { %3324 = vrsqrt.f32 %v810_v15  ;;  %vm818_vm5 = vweird.f32 %v810_v15 }
 0x750   :  { %v894_v54 = vpop.f32.mrf.mxu2 }
 0x751   :  { %v895_v25 = vadd.f32 %v4188_v37, %v894_v54  ;;  %v3325_v16 = vpop.eup %3324 }
 0x752   :  { %v813_v18 = vmul.f32 %v3325_v16, %v810_v15  ;;  %vm819_vm4 = vweird.f32 %v3325_v16 }
 0x753   :  { %v900_v62 = vmul.f32 %v895_v25, %v3538_v31  ;;  %vm820_vm6 = vmor %vm818_vm5, %vm819_vm4 }
 0x754   :  { %v814_v19 = vmul.f32 %v3325_v16, %v813_v18 }
 0x758   :  { %v897_v26 = vpop.f32.mrf.mxu2 }
 0x759   :  { %v898_v29 = vadd.f32 %v4188_v37, %v897_v26 }
 0x75b   :  { %v901_v27 = vmul.f32 %v898_v29, %v3552_v39 }
 0x75d   :  { %v902_v28 = vadd.f32 %v901_v27, %v900_v62 }
 0x75f   :  { %v903_v30 = vrot.slane %v902_v28, 4 }
 0x761   :  { %v904_v0 = vadd.f32 %v903_v30, %v902_v28 }
 0x763   :  { %v905_v33 = vrot.slane %v904_v0, 2 }
 0x765   :  { %v906_v41 = vadd.f32 %v905_v33, %v904_v0  ;;  %v4275_v0 = vld [vmem:[%s6003_s3 + $0x170] sm:$0xff]  ;;  %v4281_v33 = vld [vmem:[%s6003_s3 + $0x168] sm:$0xff] }
 0x767   :  { %v907_v43 = vrot.slane %v906_v41, 1 }
 0x769   :  { %v908_v45 = vadd.f32 %v907_v43, %v906_v41  ;;  %v4287_v41 = vld [vmem:[%s6003_s3 + $0x160] sm:$0xff]  ;;  %v4293_v43 = vld [vmem:[%s6003_s3 + $0x158] sm:$0xff] }
 0x76b   :  { %925 = vmatmul.f32.vlgmr.msrb.gmra.mxu0 %v908_v45  ;;  %v4299_v45 = vld [vmem:[%s6003_s3 + $0x150] sm:$0xff] }
 0x76c   :  { %1126 = vmatpush.msrb.mxu0 %v4054_v20  ;;  %v815_v20 = vmul.f32 0.5, %v814_v19 }
 0x76e   :  { %1127 = vmatpush.msrb.mxu0 %v4061_v58  ;;  %v816_v58 = vsub.f32 1.5, %v815_v20 }
 0x770   :  { %1128 = vmatpush.msrb.mxu0 %v4068_v21  ;;  %v817_v21 = vmul.f32 %v3325_v16, %v816_v58 }
 0x772   :  { %1129 = vmatpush.msrb.mxu0 %v4075_v22  ;;  %v821_v22 = vsel %vm820_vm6, %v3325_v16, %v817_v21  ;;  %v4340_v21 = vld [vmem:[%s6003_s3 + $0x128] sm:$0xff] }
 0x774   :  { %1130 = vmatpush.msrb.mxu0 %v4082_v24  ;;  %v822_v24 = vperm.slane %v821_v22, 0  ;;  %v4346_v22 = vld [vmem:[%s6003_s3 + $0x120] sm:$0xff] }
 0x776   :  { %1131 = vmatpush.msrb.mxu0 %v4089_v9  ;;  %v823_v9 = vmul.f32 %v822_v24, %v3968_v42 }
 0x778   :  { %1132 = vmatpush.msrb.mxu0 %v4096_v36 }
 0x77a   :  { %1133 = vmatpush.msrb.mxu0 %v4103_v40 }
 0x77c   :  { %1134 = vmatpush.msrb.mxu0 %v4110_v11  ;;  %v825_v11 = vmul.f32 %v4037_v6, %v823_v9  ;;  %v4352_v9 = vld [vmem:[%s6003_s3 + $0x118] sm:$0xff] }
 0x77e   :  { %1135 = vmatpush.msrb.mxu0 %v4117_v44  ;;  %v827_v44 = vadd.f32 %v4044_v13, %v825_v11 }
 0x780   :  { %1136 = vmatpush.msrb.mxu0 %v4124_v35  ;;  %v824_v35 = vmul.f32 %v822_v24, %v3970_v10 }
 0x782   :  { %1137 = vmatpush.msrb.mxu0 %v4131_v46  ;;  %v829_v46 = vmax.f32 %v827_v44, 0.0  ;;  %v4369_v44 = vld [vmem:[%s6003_s3 + $0x100] sm:$0xff] }
 0x784   :  { %1138 = vmatpush.msrb.mxu0 %v4138_v48  ;;  %v826_v48 = vmul.f32 %v4037_v6, %v824_v35 }
 0x786   :  { %1139 = vmatpush.msrb.mxu0 %v4145_v49  ;;  %v828_v49 = vadd.f32 %v4044_v13, %v826_v48 }
 0x788   :  { %1140 = vmatpush.msrb.mxu0 %v4150_v50  ;;  %v830_v50 = vmax.f32 %v828_v49, 0.0 }
 0x78a   :  { %1141 = vmatpush.msrb.mxu0 %v4157_v51 }
 0x7e8   :  { %v926_v47 = vpop.f32.mrf.mxu0 }
 0x7e9   :  { %v929_v55 = vmul.f32 %v926_v47, %v3600_v2 }
 0x7eb   :  { %3067 = vmatmul.msk.f32.vlgmr.msra.gmra.mxu1 %vm126_vm1, %v929_v55 }
 0x7ec   :  { %1164 = vmatpush.msra.mxu1 %v4168_v53 }
 0x7ee   :  { %1165 = vmatpush.msra.mxu1 %v4173_v56 }
 0x868   :  { %v950_v38 = vpop.f32.mrf.mxu1 }
 0x869   :  { %v953_v59 = vperm.slane %v950_v38, 0  ;;  %v4305_v38 = vld [vmem:[%s6003_s3 + $0x148] sm:$0xff] }
 0x86b   :  { %v4242_v60 = vsub.f32 %v900_v62, %v953_v59  ;;  %v4244_v61 = vsub.f32 %v901_v27, %v953_v59 }
 0x86d   :  { %v956_v63 = vmul.f32 %v4242_v60, %v4242_v60  ;;  %v957_v1 = vmul.f32 %v4244_v61, %v4244_v61 }
 0x86f   :  { %v958_v3 = vmul.f32 %v956_v63, %v3538_v31  ;;  %v959_v32 = vmul.f32 %v957_v1, %v3552_v39  ;;  %v4315_v1 = vld [vmem:[%s6003_s3 + $0x140] sm:$0xff] }
 0x871   :  { %v960_v4 = vadd.f32 %v959_v32, %v958_v3 }
 0x873   :  { %v961_v5 = vrot.slane %v960_v4, 4 }
 0x875   :  { %v962_v7 = vadd.f32 %v961_v5, %v960_v4  ;;  %v4325_v4 = vld [vmem:[%s6003_s3 + $0x138] sm:$0xff] }
 0x877   :  { %v963_v8 = vrot.slane %v962_v7, 2 }
 0x879   :  { %v964_v12 = vadd.f32 %v963_v8, %v962_v7  ;;  %v4333_v8 = vld [vmem:[%s6003_s3 + $0x130] sm:$0xff] }
 0x87b   :  { %v965_v14 = vrot.slane %v964_v12, 1 }
 0x87d   :  { %v966_v57 = vadd.f32 %v965_v14, %v964_v12 }
 0x87f   :  { %983 = vmatmul.f32.vlgmr.msrb.gmra.mxu1 %v966_v57 }
 0x8fc   :  { %v984_v36 = vpop.f32.mrf.mxu1 }
 0x8fd   :  { %v987_v40 = vmul.f32 %v984_v36, %v3600_v2  ;;  %v4357_v36 = vld [vmem:[%s6003_s3 + $0x110] sm:$0xff] }
 0x8ff   :  { %3068 = vmatmul.msk.f32.vlgmr.msra.gmra.mxu3 %vm126_vm1, %v987_v40  ;;  %v4363_v40 = vld [vmem:[%s6003_s3 + $0x108] sm:$0xff] }
 0x907   :  { %1052 = vmatmul.f32.vlgmr.msrb.gmra.mxu3 %v829_v46 }
 0x90f   :  { %1055 = vmatmul.f32.gmra.mxu3 %v830_v50 }
 0x982   :  { %v1008_v42 = vpop.f32.mrf.mxu3 }
 0x983   :  { %v1009_v20 = vadd.f32 1e-05, %v1008_v42 }
 0x985   :  { %3326 = vrsqrt.f32 %v1009_v20  ;;  %vm1017_vm8 = vweird.f32 %v1009_v20 }
 0x98a   :  { %v1053_v51 = vpop.f32.mrf.mxu3 }
 0x98b   :  { %v1054_v52 = vadd.f32 %v4188_v37, %v1053_v51  ;;  %v3327_v58 = vpop.eup %3326  ;;  %v4377_v51 = vld [vmem:[%s6001_s5 + $0x2] ss:$0 sm:$0xff] }
 0x98c   :  { %v1012_v24 = vmul.f32 %v3327_v58, %v1009_v20  ;;  %vm1018_vm7 = vweird.f32 %v3327_v58 }
 0x98d   :  { %v1059_v54 = vmul.f32 %v1054_v52, %v3638_v34  ;;  %vm1019_vm9 = vmor %vm1017_vm8, %vm1018_vm7 }
 0x98e   :  { %v1013_v11 = vmul.f32 %v3327_v58, %v1012_v24 }
 0x990   :  { %v1014_v35 = vmul.f32 0.5, %v1013_v11 }
 0x992   :  { %v1056_v53 = vpop.f32.mrf.mxu3  ;;  %v1015_v46 = vsub.f32 1.5, %v1014_v35 }
 0x993   :  { %v1057_v56 = vadd.f32 %v4188_v37, %v1056_v53  ;;  %v4270_v37 = vld [vmem:[%s6003_s3 + $0x178] sm:$0xff] }
 0x994   :  { %1235 = vmatpush.msrb.mxu1 %v4270_v37  ;;  %v1016_v48 = vmul.f32 %v3327_v58, %v1015_v46 }
 0x995   :  { %v1060_v25 = vmul.f32 %v1057_v56, %v3634_v23 }
 0x996   :  { %1236 = vmatpush.msrb.mxu1 %v4275_v0  ;;  %v1020_v49 = vsel %vm1019_vm9, %v3327_v58, %v1016_v48  ;;  %v4528_v58 = vld [vmem:[%s5998_s4 + $0x3] ss:$0 sm:$0xff] }
 0x997   :  { %v1061_v10 = vadd.f32 %v1060_v25, %v1059_v54  ;;  %v1021_v50 = vperm.slane %v1020_v49, 0 }
 0x998   :  { %1237 = vmatpush.msrb.mxu1 %v4281_v33 }
 0x999   :  { %v1062_v26 = vrot.slane %v1061_v10, 4  ;;  %v1022_v42 = vmul.f32 %v1021_v50, %v4242_v60  ;;  %v1023_v60 = vmul.f32 %v1021_v50, %v4244_v61  ;;  %v4401_v61 = vld [vmem:[%s5999_s7 + $0x1f0] sm:$0xff] }
 0x99a   :  { %1238 = vmatpush.msrb.mxu1 %v4287_v41 }
 0x99b   :  { %v1063_v29 = vadd.f32 %v1062_v26, %v1061_v10  ;;  %v1027_v56 = vmul.f32 %v4377_v51, %v1022_v42  ;;  %v1028_v26 = vmul.f32 %v4377_v51, %v1023_v60 }
 0x99c   :  { %1239 = vmatpush.msrb.mxu1 %v4293_v43 }
 0x99d   :  { %v1064_v6 = vrot.slane %v1063_v29, 2 }
 0x99e   :  { %1240 = vmatpush.msrb.mxu1 %v4299_v45 }
 0x99f   :  { %v1065_v62 = vadd.f32 %v1064_v6, %v1063_v29 }
 0x9a0   :  { %1241 = vmatpush.msrb.mxu1 %v4305_v38 }
 0x9a1   :  { %v1066_v27 = vrot.slane %v1065_v62, 1 }
 0x9a2   :  { %1242 = vmatpush.msrb.mxu1 %v4315_v1 }
 0x9a3   :  { %v1067_v13 = vadd.f32 %v1066_v27, %v1065_v62  ;;  %v4394_v62 = vld [vmem:[%s5999_s7 + $0x1f8] sm:$0xff]  ;;  %v4408_v27 = vld [vmem:[%s5999_s7 + $0x1e8] sm:$0xff] }
 0x9a4   :  { %1243 = vmatpush.msrb.mxu1 %v4325_v4  ;;  %1267 = vmatpush.msra.mxu3 %v4394_v62 }
 0x9a5   :  { %1084 = vmatmul.f32.vlgmr.msra.gmra.mxu2 %v1067_v13  ;;  %v4415_v13 = vld [vmem:[%s5999_s7 + $0x1e0] sm:$0xff] }
 0x9a6   :  { %1244 = vmatpush.msrb.mxu1 %v4333_v8  ;;  %1268 = vmatpush.msra.mxu3 %v4401_v61 }
 0x9a8   :  { %1245 = vmatpush.msrb.mxu1 %v4340_v21  ;;  %1269 = vmatpush.msra.mxu3 %v4408_v27 }
 0x9aa   :  { %1246 = vmatpush.msrb.mxu1 %v4346_v22  ;;  %1270 = vmatpush.msra.mxu3 %v4415_v13 }
 0x9ac   :  { %1247 = vmatpush.msrb.mxu1 %v4352_v9 }
 0x9ae   :  { %1248 = vmatpush.msrb.mxu1 %v4357_v36 }
 0x9b0   :  { %1249 = vmatpush.msrb.mxu1 %v4363_v40 }
 0x9b2   :  { %1250 = vmatpush.msrb.mxu1 %v4369_v44 }
 0xa28   :  { %v1085_v28 = vpop.f32.mrf.mxu2 }
 0xa29   :  { %v1088_v30 = vmul.f32 %v1085_v28, %v3700_v17  ;;  %v4422_v28 = vld [vmem:[%s5999_s7 + $0x1d8] sm:$0xff] }
 0xa2a   :  { %1271 = vmatpush.msra.mxu3 %v4422_v28 }
 0xa2b   :  { %3069 = vmatmul.msk.f32.vlgmr.msra.gmra.mxu0 %vm126_vm1, %v1088_v30  ;;  %v4429_v30 = vld [vmem:[%s5999_s7 + $0x1d0] sm:$0xff] }
 0xa2c   :  { %1272 = vmatpush.msra.mxu3 %v4429_v30 }
 0xaa8   :  { %v1109_v47 = vpop.f32.mrf.mxu0 }
 0xaa9   :  { %v1112_v55 = vperm.slane %v1109_v47, 0  ;;  %v4436_v47 = vld [vmem:[%s5999_s7 + $0x1c8] sm:$0xff] }
 0xaaa   :  { %1273 = vmatpush.msra.mxu3 %v4436_v47 }
 0xaab   :  { %v4308_v59 = vsub.f32 %v1059_v54, %v1112_v55  ;;  %v4310_v63 = vsub.f32 %v1060_v25, %v1112_v55  ;;  %v4384_v54 = vld [vmem:[%s6002_s6 + $0x2] ss:$0 sm:$0xff] }
 0xaac   :  { %v1032_v25 = vadd.f32 %v4384_v54, %v1027_v56  ;;  %v1033_v29 = vadd.f32 %v4384_v54, %v1028_v26  ;;  %v4443_v55 = vld [vmem:[%s5999_s7 + $0x1c0] sm:$0xff] }
 0xaad   :  { %v1115_v3 = vmul.f32 %v4308_v59, %v4308_v59  ;;  %v1116_v32 = vmul.f32 %v4310_v63, %v4310_v63  ;;  %1274 = vmatpush.msra.mxu3 %v4443_v55 }
 0xaae   :  { %v1034_v10 = vmax.f32 %v1032_v25, 0.0  ;;  %v1035_v6 = vmax.f32 %v1033_v29, 0.0 }
 0xaaf   :  { %v1117_v5 = vmul.f32 %v1115_v3, %v3638_v34  ;;  %v1118_v7 = vmul.f32 %v1116_v32, %v3634_v23  ;;  %v4450_v3 = vld [vmem:[%s5999_s7 + $0x1b8] sm:$0xff]  ;;  %v4457_v32 = vld [vmem:[%s5999_s7 + $0x1b0] sm:$0xff] }
 0xab0   :  { %1275 = vmatpush.msra.mxu3 %v4450_v3 }
 0xab1   :  { %v1119_v12 = vadd.f32 %v1118_v7, %v1117_v5  ;;  %v4464_v5 = vld [vmem:[%s5999_s7 + $0x1a8] sm:$0xff]  ;;  %v4471_v7 = vld [vmem:[%s5999_s7 + $0x1a0] sm:$0xff] }
 0xab2   :  { %1276 = vmatpush.msra.mxu3 %v4457_v32 }
 0xab3   :  { %v1120_v14 = vrot.slane %v1119_v12, 4 }
 0xab4   :  { %1277 = vmatpush.msra.mxu3 %v4464_v5 }
 0xab5   :  { %v1121_v57 = vadd.f32 %v1120_v14, %v1119_v12  ;;  %v4478_v12 = vld [vmem:[%s5999_s7 + $0x198] sm:$0xff]  ;;  %v4485_v14 = vld [vmem:[%s5999_s7 + $0x190] sm:$0xff] }
 0xab6   :  { %1278 = vmatpush.msra.mxu3 %v4471_v7 }
 0xab7   :  { %v1122_v15 = vrot.slane %v1121_v57, 2 }
 0xab8   :  { %1279 = vmatpush.msra.mxu3 %v4478_v12 }
 0xab9   :  { %v1123_v16 = vadd.f32 %v1122_v15, %v1121_v57  ;;  %v4490_v57 = vld [vmem:[%s5999_s7 + $0x188] sm:$0xff]  ;;  %v4497_v15 = vld [vmem:[%s5999_s7 + $0x180] sm:$0xff] }
 0xaba   :  { %1280 = vmatpush.msra.mxu3 %v4485_v14 }
 0xabb   :  { %v1124_v18 = vrot.slane %v1123_v16, 1 }
 0xabc   :  { %1281 = vmatpush.msra.mxu3 %v4490_v57 }
 0xabd   :  { %v1125_v19 = vadd.f32 %v1124_v18, %v1123_v16  ;;  %v4508_v18 = vld [vmem:[%s6000_s8 + $0x38] sm:$0xff] }
 0xabe   :  { %1282 = vmatpush.msra.mxu3 %v4497_v15  ;;  %1305 = vmatpush.msrb.mxu2 %v4508_v18 }
 0xabf   :  { %1142 = vmatmul.f32.vlgmr.msrb.gmra.mxu0 %v1125_v19  ;;  %v4513_v19 = vld [vmem:[%s6000_s8 + $0x30] sm:$0xff] }
 0xac0   :  { %1363 = vmatpush.msra.mxu0 %v4508_v18  ;;  %1464 = vmatpush.msrb.mxu3 %v4508_v18 }
 0xac1   :  { %1306 = vmatpush.msrb.mxu2 %v4513_v19 }
 0xac2   :  { %1364 = vmatpush.msra.mxu0 %v4513_v19  ;;  %1465 = vmatpush.msrb.mxu3 %v4513_v19 }
 0xac3   :  { %1325 = vmatpush.msra.mxu2 %v4394_v62 }
 0xac4   :  { %1394 = vmatpush.msrb.mxu0 %v4270_v37 }
 0xac5   :  { %1326 = vmatpush.msra.mxu2 %v4401_v61 }
 0xac6   :  { %1395 = vmatpush.msrb.mxu0 %v4275_v0 }
 0xac7   :  { %1327 = vmatpush.msra.mxu2 %v4408_v27 }
 0xac8   :  { %1396 = vmatpush.msrb.mxu0 %v4281_v33 }
 0xac9   :  { %1328 = vmatpush.msra.mxu2 %v4415_v13 }
 0xaca   :  { %1397 = vmatpush.msrb.mxu0 %v4287_v41 }
 0xacb   :  { %1329 = vmatpush.msra.mxu2 %v4422_v28 }
 0xacc   :  { %1398 = vmatpush.msrb.mxu0 %v4293_v43 }
 0xacd   :  { %1330 = vmatpush.msra.mxu2 %v4429_v30 }
 0xace   :  { %1399 = vmatpush.msrb.mxu0 %v4299_v45 }
 0xacf   :  { %1331 = vmatpush.msra.mxu2 %v4436_v47 }
 0xad0   :  { %1400 = vmatpush.msrb.mxu0 %v4305_v38 }
 0xad1   :  { %1332 = vmatpush.msra.mxu2 %v4443_v55 }
 0xad2   :  { %1401 = vmatpush.msrb.mxu0 %v4315_v1 }
 0xad3   :  { %1333 = vmatpush.msra.mxu2 %v4450_v3 }
 0xad4   :  { %1402 = vmatpush.msrb.mxu0 %v4325_v4 }
 0xad5   :  { %1334 = vmatpush.msra.mxu2 %v4457_v32 }
 0xad6   :  { %1403 = vmatpush.msrb.mxu0 %v4333_v8 }
 0xad7   :  { %1335 = vmatpush.msra.mxu2 %v4464_v5 }
 0xad8   :  { %1404 = vmatpush.msrb.mxu0 %v4340_v21 }
 0xad9   :  { %1336 = vmatpush.msra.mxu2 %v4471_v7 }
 0xada   :  { %1405 = vmatpush.msrb.mxu0 %v4346_v22 }
 0xadb   :  { %1337 = vmatpush.msra.mxu2 %v4478_v12 }
 0xadc   :  { %1406 = vmatpush.msrb.mxu0 %v4352_v9 }
 0xadd   :  { %1338 = vmatpush.msra.mxu2 %v4485_v14 }
 0xade   :  { %1407 = vmatpush.msrb.mxu0 %v4357_v36 }
 0xadf   :  { %1339 = vmatpush.msra.mxu2 %v4490_v57 }
 0xae0   :  { %1408 = vmatpush.msrb.mxu0 %v4363_v40 }
 0xae1   :  { %1340 = vmatpush.msra.mxu2 %v4497_v15 }
 0xae2   :  { %1409 = vmatpush.msrb.mxu0 %v4369_v44 }
 0xb3c   :  { %v1143_v52 = vpop.f32.mrf.mxu0 }
 0xb3d   :  { %v1146_v53 = vmul.f32 %v1143_v52, %v3700_v17 }
 0xb3f   :  { %3070 = vmatmul.msk.f32.vlgmr.msra.gmra.mxu1 %vm126_vm1, %v1146_v53 }
 0xb40   :  { %1426 = vmatpush.msra.mxu1 %v4394_v62 }
 0xb42   :  { %1427 = vmatpush.msra.mxu1 %v4401_v61 }
 0xb44   :  { %1428 = vmatpush.msra.mxu1 %v4408_v27 }
 0xb46   :  { %1429 = vmatpush.msra.mxu1 %v4415_v13 }
 0xb47   :  { %1251 = vmatmul.f32.vlgmr.msrb.gmra.mxu1 %v1034_v10 }
 0xb48   :  { %1430 = vmatpush.msra.mxu1 %v4422_v28 }
 0xb4a   :  { %1431 = vmatpush.msra.mxu1 %v4429_v30 }
 0xb4c   :  { %1432 = vmatpush.msra.mxu1 %v4436_v47 }
 0xb4e   :  { %1433 = vmatpush.msra.mxu1 %v4443_v55 }
 0xb4f   :  { %1254 = vmatmul.f32.gmra.mxu1 %v1035_v6 }
 0xb50   :  { %1434 = vmatpush.msra.mxu1 %v4450_v3 }
 0xb52   :  { %1435 = vmatpush.msra.mxu1 %v4457_v32 }
 0xb54   :  { %1436 = vmatpush.msra.mxu1 %v4464_v5 }
 0xb56   :  { %1437 = vmatpush.msra.mxu1 %v4471_v7 }
 0xb58   :  { %1438 = vmatpush.msra.mxu1 %v4478_v12 }
 0xb5a   :  { %1439 = vmatpush.msra.mxu1 %v4485_v14 }
 0xb5c   :  { %1440 = vmatpush.msra.mxu1 %v4490_v57 }
 0xb5e   :  { %1441 = vmatpush.msra.mxu1 %v4497_v15 }
 0xbbc   :  { %v4499_v16 = vpop.f32.mrf.mxu1 }
 0xbbd   :  { %v1168_v10 = vadd.f32 1e-05, %v4499_v16 }
 0xbbf   :  { %3328 = vrsqrt.f32 %v1168_v10  ;;  %vm1176_vm11 = vweird.f32 %v1168_v10 }
 0xbc4   :  { %v1252_v20 = vpop.f32.mrf.mxu1 }
 0xbc5   :  { %v1253_v37 = vadd.f32 %v4528_v58, %v1252_v20  ;;  %v3329_v26 = vpop.eup %3328 }
 0xbc6   :  { %v1171_v29 = vmul.f32 %v3329_v26, %v1168_v10  ;;  %vm1177_vm10 = vweird.f32 %v3329_v26 }
 0xbc7   :  { %v1258_v11 = vmul.f32 %v1253_v37, %v3538_v31  ;;  %vm1178_vm12 = vmor %vm1176_vm11, %vm1177_vm10 }
 0xbc8   :  { %v1172_v6 = vmul.f32 %v3329_v26, %v1171_v29 }
 0xbcc   :  { %v1255_v0 = vpop.f32.mrf.mxu1 }
 0xbcd   :  { %v1256_v24 = vadd.f32 %v4528_v58, %v1255_v0 }
 0xbcf   :  { %v1259_v33 = vmul.f32 %v1256_v24, %v3552_v39 }
 0xbd1   :  { %v1260_v41 = vadd.f32 %v1259_v33, %v1258_v11 }
 0xbd3   :  { %v1261_v43 = vrot.slane %v1260_v41, 4 }
 0xbd5   :  { %v1262_v35 = vadd.f32 %v1261_v43, %v1260_v41 }
 0xbd7   :  { %v1263_v45 = vrot.slane %v1262_v35, 2 }
 0xbd9   :  { %v1264_v38 = vadd.f32 %v1263_v45, %v1262_v35  ;;  %v4615_v35 = vld [vmem:[%s6003_s3 + $0x1f0] sm:$0xff]  ;;  %v4621_v45 = vld [vmem:[%s6003_s3 + $0x1e8] sm:$0xff] }
 0xbdb   :  { %v1265_v1 = vrot.slane %v1264_v38, 1 }
 0xbdd   :  { %v1266_v4 = vadd.f32 %v1265_v1, %v1264_v38  ;;  %v4627_v38 = vld [vmem:[%s6003_s3 + $0x1e0] sm:$0xff]  ;;  %v4633_v1 = vld [vmem:[%s6003_s3 + $0x1d8] sm:$0xff] }
 0xbdf   :  { %1283 = vmatmul.f32.vlgmr.msra.gmra.mxu3 %v1266_v4  ;;  %v4639_v4 = vld [vmem:[%s6003_s3 + $0x1d0] sm:$0xff] }
 0xbe0   :  { %1484 = vmatpush.msra.mxu3 %v4394_v62  ;;  %v1173_v62 = vmul.f32 0.5, %v1172_v6 }
 0xbe2   :  { %1485 = vmatpush.msra.mxu3 %v4401_v61  ;;  %v1174_v61 = vsub.f32 1.5, %v1173_v62 }
 0xbe4   :  { %1486 = vmatpush.msra.mxu3 %v4408_v27  ;;  %v1175_v27 = vmul.f32 %v3329_v26, %v1174_v61 }
 0xbe6   :  { %1487 = vmatpush.msra.mxu3 %v4415_v13  ;;  %v1179_v13 = vsel %vm1178_vm12, %v3329_v26, %v1175_v27  ;;  %v4680_v27 = vld [vmem:[%s6003_s3 + $0x1a8] sm:$0xff] }
 0xbe8   :  { %1488 = vmatpush.msra.mxu3 %v4422_v28  ;;  %v1180_v28 = vperm.slane %v1179_v13, 0  ;;  %v4686_v13 = vld [vmem:[%s6003_s3 + $0x1a0] sm:$0xff] }
 0xbea   :  { %1489 = vmatpush.msra.mxu3 %v4429_v30  ;;  %v1181_v30 = vmul.f32 %v1180_v28, %v4308_v59 }
 0xbec   :  { %1490 = vmatpush.msra.mxu3 %v4436_v47 }
 0xbee   :  { %1491 = vmatpush.msra.mxu3 %v4443_v55 }
 0xbf0   :  { %1492 = vmatpush.msra.mxu3 %v4450_v3  ;;  %v1183_v3 = vmul.f32 %v4377_v51, %v1181_v30  ;;  %v4692_v30 = vld [vmem:[%s6003_s3 + $0x198] sm:$0xff] }
 0xbf2   :  { %1493 = vmatpush.msra.mxu3 %v4457_v32  ;;  %v1185_v32 = vadd.f32 %v4384_v54, %v1183_v3 }
 0xbf4   :  { %1494 = vmatpush.msra.mxu3 %v4464_v5  ;;  %v1182_v5 = vmul.f32 %v1180_v28, %v4310_v63 }
 0xbf6   :  { %1495 = vmatpush.msra.mxu3 %v4471_v7  ;;  %v1187_v7 = vmax.f32 %v1185_v32, 0.0  ;;  %v4709_v32 = vld [vmem:[%s6003_s3 + $0x180] sm:$0xff] }
 0xbf8   :  { %1496 = vmatpush.msra.mxu3 %v4478_v12  ;;  %v1184_v12 = vmul.f32 %v4377_v51, %v1182_v5 }
 0xbfa   :  { %1497 = vmatpush.msra.mxu3 %v4485_v14  ;;  %v1186_v14 = vadd.f32 %v4384_v54, %v1184_v12 }
 0xbfc   :  { %1498 = vmatpush.msra.mxu3 %v4490_v57  ;;  %v1188_v57 = vmax.f32 %v1186_v14, 0.0 }
 0xbfe   :  { %1499 = vmatpush.msra.mxu3 %v4497_v15 }
 0xc62   :  { %v1284_v8 = vpop.f32.mrf.mxu3 }
 0xc63   :  { %v1287_v21 = vmul.f32 %v1284_v8, %v3600_v2 }
 0xc65   :  { %3108 = vmatmul.msk.f32.vlgmr.msrb.gmra.mxu2 %vm126_vm1, %v1287_v21 }
 0xc66   :  { %1522 = vmatpush.msrb.mxu2 %v4508_v18 }
 0xc68   :  { %1523 = vmatpush.msrb.mxu2 %v4513_v19 }
 0xce8   :  { %v1308_v22 = vpop.f32.mrf.mxu2 }
 0xce9   :  { %v1311_v9 = vperm.slane %v1308_v22, 0  ;;  %v4645_v22 = vld [vmem:[%s6003_s3 + $0x1c8] sm:$0xff] }
 0xceb   :  { %v4582_v36 = vsub.f32 %v1258_v11, %v1311_v9  ;;  %v4584_v40 = vsub.f32 %v1259_v33, %v1311_v9 }
 0xced   :  { %v1314_v44 = vmul.f32 %v4582_v36, %v4582_v36  ;;  %v1315_v46 = vmul.f32 %v4584_v40, %v4584_v40 }
 0xcef   :  { %v1316_v48 = vmul.f32 %v1314_v44, %v3538_v31  ;;  %v1317_v49 = vmul.f32 %v1315_v46, %v3552_v39  ;;  %v4655_v46 = vld [vmem:[%s6003_s3 + $0x1c0] sm:$0xff] }
 0xcf1   :  { %v1318_v50 = vadd.f32 %v1317_v49, %v1316_v48 }
 0xcf3   :  { %v1319_v42 = vrot.slane %v1318_v50, 4 }
 0xcf5   :  { %v1320_v52 = vadd.f32 %v1319_v42, %v1318_v50  ;;  %v4665_v50 = vld [vmem:[%s6003_s3 + $0x1b8] sm:$0xff] }
 0xcf7   :  { %v1321_v53 = vrot.slane %v1320_v52, 2 }
 0xcf9   :  { %v1322_v56 = vadd.f32 %v1321_v53, %v1320_v52  ;;  %v4673_v53 = vld [vmem:[%s6003_s3 + $0x1b0] sm:$0xff] }
 0xcfb   :  { %v1323_v25 = vrot.slane %v1322_v56, 1 }
 0xcfd   :  { %v1324_v60 = vadd.f32 %v1323_v25, %v1322_v56 }
 0xcff   :  { %1341 = vmatmul.f32.vlgmr.msra.gmra.mxu2 %v1324_v60 }
 0xd82   :  { %v1342_v47 = vpop.f32.mrf.mxu2 }
 0xd83   :  { %v1345_v55 = vmul.f32 %v1342_v47, %v3600_v2  ;;  %v4697_v47 = vld [vmem:[%s6003_s3 + $0x190] sm:$0xff] }
 0xd85   :  { %3109 = vmatmul.msk.f32.vlgmr.msra.gmra.mxu0 %vm126_vm1, %v1345_v55  ;;  %v4703_v55 = vld [vmem:[%s6003_s3 + $0x188] sm:$0xff] }
 0xd8d   :  { %1410 = vmatmul.f32.vlgmr.msrb.gmra.mxu0 %v1187_v7 }
 0xd95   :  { %1413 = vmatmul.f32.gmra.mxu0 %v1188_v57 }
 0xe02   :  { %v1366_v59 = vpop.f32.mrf.mxu0 }
 0xe03   :  { %v1367_v62 = vadd.f32 1e-05, %v1366_v59 }
 0xe05   :  { %3330 = vrsqrt.f32 %v1367_v62  ;;  %vm1375_vm14 = vweird.f32 %v1367_v62 }
 0xe0a   :  { %v1411_v15 = vpop.f32.mrf.mxu0 }
 0xe0b   :  { %v1412_v16 = vadd.f32 %v4528_v58, %v1411_v15  ;;  %v3331_v61 = vpop.eup %3330  ;;  %v4717_v15 = vld [vmem:[%s6001_s5 + $0x3] ss:$0 sm:$0xff] }
 0xe0c   :  { %v1370_v28 = vmul.f32 %v3331_v61, %v1367_v62  ;;  %vm1376_vm13 = vweird.f32 %v3331_v61 }
 0xe0d   :  { %v1417_v20 = vmul.f32 %v1412_v16, %v3638_v34  ;;  %vm1377_vm15 = vmor %vm1375_vm14, %vm1376_vm13 }
 0xe0e   :  { %v1371_v3 = vmul.f32 %v3331_v61, %v1370_v28 }
 0xe10   :  { %v1372_v5 = vmul.f32 0.5, %v1371_v3 }
 0xe12   :  { %v1414_v18 = vpop.f32.mrf.mxu0  ;;  %v1373_v7 = vsub.f32 1.5, %v1372_v5 }
 0xe13   :  { %v1415_v19 = vadd.f32 %v4528_v58, %v1414_v18  ;;  %v4610_v58 = vld [vmem:[%s6003_s3 + $0x1f8] sm:$0xff] }
 0xe14   :  { %1593 = vmatpush.msra.mxu2 %v4610_v58  ;;  %v1374_v12 = vmul.f32 %v3331_v61, %v1373_v7 }
 0xe15   :  { %v1418_v37 = vmul.f32 %v1415_v19, %v3634_v23 }
 0xe16   :  { %1594 = vmatpush.msra.mxu2 %v4615_v35  ;;  %v1378_v14 = vsel %vm1377_vm15, %v3331_v61, %v1374_v12  ;;  %v4868_v61 = vld [vmem:[%s5998_s4 + $0x4] ss:$0 sm:$0xff] }
 0xe17   :  { %v1419_v63 = vadd.f32 %v1418_v37, %v1417_v20  ;;  %v1379_v57 = vperm.slane %v1378_v14, 0 }
 0xe18   :  { %1595 = vmatpush.msra.mxu2 %v4621_v45 }
 0xe19   :  { %v1420_v0 = vrot.slane %v1419_v63, 4  ;;  %v1380_v59 = vmul.f32 %v1379_v57, %v4582_v36  ;;  %v1381_v36 = vmul.f32 %v1379_v57, %v4584_v40  ;;  %v4741_v40 = vld [vmem:[%s5999_s7 + $0x270] sm:$0xff] }
 0xe1a   :  { %1596 = vmatpush.msra.mxu2 %v4627_v38 }
 0xe1b   :  { %v1421_v24 = vadd.f32 %v1420_v0, %v1419_v63  ;;  %v1385_v19 = vmul.f32 %v4717_v15, %v1380_v59  ;;  %v1386_v0 = vmul.f32 %v4717_v15, %v1381_v36 }
 0xe1c   :  { %1597 = vmatpush.msra.mxu2 %v4633_v1 }
 0xe1d   :  { %v1422_v51 = vrot.slane %v1421_v24, 2 }
 0xe1e   :  { %1598 = vmatpush.msra.mxu2 %v4639_v4 }
 0xe1f   :  { %v1423_v11 = vadd.f32 %v1422_v51, %v1421_v24 }
 0xe20   :  { %1599 = vmatpush.msra.mxu2 %v4645_v22 }
 0xe21   :  { %v1424_v33 = vrot.slane %v1423_v11, 1 }
 0xe22   :  { %1600 = vmatpush.msra.mxu2 %v4655_v46 }
 0xe23   :  { %v1425_v54 = vadd.f32 %v1424_v33, %v1423_v11  ;;  %v4734_v11 = vld [vmem:[%s5999_s7 + $0x278] sm:$0xff]  ;;  %v4748_v33 = vld [vmem:[%s5999_s7 + $0x268] sm:$0xff] }
 0xe24   :  { %1601 = vmatpush.msra.mxu2 %v4665_v50  ;;  %1625 = vmatpush.msra.mxu0 %v4734_v11 }
 0xe25   :  { %1442 = vmatmul.f32.vlgmr.msra.gmra.mxu1 %v1425_v54  ;;  %v4755_v54 = vld [vmem:[%s5999_s7 + $0x260] sm:$0xff] }
 0xe26   :  { %1602 = vmatpush.msra.mxu2 %v4673_v53  ;;  %1626 = vmatpush.msra.mxu0 %v4741_v40 }
 0xe28   :  { %1603 = vmatpush.msra.mxu2 %v4680_v27  ;;  %1627 = vmatpush.msra.mxu0 %v4748_v33 }
 0xe2a   :  { %1604 = vmatpush.msra.mxu2 %v4686_v13  ;;  %1628 = vmatpush.msra.mxu0 %v4755_v54 }
 0xe2c   :  { %1605 = vmatpush.msra.mxu2 %v4692_v30 }
 0xe2e   :  { %1606 = vmatpush.msra.mxu2 %v4697_v47 }
 0xe30   :  { %1607 = vmatpush.msra.mxu2 %v4703_v55 }
 0xe32   :  { %1608 = vmatpush.msra.mxu2 %v4709_v32 }
 0xea2   :  { %v1443_v41 = vpop.f32.mrf.mxu1 }
 0xea3   :  { %v1446_v43 = vmul.f32 %v1443_v41, %v3700_v17  ;;  %v4762_v41 = vld [vmem:[%s5999_s7 + $0x258] sm:$0xff] }
 0xea4   :  { %1629 = vmatpush.msra.mxu0 %v4762_v41 }
 0xea5   :  { %3110 = vmatmul.msk.f32.vlgmr.msrb.gmra.mxu3 %vm126_vm1, %v1446_v43  ;;  %v4769_v43 = vld [vmem:[%s5999_s7 + $0x250] sm:$0xff] }
 0xea6   :  { %1630 = vmatpush.msra.mxu0 %v4769_v43 }
 0xf28   :  { %v1467_v8 = vpop.f32.mrf.mxu3 }
 0xf29   :  { %v1470_v21 = vperm.slane %v1467_v8, 0  ;;  %v4776_v8 = vld [vmem:[%s5999_s7 + $0x248] sm:$0xff] }
 0xf2a   :  { %1631 = vmatpush.msra.mxu0 %v4776_v8 }
 0xf2b   :  { %v4648_v9 = vsub.f32 %v1417_v20, %v1470_v21  ;;  %v4650_v44 = vsub.f32 %v1418_v37, %v1470_v21  ;;  %v4724_v20 = vld [vmem:[%s6002_s6 + $0x3] ss:$0 sm:$0xff] }
 0xf2c   :  { %v1390_v37 = vadd.f32 %v4724_v20, %v1385_v19  ;;  %v1391_v24 = vadd.f32 %v4724_v20, %v1386_v0  ;;  %v4783_v21 = vld [vmem:[%s5999_s7 + $0x240] sm:$0xff] }
 0xf2d   :  { %v1473_v48 = vmul.f32 %v4648_v9, %v4648_v9  ;;  %v1474_v49 = vmul.f32 %v4650_v44, %v4650_v44  ;;  %1632 = vmatpush.msra.mxu0 %v4783_v21 }
 0xf2e   :  { %v1392_v63 = vmax.f32 %v1390_v37, 0.0  ;;  %v1393_v51 = vmax.f32 %v1391_v24, 0.0 }
 0xf2f   :  { %v1475_v42 = vmul.f32 %v1473_v48, %v3638_v34  ;;  %v1476_v52 = vmul.f32 %v1474_v49, %v3634_v23  ;;  %v4790_v48 = vld [vmem:[%s5999_s7 + $0x238] sm:$0xff]  ;;  %v4797_v49 = vld [vmem:[%s5999_s7 + $0x230] sm:$0xff] }
 0xf30   :  { %1633 = vmatpush.msra.mxu0 %v4790_v48 }
 0xf31   :  { %v1477_v56 = vadd.f32 %v1476_v52, %v1475_v42  ;;  %v4804_v42 = vld [vmem:[%s5999_s7 + $0x228] sm:$0xff]  ;;  %v4811_v52 = vld [vmem:[%s5999_s7 + $0x220] sm:$0xff] }
 0xf32   :  { %1634 = vmatpush.msra.mxu0 %v4797_v49 }
 0xf33   :  { %v1478_v25 = vrot.slane %v1477_v56, 4 }
 0xf34   :  { %1635 = vmatpush.msra.mxu0 %v4804_v42 }
 0xf35   :  { %v1479_v60 = vadd.f32 %v1478_v25, %v1477_v56  ;;  %v4818_v56 = vld [vmem:[%s5999_s7 + $0x218] sm:$0xff]  ;;  %v4825_v25 = vld [vmem:[%s5999_s7 + $0x210] sm:$0xff] }
 0xf36   :  { %1636 = vmatpush.msra.mxu0 %v4811_v52 }
 0xf37   :  { %v1480_v10 = vrot.slane %v1479_v60, 2 }
 0xf38   :  { %1637 = vmatpush.msra.mxu0 %v4818_v56 }
 0xf39   :  { %v1481_v26 = vadd.f32 %v1480_v10, %v1479_v60  ;;  %v4830_v60 = vld [vmem:[%s5999_s7 + $0x208] sm:$0xff]  ;;  %v4837_v10 = vld [vmem:[%s5999_s7 + $0x200] sm:$0xff] }
 0xf3a   :  { %1638 = vmatpush.msra.mxu0 %v4825_v25 }
 0xf3b   :  { %v1482_v29 = vrot.slane %v1481_v26, 1 }
 0xf3c   :  { %1639 = vmatpush.msra.mxu0 %v4830_v60 }
 0xf3d   :  { %v1483_v6 = vadd.f32 %v1482_v29, %v1481_v26  ;;  %v4848_v29 = vld [vmem:[%s6000_s8 + $0x48] sm:$0xff] }
 0xf3e   :  { %1640 = vmatpush.msra.mxu0 %v4837_v10  ;;  %1663 = vmatpush.msrb.mxu1 %v4848_v29 }
 0xf3f   :  { %1500 = vmatmul.f32.vlgmr.msra.gmra.mxu3 %v1483_v6  ;;  %v4853_v6 = vld [vmem:[%s6000_s8 + $0x40] sm:$0xff] }
 0xf40   :  { %1721 = vmatpush.msrb.mxu3 %v4848_v29  ;;  %1822 = vmatpush.msrb.mxu0 %v4848_v29 }
 0xf41   :  { %1664 = vmatpush.msrb.mxu1 %v4853_v6 }
 0xf42   :  { %1722 = vmatpush.msrb.mxu3 %v4853_v6  ;;  %1823 = vmatpush.msrb.mxu0 %v4853_v6 }
 0xf43   :  { %1683 = vmatpush.msra.mxu1 %v4734_v11 }
 0xf44   :  { %1752 = vmatpush.msra.mxu3 %v4610_v58 }
 0xf45   :  { %1684 = vmatpush.msra.mxu1 %v4741_v40 }
 0xf46   :  { %1753 = vmatpush.msra.mxu3 %v4615_v35 }
 0xf47   :  { %1685 = vmatpush.msra.mxu1 %v4748_v33 }
 0xf48   :  { %1754 = vmatpush.msra.mxu3 %v4621_v45 }
 0xf49   :  { %1686 = vmatpush.msra.mxu1 %v4755_v54 }
 0xf4a   :  { %1755 = vmatpush.msra.mxu3 %v4627_v38 }
 0xf4b   :  { %1687 = vmatpush.msra.mxu1 %v4762_v41 }
 0xf4c   :  { %1756 = vmatpush.msra.mxu3 %v4633_v1 }
 0xf4d   :  { %1688 = vmatpush.msra.mxu1 %v4769_v43 }
 0xf4e   :  { %1757 = vmatpush.msra.mxu3 %v4639_v4 }
 0xf4f   :  { %1689 = vmatpush.msra.mxu1 %v4776_v8 }
 0xf50   :  { %1758 = vmatpush.msra.mxu3 %v4645_v22 }
 0xf51   :  { %1690 = vmatpush.msra.mxu1 %v4783_v21 }
 0xf52   :  { %1759 = vmatpush.msra.mxu3 %v4655_v46 }
 0xf53   :  { %1691 = vmatpush.msra.mxu1 %v4790_v48 }
 0xf54   :  { %1760 = vmatpush.msra.mxu3 %v4665_v50 }
 0xf55   :  { %1692 = vmatpush.msra.mxu1 %v4797_v49 }
 0xf56   :  { %1761 = vmatpush.msra.mxu3 %v4673_v53 }
 0xf57   :  { %1693 = vmatpush.msra.mxu1 %v4804_v42 }
 0xf58   :  { %1762 = vmatpush.msra.mxu3 %v4680_v27 }
 0xf59   :  { %1694 = vmatpush.msra.mxu1 %v4811_v52 }
 0xf5a   :  { %1763 = vmatpush.msra.mxu3 %v4686_v13 }
 0xf5b   :  { %1695 = vmatpush.msra.mxu1 %v4818_v56 }
 0xf5c   :  { %1764 = vmatpush.msra.mxu3 %v4692_v30 }
 0xf5d   :  { %1696 = vmatpush.msra.mxu1 %v4825_v25 }
 0xf5e   :  { %1765 = vmatpush.msra.mxu3 %v4697_v47 }
 0xf5f   :  { %1697 = vmatpush.msra.mxu1 %v4830_v60 }
 0xf60   :  { %1766 = vmatpush.msra.mxu3 %v4703_v55 }
 0xf61   :  { %1698 = vmatpush.msra.mxu1 %v4837_v10 }
 0xf62   :  { %1767 = vmatpush.msra.mxu3 %v4709_v32 }
 0xfc2   :  { %v1501_v16 = vpop.f32.mrf.mxu3 }
 0xfc3   :  { %v1504_v18 = vmul.f32 %v1501_v16, %v3700_v17 }
 0xfc5   :  { %3111 = vmatmul.msk.f32.vlgmr.msrb.gmra.mxu2 %vm126_vm1, %v1504_v18 }
 0xfc6   :  { %1784 = vmatpush.msrb.mxu2 %v4734_v11 }
 0xfc8   :  { %1785 = vmatpush.msrb.mxu2 %v4741_v40 }
 0xfca   :  { %1786 = vmatpush.msrb.mxu2 %v4748_v33 }
 0xfcc   :  { %1787 = vmatpush.msrb.mxu2 %v4755_v54 }
 0xfcd   :  { %1609 = vmatmul.f32.vlgmr.msra.gmra.mxu2 %v1392_v63 }
 0xfce   :  { %1788 = vmatpush.msrb.mxu2 %v4762_v41 }
 0xfd0   :  { %1789 = vmatpush.msrb.mxu2 %v4769_v43 }
 0xfd2   :  { %1790 = vmatpush.msrb.mxu2 %v4776_v8 }
 0xfd4   :  { %1791 = vmatpush.msrb.mxu2 %v4783_v21 }
 0xfd5   :  { %1612 = vmatmul.f32.gmra.mxu2 %v1393_v51 }
 0xfd6   :  { %1792 = vmatpush.msrb.mxu2 %v4790_v48 }
 0xfd8   :  { %1793 = vmatpush.msrb.mxu2 %v4797_v49 }
 0xfda   :  { %1794 = vmatpush.msrb.mxu2 %v4804_v42 }
 0xfdc   :  { %1795 = vmatpush.msrb.mxu2 %v4811_v52 }
 0xfde   :  { %1796 = vmatpush.msrb.mxu2 %v4818_v56 }
 0xfe0   :  { %1797 = vmatpush.msrb.mxu2 %v4825_v25 }
 0xfe2   :  { %1798 = vmatpush.msrb.mxu2 %v4830_v60 }
 0xfe4   :  { %1799 = vmatpush.msrb.mxu2 %v4837_v10 }
0x1048   :  { %v4839_v26 = vpop.f32.mrf.mxu2 }
0x1049   :  { %v1526_v63 = vadd.f32 1e-05, %v4839_v26 }
0x104b   :  { %3332 = vrsqrt.f32 %v1526_v63  ;;  %vm1534_vm2 = vweird.f32 %v1526_v63 }
0x1050   :  { %v1610_v62 = vpop.f32.mrf.mxu2 }
0x1051   :  { %v1611_v58 = vadd.f32 %v4868_v61, %v1610_v62  ;;  %v3333_v0 = vpop.eup %3332 }
0x1052   :  { %v1529_v24 = vmul.f32 %v3333_v0, %v1526_v63  ;;  %vm1535_vm0 = vweird.f32 %v3333_v0 }
0x1053   :  { %v1616_v3 = vmul.f32 %v1611_v58, %v3538_v31  ;;  %vm1536_vm3 = vmor %vm1534_vm2, %vm1535_vm0 }
0x1054   :  { %v1530_v51 = vmul.f32 %v3333_v0, %v1529_v24 }
0x1058   :  { %v1613_v35 = vpop.f32.mrf.mxu2 }
0x1059   :  { %v1614_v28 = vadd.f32 %v4868_v61, %v1613_v35 }
0x105b   :  { %v1617_v45 = vmul.f32 %v1614_v28, %v3552_v39 }
0x105d   :  { %v1618_v38 = vadd.f32 %v1617_v45, %v1616_v3 }
0x105f   :  { %v1619_v1 = vrot.slane %v1618_v38, 4 }
0x1061   :  { %v1620_v5 = vadd.f32 %v1619_v1, %v1618_v38 }
0x1063   :  { %v1621_v4 = vrot.slane %v1620_v5, 2 }
0x1065   :  { %v1622_v22 = vadd.f32 %v1621_v4, %v1620_v5  ;;  %v4955_v5 = vld [vmem:[%s6003_s3 + $0x270] sm:$0xff]  ;;  %v4961_v4 = vld [vmem:[%s6003_s3 + $0x268] sm:$0xff] }
0x1067   :  { %v1623_v46 = vrot.slane %v1622_v22, 1 }
0x1069   :  { %v1624_v50 = vadd.f32 %v1623_v46, %v1622_v22  ;;  %v4967_v22 = vld [vmem:[%s6003_s3 + $0x260] sm:$0xff]  ;;  %v4973_v46 = vld [vmem:[%s6003_s3 + $0x258] sm:$0xff] }
0x106b   :  { %1641 = vmatmul.f32.vlgmr.msra.gmra.mxu0 %v1624_v50  ;;  %v4979_v50 = vld [vmem:[%s6003_s3 + $0x250] sm:$0xff] }
0x106c   :  { %1842 = vmatpush.msra.mxu0 %v4734_v11  ;;  %v1531_v11 = vmul.f32 0.5, %v1530_v51 }
0x106e   :  { %1843 = vmatpush.msra.mxu0 %v4741_v40  ;;  %v1532_v40 = vsub.f32 1.5, %v1531_v11 }
0x1070   :  { %1844 = vmatpush.msra.mxu0 %v4748_v33  ;;  %v1533_v33 = vmul.f32 %v3333_v0, %v1532_v40 }
0x1072   :  { %1845 = vmatpush.msra.mxu0 %v4755_v54  ;;  %v1537_v54 = vsel %vm1536_vm3, %v3333_v0, %v1533_v33  ;;  %v5020_v33 = vld [vmem:[%s6003_s3 + $0x228] sm:$0xff] }
0x1074   :  { %1846 = vmatpush.msra.mxu0 %v4762_v41  ;;  %v1538_v41 = vperm.slane %v1537_v54, 0  ;;  %v5026_v54 = vld [vmem:[%s6003_s3 + $0x220] sm:$0xff] }
0x1076   :  { %1847 = vmatpush.msra.mxu0 %v4769_v43  ;;  %v1539_v43 = vmul.f32 %v1538_v41, %v4648_v9 }
0x1078   :  { %1848 = vmatpush.msra.mxu0 %v4776_v8 }
0x107a   :  { %1849 = vmatpush.msra.mxu0 %v4783_v21 }
0x107c   :  { %1850 = vmatpush.msra.mxu0 %v4790_v48  ;;  %v1541_v48 = vmul.f32 %v4717_v15, %v1539_v43  ;;  %v5032_v43 = vld [vmem:[%s6003_s3 + $0x218] sm:$0xff] }
0x107e   :  { %1851 = vmatpush.msra.mxu0 %v4797_v49  ;;  %v1543_v49 = vadd.f32 %v4724_v20, %v1541_v48 }
0x1080   :  { %1852 = vmatpush.msra.mxu0 %v4804_v42  ;;  %v1540_v42 = vmul.f32 %v1538_v41, %v4650_v44 }
0x1082   :  { %1853 = vmatpush.msra.mxu0 %v4811_v52  ;;  %v1545_v52 = vmax.f32 %v1543_v49, 0.0  ;;  %v5049_v49 = vld [vmem:[%s6003_s3 + $0x200] sm:$0xff] }
0x1084   :  { %1854 = vmatpush.msra.mxu0 %v4818_v56  ;;  %v1542_v56 = vmul.f32 %v4717_v15, %v1540_v42 }
0x1086   :  { %1855 = vmatpush.msra.mxu0 %v4825_v25  ;;  %v1544_v25 = vadd.f32 %v4724_v20, %v1542_v56 }
0x1088   :  { %1856 = vmatpush.msra.mxu0 %v4830_v60  ;;  %v1546_v60 = vmax.f32 %v1544_v25, 0.0 }
0x108a   :  { %1857 = vmatpush.msra.mxu0 %v4837_v10 }
0x10e8   :  { %v1642_v53 = vpop.f32.mrf.mxu0 }
0x10e9   :  { %v1645_v27 = vmul.f32 %v1642_v53, %v3600_v2 }
0x10eb   :  { %3149 = vmatmul.msk.f32.vlgmr.msrb.gmra.mxu1 %vm126_vm1, %v1645_v27 }
0x10ec   :  { %1880 = vmatpush.msrb.mxu1 %v4848_v29 }
0x10ee   :  { %1881 = vmatpush.msrb.mxu1 %v4853_v6 }
0x1168   :  { %v1666_v13 = vpop.f32.mrf.mxu1 }
0x1169   :  { %v1669_v30 = vperm.slane %v1666_v13, 0  ;;  %v4985_v13 = vld [vmem:[%s6003_s3 + $0x248] sm:$0xff] }
0x116b   :  { %v4922_v47 = vsub.f32 %v1616_v3, %v1669_v30  ;;  %v4924_v55 = vsub.f32 %v1617_v45, %v1669_v30 }
0x116d   :  { %v1672_v32 = vmul.f32 %v4922_v47, %v4922_v47  ;;  %v1673_v7 = vmul.f32 %v4924_v55, %v4924_v55 }
0x116f   :  { %v1674_v12 = vmul.f32 %v1672_v32, %v3538_v31  ;;  %v1675_v14 = vmul.f32 %v1673_v7, %v3552_v39  ;;  %v4995_v7 = vld [vmem:[%s6003_s3 + $0x240] sm:$0xff] }
0x1171   :  { %v1676_v57 = vadd.f32 %v1675_v14, %v1674_v12 }
0x1173   :  { %v1677_v59 = vrot.slane %v1676_v57, 4 }
0x1175   :  { %v1678_v16 = vadd.f32 %v1677_v59, %v1676_v57  ;;  %v5005_v57 = vld [vmem:[%s6003_s3 + $0x238] sm:$0xff] }
0x1177   :  { %v1679_v18 = vrot.slane %v1678_v16, 2 }
0x1179   :  { %v1680_v19 = vadd.f32 %v1679_v18, %v1678_v16  ;;  %v5013_v18 = vld [vmem:[%s6003_s3 + $0x230] sm:$0xff] }
0x117b   :  { %v1681_v37 = vrot.slane %v1680_v19, 1 }
0x117d   :  { %v1682_v36 = vadd.f32 %v1681_v37, %v1680_v19 }
0x117f   :  { %1699 = vmatmul.f32.vlgmr.msra.gmra.mxu1 %v1682_v36 }
0x11fc   :  { %v1700_v8 = vpop.f32.mrf.mxu1 }
0x11fd   :  { %v1703_v21 = vmul.f32 %v1700_v8, %v3600_v2  ;;  %v5037_v8 = vld [vmem:[%s6003_s3 + $0x210] sm:$0xff] }
0x11ff   :  { %3150 = vmatmul.msk.f32.vlgmr.msrb.gmra.mxu3 %vm126_vm1, %v1703_v21  ;;  %v5043_v21 = vld [vmem:[%s6003_s3 + $0x208] sm:$0xff] }
0x1207   :  { %1768 = vmatmul.f32.vlgmr.msra.gmra.mxu3 %v1545_v52 }
0x120f   :  { %1771 = vmatmul.f32.gmra.mxu3 %v1546_v60 }
0x1282   :  { %v1724_v9 = vpop.f32.mrf.mxu3 }
0x1283   :  { %v1725_v11 = vadd.f32 1e-05, %v1724_v9 }
0x1285   :  { %3334 = vrsqrt.f32 %v1725_v11  ;;  %vm1733_vm5 = vweird.f32 %v1725_v11 }
0x128a   :  { %v1769_v10 = vpop.f32.mrf.mxu3 }
0x128b   :  { %v1770_v26 = vadd.f32 %v4868_v61, %v1769_v10  ;;  %v3335_v40 = vpop.eup %3334  ;;  %v5057_v10 = vld [vmem:[%s6001_s5 + $0x4] ss:$0 sm:$0xff] }
0x128c   :  { %v1728_v41 = vmul.f32 %v3335_v40, %v1725_v11  ;;  %vm1734_vm4 = vweird.f32 %v3335_v40 }
0x128d   :  { %v1775_v62 = vmul.f32 %v1770_v26, %v3638_v34  ;;  %vm1735_vm6 = vmor %vm1733_vm5, %vm1734_vm4 }
0x128e   :  { %v1729_v48 = vmul.f32 %v3335_v40, %v1728_v41 }
0x1290   :  { %v1730_v42 = vmul.f32 0.5, %v1729_v48 }
0x1292   :  { %v1772_v29 = vpop.f32.mrf.mxu3  ;;  %v1731_v52 = vsub.f32 1.5, %v1730_v42 }
0x1293   :  { %v1773_v6 = vadd.f32 %v4868_v61, %v1772_v29  ;;  %v4950_v61 = vld [vmem:[%s6003_s3 + $0x278] sm:$0xff] }
0x1294   :  { %1951 = vmatpush.msra.mxu1 %v4950_v61  ;;  %v1732_v56 = vmul.f32 %v3335_v40, %v1731_v52 }
0x1295   :  { %v1776_v58 = vmul.f32 %v1773_v6, %v3634_v23 }
0x1296   :  { %1952 = vmatpush.msra.mxu1 %v4955_v5  ;;  %v1736_v25 = vsel %vm1735_vm6, %v3335_v40, %v1732_v56  ;;  %v5208_v40 = vld [vmem:[%s5998_s4 + $0x5] ss:$0 sm:$0xff] }
0x1297   :  { %v1777_v44 = vadd.f32 %v1776_v58, %v1775_v62  ;;  %v1737_v60 = vperm.slane %v1736_v25, 0 }
0x1298   :  { %1953 = vmatpush.msra.mxu1 %v4961_v4 }
0x1299   :  { %v1778_v35 = vrot.slane %v1777_v44, 4  ;;  %v1738_v9 = vmul.f32 %v1737_v60, %v4922_v47  ;;  %v1739_v47 = vmul.f32 %v1737_v60, %v4924_v55  ;;  %v5081_v55 = vld [vmem:[%s5999_s7 + $0x2f0] sm:$0xff] }
0x129a   :  { %1954 = vmatpush.msra.mxu1 %v4967_v22 }
0x129b   :  { %v1779_v28 = vadd.f32 %v1778_v35, %v1777_v44  ;;  %v1743_v6 = vmul.f32 %v5057_v10, %v1738_v9  ;;  %v1744_v35 = vmul.f32 %v5057_v10, %v1739_v47 }
0x129c   :  { %1955 = vmatpush.msra.mxu1 %v4973_v46 }
0x129d   :  { %v1780_v15 = vrot.slane %v1779_v28, 2 }
0x129e   :  { %1956 = vmatpush.msra.mxu1 %v4979_v50 }
0x129f   :  { %v1781_v3 = vadd.f32 %v1780_v15, %v1779_v28 }
0x12a0   :  { %1957 = vmatpush.msra.mxu1 %v4985_v13 }
0x12a1   :  { %v1782_v45 = vrot.slane %v1781_v3, 1 }
0x12a2   :  { %1958 = vmatpush.msra.mxu1 %v4995_v7 }
0x12a3   :  { %v1783_v20 = vadd.f32 %v1782_v45, %v1781_v3  ;;  %v5074_v3 = vld [vmem:[%s5999_s7 + $0x2f8] sm:$0xff]  ;;  %v5088_v45 = vld [vmem:[%s5999_s7 + $0x2e8] sm:$0xff] }
0x12a4   :  { %1959 = vmatpush.msra.mxu1 %v5005_v57  ;;  %1983 = vmatpush.msrb.mxu3 %v5074_v3 }
0x12a5   :  { %1800 = vmatmul.f32.vlgmr.msrb.gmra.mxu2 %v1783_v20  ;;  %v5095_v20 = vld [vmem:[%s5999_s7 + $0x2e0] sm:$0xff] }
0x12a6   :  { %1960 = vmatpush.msra.mxu1 %v5013_v18  ;;  %1984 = vmatpush.msrb.mxu3 %v5081_v55 }
0x12a8   :  { %1961 = vmatpush.msra.mxu1 %v5020_v33  ;;  %1985 = vmatpush.msrb.mxu3 %v5088_v45 }
0x12aa   :  { %1962 = vmatpush.msra.mxu1 %v5026_v54  ;;  %1986 = vmatpush.msrb.mxu3 %v5095_v20 }
0x12ac   :  { %1963 = vmatpush.msra.mxu1 %v5032_v43 }
0x12ae   :  { %1964 = vmatpush.msra.mxu1 %v5037_v8 }
0x12b0   :  { %1965 = vmatpush.msra.mxu1 %v5043_v21 }
0x12b2   :  { %1966 = vmatpush.msra.mxu1 %v5049_v49 }
0x1328   :  { %v1801_v38 = vpop.f32.mrf.mxu2 }
0x1329   :  { %v1804_v1 = vmul.f32 %v1801_v38, %v3700_v17  ;;  %v5102_v38 = vld [vmem:[%s5999_s7 + $0x2d8] sm:$0xff] }
0x132a   :  { %1987 = vmatpush.msrb.mxu3 %v5102_v38 }
0x132b   :  { %3151 = vmatmul.msk.f32.vlgmr.msrb.gmra.mxu0 %vm126_vm1, %v1804_v1  ;;  %v5109_v1 = vld [vmem:[%s5999_s7 + $0x2d0] sm:$0xff] }
0x132c   :  { %1988 = vmatpush.msrb.mxu3 %v5109_v1 }
0x13a8   :  { %v1825_v53 = vpop.f32.mrf.mxu0 }
0x13a9   :  { %v1828_v27 = vperm.slane %v1825_v53, 0  ;;  %v5116_v53 = vld [vmem:[%s5999_s7 + $0x2c8] sm:$0xff] }
0x13aa   :  { %1989 = vmatpush.msrb.mxu3 %v5116_v53 }
0x13ab   :  { %v4988_v30 = vsub.f32 %v1775_v62, %v1828_v27  ;;  %v4990_v32 = vsub.f32 %v1776_v58, %v1828_v27  ;;  %v5064_v62 = vld [vmem:[%s6002_s6 + $0x4] ss:$0 sm:$0xff] }
0x13ac   :  { %v1748_v58 = vadd.f32 %v5064_v62, %v1743_v6  ;;  %v1749_v28 = vadd.f32 %v5064_v62, %v1744_v35  ;;  %v5123_v27 = vld [vmem:[%s5999_s7 + $0x2c0] sm:$0xff] }
0x13ad   :  { %v1831_v12 = vmul.f32 %v4988_v30, %v4988_v30  ;;  %v1832_v14 = vmul.f32 %v4990_v32, %v4990_v32  ;;  %1990 = vmatpush.msrb.mxu3 %v5123_v27 }
0x13ae   :  { %v1750_v44 = vmax.f32 %v1748_v58, 0.0  ;;  %v1751_v15 = vmax.f32 %v1749_v28, 0.0 }
0x13af   :  { %v1833_v59 = vmul.f32 %v1831_v12, %v3638_v34  ;;  %v1834_v16 = vmul.f32 %v1832_v14, %v3634_v23  ;;  %v5130_v12 = vld [vmem:[%s5999_s7 + $0x2b8] sm:$0xff]  ;;  %v5137_v14 = vld [vmem:[%s5999_s7 + $0x2b0] sm:$0xff] }
0x13b0   :  { %1991 = vmatpush.msrb.mxu3 %v5130_v12 }
0x13b1   :  { %v1835_v19 = vadd.f32 %v1834_v16, %v1833_v59  ;;  %v5144_v59 = vld [vmem:[%s5999_s7 + $0x2a8] sm:$0xff]  ;;  %v5151_v16 = vld [vmem:[%s5999_s7 + $0x2a0] sm:$0xff] }
0x13b2   :  { %1992 = vmatpush.msrb.mxu3 %v5137_v14 }
0x13b3   :  { %v1836_v37 = vrot.slane %v1835_v19, 4 }
0x13b4   :  { %1993 = vmatpush.msrb.mxu3 %v5144_v59 }
0x13b5   :  { %v1837_v36 = vadd.f32 %v1836_v37, %v1835_v19  ;;  %v5158_v19 = vld [vmem:[%s5999_s7 + $0x298] sm:$0xff]  ;;  %v5165_v37 = vld [vmem:[%s5999_s7 + $0x290] sm:$0xff] }
0x13b6   :  { %1994 = vmatpush.msrb.mxu3 %v5151_v16 }
0x13b7   :  { %v1838_v63 = vrot.slane %v1837_v36, 2 }
0x13b8   :  { %1995 = vmatpush.msrb.mxu3 %v5158_v19 }
0x13b9   :  { %v1839_v0 = vadd.f32 %v1838_v63, %v1837_v36  ;;  %v5170_v36 = vld [vmem:[%s5999_s7 + $0x288] sm:$0xff]  ;;  %v5177_v63 = vld [vmem:[%s5999_s7 + $0x280] sm:$0xff] }
0x13ba   :  { %1996 = vmatpush.msrb.mxu3 %v5165_v37 }
0x13bb   :  { %v1840_v24 = vrot.slane %v1839_v0, 1 }
0x13bc   :  { %1997 = vmatpush.msrb.mxu3 %v5170_v36 }
0x13bd   :  { %v1841_v51 = vadd.f32 %v1840_v24, %v1839_v0  ;;  %v5188_v24 = vld [vmem:[%s6000_s8 + $0x58] sm:$0xff] }
0x13be   :  { %1998 = vmatpush.msrb.mxu3 %v5177_v63  ;;  %2021 = vmatpush.msra.mxu2 %v5188_v24 }
0x13bf   :  { %1858 = vmatmul.f32.vlgmr.msra.gmra.mxu0 %v1841_v51  ;;  %v5193_v51 = vld [vmem:[%s6000_s8 + $0x50] sm:$0xff] }
0x13c0   :  { %2079 = vmatpush.msrb.mxu0 %v5188_v24  ;;  %2180 = vmatpush.msra.mxu3 %v5188_v24 }
0x13c1   :  { %2022 = vmatpush.msra.mxu2 %v5193_v51 }
0x13c2   :  { %2080 = vmatpush.msrb.mxu0 %v5193_v51  ;;  %2181 = vmatpush.msra.mxu3 %v5193_v51 }
0x13c3   :  { %2041 = vmatpush.msrb.mxu2 %v5074_v3 }
0x13c4   :  { %2110 = vmatpush.msra.mxu0 %v4950_v61 }
0x13c5   :  { %2042 = vmatpush.msrb.mxu2 %v5081_v55 }
0x13c6   :  { %2111 = vmatpush.msra.mxu0 %v4955_v5 }
0x13c7   :  { %2043 = vmatpush.msrb.mxu2 %v5088_v45 }
0x13c8   :  { %2112 = vmatpush.msra.mxu0 %v4961_v4 }
0x13c9   :  { %2044 = vmatpush.msrb.mxu2 %v5095_v20 }
0x13ca   :  { %2113 = vmatpush.msra.mxu0 %v4967_v22 }
0x13cb   :  { %2045 = vmatpush.msrb.mxu2 %v5102_v38 }
0x13cc   :  { %2114 = vmatpush.msra.mxu0 %v4973_v46 }
0x13cd   :  { %2046 = vmatpush.msrb.mxu2 %v5109_v1 }
0x13ce   :  { %2115 = vmatpush.msra.mxu0 %v4979_v50 }
0x13cf   :  { %2047 = vmatpush.msrb.mxu2 %v5116_v53 }
0x13d0   :  { %2116 = vmatpush.msra.mxu0 %v4985_v13 }
0x13d1   :  { %2048 = vmatpush.msrb.mxu2 %v5123_v27 }
0x13d2   :  { %2117 = vmatpush.msra.mxu0 %v4995_v7 }
0x13d3   :  { %2049 = vmatpush.msrb.mxu2 %v5130_v12 }
0x13d4   :  { %2118 = vmatpush.msra.mxu0 %v5005_v57 }
0x13d5   :  { %2050 = vmatpush.msrb.mxu2 %v5137_v14 }
0x13d6   :  { %2119 = vmatpush.msra.mxu0 %v5013_v18 }
0x13d7   :  { %2051 = vmatpush.msrb.mxu2 %v5144_v59 }
0x13d8   :  { %2120 = vmatpush.msra.mxu0 %v5020_v33 }
0x13d9   :  { %2052 = vmatpush.msrb.mxu2 %v5151_v16 }
0x13da   :  { %2121 = vmatpush.msra.mxu0 %v5026_v54 }
0x13db   :  { %2053 = vmatpush.msrb.mxu2 %v5158_v19 }
0x13dc   :  { %2122 = vmatpush.msra.mxu0 %v5032_v43 }
0x13dd   :  { %2054 = vmatpush.msrb.mxu2 %v5165_v37 }
0x13de   :  { %2123 = vmatpush.msra.mxu0 %v5037_v8 }
0x13df   :  { %2055 = vmatpush.msrb.mxu2 %v5170_v36 }
0x13e0   :  { %2124 = vmatpush.msra.mxu0 %v5043_v21 }
0x13e1   :  { %2056 = vmatpush.msrb.mxu2 %v5177_v63 }
0x13e2   :  { %2125 = vmatpush.msra.mxu0 %v5049_v49 }
0x143c   :  { %v1859_v26 = vpop.f32.mrf.mxu0 }
0x143d   :  { %v1862_v29 = vmul.f32 %v1859_v26, %v3700_v17 }
0x143f   :  { %3152 = vmatmul.msk.f32.vlgmr.msrb.gmra.mxu1 %vm126_vm1, %v1862_v29 }
0x1440   :  { %2142 = vmatpush.msrb.mxu1 %v5074_v3 }
0x1442   :  { %2143 = vmatpush.msrb.mxu1 %v5081_v55 }
0x1444   :  { %2144 = vmatpush.msrb.mxu1 %v5088_v45 }
0x1446   :  { %2145 = vmatpush.msrb.mxu1 %v5095_v20 }
0x1447   :  { %1967 = vmatmul.f32.vlgmr.msra.gmra.mxu1 %v1750_v44 }
0x1448   :  { %2146 = vmatpush.msrb.mxu1 %v5102_v38 }
0x144a   :  { %2147 = vmatpush.msrb.mxu1 %v5109_v1 }
0x144c   :  { %2148 = vmatpush.msrb.mxu1 %v5116_v53 }
0x144e   :  { %2149 = vmatpush.msrb.mxu1 %v5123_v27 }
0x144f   :  { %1970 = vmatmul.f32.gmra.mxu1 %v1751_v15 }
0x1450   :  { %2150 = vmatpush.msrb.mxu1 %v5130_v12 }
0x1452   :  { %2151 = vmatpush.msrb.mxu1 %v5137_v14 }
0x1454   :  { %2152 = vmatpush.msrb.mxu1 %v5144_v59 }
0x1456   :  { %2153 = vmatpush.msrb.mxu1 %v5151_v16 }
0x1458   :  { %2154 = vmatpush.msrb.mxu1 %v5158_v19 }
0x145a   :  { %2155 = vmatpush.msrb.mxu1 %v5165_v37 }
0x145c   :  { %2156 = vmatpush.msrb.mxu1 %v5170_v36 }
0x145e   :  { %2157 = vmatpush.msrb.mxu1 %v5177_v63 }
0x14bc   :  { %v5179_v0 = vpop.f32.mrf.mxu1 }
0x14bd   :  { %v1884_v44 = vadd.f32 1e-05, %v5179_v0 }
0x14bf   :  { %3336 = vrsqrt.f32 %v1884_v44  ;;  %vm1892_vm8 = vweird.f32 %v1884_v44 }
0x14c4   :  { %v1968_v11 = vpop.f32.mrf.mxu1 }
0x14c5   :  { %v1969_v61 = vadd.f32 %v5208_v40, %v1968_v11  ;;  %v3337_v35 = vpop.eup %3336 }
0x14c6   :  { %v1887_v28 = vmul.f32 %v3337_v35, %v1884_v44  ;;  %vm1893_vm7 = vweird.f32 %v3337_v35 }
0x14c7   :  { %v1974_v48 = vmul.f32 %v1969_v61, %v3538_v31  ;;  %vm1894_vm9 = vmor %vm1892_vm8, %vm1893_vm7 }
0x14c8   :  { %v1888_v15 = vmul.f32 %v3337_v35, %v1887_v28 }
0x14cc   :  { %v1971_v5 = vpop.f32.mrf.mxu1 }
0x14cd   :  { %v1972_v41 = vadd.f32 %v5208_v40, %v1971_v5 }
0x14cf   :  { %v1975_v4 = vmul.f32 %v1972_v41, %v3552_v39 }
0x14d1   :  { %v1976_v22 = vadd.f32 %v1975_v4, %v1974_v48 }
0x14d3   :  { %v1977_v46 = vrot.slane %v1976_v22, 4 }
0x14d5   :  { %v1978_v42 = vadd.f32 %v1977_v46, %v1976_v22 }
0x14d7   :  { %v1979_v50 = vrot.slane %v1978_v42, 2 }
0x14d9   :  { %v1980_v13 = vadd.f32 %v1979_v50, %v1978_v42  ;;  %v5295_v42 = vld [vmem:[%s6003_s3 + $0x2f0] sm:$0xff]  ;;  %v5301_v50 = vld [vmem:[%s6003_s3 + $0x2e8] sm:$0xff] }
0x14db   :  { %v1981_v7 = vrot.slane %v1980_v13, 1 }
0x14dd   :  { %v1982_v57 = vadd.f32 %v1981_v7, %v1980_v13  ;;  %v5307_v13 = vld [vmem:[%s6003_s3 + $0x2e0] sm:$0xff]  ;;  %v5313_v7 = vld [vmem:[%s6003_s3 + $0x2d8] sm:$0xff] }
0x14df   :  { %1999 = vmatmul.f32.vlgmr.msrb.gmra.mxu3 %v1982_v57  ;;  %v5319_v57 = vld [vmem:[%s6003_s3 + $0x2d0] sm:$0xff] }
0x14e0   :  { %2200 = vmatpush.msrb.mxu3 %v5074_v3  ;;  %v1889_v3 = vmul.f32 0.5, %v1888_v15 }
0x14e2   :  { %2201 = vmatpush.msrb.mxu3 %v5081_v55  ;;  %v1890_v55 = vsub.f32 1.5, %v1889_v3 }
0x14e4   :  { %2202 = vmatpush.msrb.mxu3 %v5088_v45  ;;  %v1891_v45 = vmul.f32 %v3337_v35, %v1890_v55 }
0x14e6   :  { %2203 = vmatpush.msrb.mxu3 %v5095_v20  ;;  %v1895_v20 = vsel %vm1894_vm9, %v3337_v35, %v1891_v45  ;;  %v5360_v45 = vld [vmem:[%s6003_s3 + $0x2a8] sm:$0xff] }
0x14e8   :  { %2204 = vmatpush.msrb.mxu3 %v5102_v38  ;;  %v1896_v38 = vperm.slane %v1895_v20, 0  ;;  %v5366_v20 = vld [vmem:[%s6003_s3 + $0x2a0] sm:$0xff] }
0x14ea   :  { %2205 = vmatpush.msrb.mxu3 %v5109_v1  ;;  %v1897_v1 = vmul.f32 %v1896_v38, %v4988_v30 }
0x14ec   :  { %2206 = vmatpush.msrb.mxu3 %v5116_v53 }
0x14ee   :  { %2207 = vmatpush.msrb.mxu3 %v5123_v27 }
0x14f0   :  { %2208 = vmatpush.msrb.mxu3 %v5130_v12  ;;  %v1899_v12 = vmul.f32 %v5057_v10, %v1897_v1  ;;  %v5372_v1 = vld [vmem:[%s6003_s3 + $0x298] sm:$0xff] }
0x14f2   :  { %2209 = vmatpush.msrb.mxu3 %v5137_v14  ;;  %v1901_v14 = vadd.f32 %v5064_v62, %v1899_v12 }
0x14f4   :  { %2210 = vmatpush.msrb.mxu3 %v5144_v59  ;;  %v1898_v59 = vmul.f32 %v1896_v38, %v4990_v32 }
0x14f6   :  { %2211 = vmatpush.msrb.mxu3 %v5151_v16  ;;  %v1903_v16 = vmax.f32 %v1901_v14, 0.0  ;;  %v5389_v14 = vld [vmem:[%s6003_s3 + $0x280] sm:$0xff] }
0x14f8   :  { %2212 = vmatpush.msrb.mxu3 %v5158_v19  ;;  %v1900_v19 = vmul.f32 %v5057_v10, %v1898_v59 }
0x14fa   :  { %2213 = vmatpush.msrb.mxu3 %v5165_v37  ;;  %v1902_v37 = vadd.f32 %v5064_v62, %v1900_v19 }
0x14fc   :  { %2214 = vmatpush.msrb.mxu3 %v5170_v36  ;;  %v1904_v36 = vmax.f32 %v1902_v37, 0.0 }
0x14fe   :  { %2215 = vmatpush.msrb.mxu3 %v5177_v63 }
0x1562   :  { %v2000_v18 = vpop.f32.mrf.mxu3 }
0x1563   :  { %v2003_v33 = vmul.f32 %v2000_v18, %v3600_v2 }
0x1565   :  { %3190 = vmatmul.msk.f32.vlgmr.msra.gmra.mxu2 %vm126_vm1, %v2003_v33 }
0x1566   :  { %2238 = vmatpush.msra.mxu2 %v5188_v24 }
0x1568   :  { %2239 = vmatpush.msra.mxu2 %v5193_v51 }
0x15e8   :  { %v2024_v54 = vpop.f32.mrf.mxu2 }
0x15e9   :  { %v2027_v43 = vperm.slane %v2024_v54, 0  ;;  %v5325_v54 = vld [vmem:[%s6003_s3 + $0x2c8] sm:$0xff] }
0x15eb   :  { %v5262_v8 = vsub.f32 %v1974_v48, %v2027_v43  ;;  %v5264_v21 = vsub.f32 %v1975_v4, %v2027_v43 }
0x15ed   :  { %v2030_v49 = vmul.f32 %v5262_v8, %v5262_v8  ;;  %v2031_v52 = vmul.f32 %v5264_v21, %v5264_v21 }
0x15ef   :  { %v2032_v56 = vmul.f32 %v2030_v49, %v3538_v31  ;;  %v2033_v25 = vmul.f32 %v2031_v52, %v3552_v39  ;;  %v5335_v52 = vld [vmem:[%s6003_s3 + $0x2c0] sm:$0xff] }
0x15f1   :  { %v2034_v60 = vadd.f32 %v2033_v25, %v2032_v56 }
0x15f3   :  { %v2035_v9 = vrot.slane %v2034_v60, 4 }
0x15f5   :  { %v2036_v26 = vadd.f32 %v2035_v9, %v2034_v60  ;;  %v5345_v60 = vld [vmem:[%s6003_s3 + $0x2b8] sm:$0xff] }
0x15f7   :  { %v2037_v29 = vrot.slane %v2036_v26, 2 }
0x15f9   :  { %v2038_v6 = vadd.f32 %v2037_v29, %v2036_v26  ;;  %v5353_v29 = vld [vmem:[%s6003_s3 + $0x2b0] sm:$0xff] }
0x15fb   :  { %v2039_v58 = vrot.slane %v2038_v6, 1 }
0x15fd   :  { %v2040_v47 = vadd.f32 %v2039_v58, %v2038_v6 }
0x15ff   :  { %2057 = vmatmul.f32.vlgmr.msrb.gmra.mxu2 %v2040_v47 }
0x1682   :  { %v2058_v53 = vpop.f32.mrf.mxu2 }
0x1683   :  { %v2061_v27 = vmul.f32 %v2058_v53, %v3600_v2  ;;  %v5377_v53 = vld [vmem:[%s6003_s3 + $0x290] sm:$0xff] }
0x1685   :  { %3191 = vmatmul.msk.f32.vlgmr.msrb.gmra.mxu0 %vm126_vm1, %v2061_v27  ;;  %v5383_v27 = vld [vmem:[%s6003_s3 + $0x288] sm:$0xff] }
0x168d   :  { %2126 = vmatmul.f32.vlgmr.msra.gmra.mxu0 %v1903_v16 }
0x1695   :  { %2129 = vmatmul.f32.gmra.mxu0 %v1904_v36 }
0x1702   :  { %v2082_v30 = vpop.f32.mrf.mxu0 }
0x1703   :  { %v2083_v3 = vadd.f32 1e-05, %v2082_v30 }
0x1705   :  { %3338 = vrsqrt.f32 %v2083_v3  ;;  %vm2091_vm11 = vweird.f32 %v2083_v3 }
0x170a   :  { %v2127_v63 = vpop.f32.mrf.mxu0 }
0x170b   :  { %v2128_v0 = vadd.f32 %v5208_v40, %v2127_v63  ;;  %v3339_v55 = vpop.eup %3338  ;;  %v5397_v63 = vld [vmem:[%s6001_s5 + $0x5] ss:$0 sm:$0xff] }
0x170c   :  { %v2086_v38 = vmul.f32 %v3339_v55, %v2083_v3  ;;  %vm2092_vm10 = vweird.f32 %v3339_v55 }
0x170d   :  { %v2133_v11 = vmul.f32 %v2128_v0, %v3638_v34  ;;  %vm2093_vm12 = vmor %vm2091_vm11, %vm2092_vm10  ;;  %vm2981_vm10 = vcmask 64512  }
0x170e   :  { %v2087_v12 = vmul.f32 %v3339_v55, %v2086_v38 }
0x1710   :  { %v2088_v59 = vmul.f32 0.5, %v2087_v12 }
0x1712   :  { %v2130_v24 = vpop.f32.mrf.mxu0  ;;  %v2089_v16 = vsub.f32 1.5, %v2088_v59 }
0x1713   :  { %v2131_v51 = vadd.f32 %v5208_v40, %v2130_v24  ;;  %v5290_v40 = vld [vmem:[%s6003_s3 + $0x2f8] sm:$0xff] }
0x1714   :  { %2309 = vmatpush.msrb.mxu2 %v5290_v40  ;;  %v2090_v19 = vmul.f32 %v3339_v55, %v2089_v16 }
0x1715   :  { %v2134_v61 = vmul.f32 %v2131_v51, %v3634_v23 }
0x1716   :  { %2310 = vmatpush.msrb.mxu2 %v5295_v42  ;;  %v2094_v37 = vsel %vm2093_vm12, %v3339_v55, %v2090_v19  ;;  %v5548_v55 = vld [vmem:[%s5998_s4 + $0x6] ss:$0 sm:$0xff] }
0x1717   :  { %v2135_v32 = vadd.f32 %v2134_v61, %v2133_v11  ;;  %v2095_v36 = vperm.slane %v2094_v37, 0 }
0x1718   :  { %2311 = vmatpush.msrb.mxu2 %v5301_v50 }
0x1719   :  { %v2136_v5 = vrot.slane %v2135_v32, 4  ;;  %v2096_v30 = vmul.f32 %v2095_v36, %v5262_v8  ;;  %v2097_v8 = vmul.f32 %v2095_v36, %v5264_v21  ;;  %v5421_v21 = vld [vmem:[%s5999_s7 + $0x370] sm:$0xff] }
0x171a   :  { %2312 = vmatpush.msrb.mxu2 %v5307_v13 }
0x171b   :  { %v2137_v41 = vadd.f32 %v2136_v5, %v2135_v32  ;;  %v2101_v51 = vmul.f32 %v5397_v63, %v2096_v30  ;;  %v2102_v5 = vmul.f32 %v5397_v63, %v2097_v8 }
0x171c   :  { %2313 = vmatpush.msrb.mxu2 %v5313_v7 }
0x171d   :  { %v2138_v10 = vrot.slane %v2137_v41, 2 }
0x171e   :  { %2314 = vmatpush.msrb.mxu2 %v5319_v57 }
0x171f   :  { %v2139_v48 = vadd.f32 %v2138_v10, %v2137_v41 }
0x1720   :  { %2315 = vmatpush.msrb.mxu2 %v5325_v54 }
0x1721   :  { %v2140_v4 = vrot.slane %v2139_v48, 1 }
0x1722   :  { %2316 = vmatpush.msrb.mxu2 %v5335_v52 }
0x1723   :  { %v2141_v62 = vadd.f32 %v2140_v4, %v2139_v48  ;;  %v5414_v48 = vld [vmem:[%s5999_s7 + $0x378] sm:$0xff]  ;;  %v5428_v4 = vld [vmem:[%s5999_s7 + $0x368] sm:$0xff] }
0x1724   :  { %2317 = vmatpush.msrb.mxu2 %v5345_v60  ;;  %2341 = vmatpush.msrb.mxu0 %v5414_v48 }
0x1725   :  { %2158 = vmatmul.f32.vlgmr.msrb.gmra.mxu1 %v2141_v62  ;;  %v5435_v62 = vld [vmem:[%s5999_s7 + $0x360] sm:$0xff] }
0x1726   :  { %2318 = vmatpush.msrb.mxu2 %v5353_v29  ;;  %2342 = vmatpush.msrb.mxu0 %v5421_v21 }
0x1728   :  { %2319 = vmatpush.msrb.mxu2 %v5360_v45  ;;  %2343 = vmatpush.msrb.mxu0 %v5428_v4 }
0x172a   :  { %2320 = vmatpush.msrb.mxu2 %v5366_v20  ;;  %2344 = vmatpush.msrb.mxu0 %v5435_v62 }
0x172c   :  { %2321 = vmatpush.msrb.mxu2 %v5372_v1 }
0x172e   :  { %2322 = vmatpush.msrb.mxu2 %v5377_v53 }
0x1730   :  { %2323 = vmatpush.msrb.mxu2 %v5383_v27 }
0x1732   :  { %2324 = vmatpush.msrb.mxu2 %v5389_v14 }
0x17a2   :  { %v2159_v22 = vpop.f32.mrf.mxu1 }
0x17a3   :  { %v2162_v46 = vmul.f32 %v2159_v22, %v3700_v17  ;;  %v5442_v22 = vld [vmem:[%s5999_s7 + $0x358] sm:$0xff] }
0x17a4   :  { %2345 = vmatpush.msrb.mxu0 %v5442_v22 }
0x17a5   :  { %3192 = vmatmul.msk.f32.vlgmr.msra.gmra.mxu3 %vm126_vm1, %v2162_v46  ;;  %v5449_v46 = vld [vmem:[%s5999_s7 + $0x350] sm:$0xff] }
0x17a6   :  { %2346 = vmatpush.msrb.mxu0 %v5449_v46 }
0x1828   :  { %v2183_v18 = vpop.f32.mrf.mxu3 }
0x1829   :  { %v2186_v33 = vperm.slane %v2183_v18, 0  ;;  %v5456_v18 = vld [vmem:[%s5999_s7 + $0x348] sm:$0xff] }
0x182a   :  { %2347 = vmatpush.msrb.mxu0 %v5456_v18 }
0x182b   :  { %v5328_v43 = vsub.f32 %v2133_v11, %v2186_v33  ;;  %v5330_v49 = vsub.f32 %v2134_v61, %v2186_v33  ;;  %v5404_v11 = vld [vmem:[%s6002_s6 + $0x5] ss:$0 sm:$0xff] }
0x182c   :  { %v2106_v61 = vadd.f32 %v5404_v11, %v2101_v51  ;;  %v2107_v41 = vadd.f32 %v5404_v11, %v2102_v5  ;;  %v5463_v33 = vld [vmem:[%s5999_s7 + $0x340] sm:$0xff] }
0x182d   :  { %v2189_v56 = vmul.f32 %v5328_v43, %v5328_v43  ;;  %v2190_v25 = vmul.f32 %v5330_v49, %v5330_v49  ;;  %2348 = vmatpush.msrb.mxu0 %v5463_v33 }
0x182e   :  { %v2108_v32 = vmax.f32 %v2106_v61, 0.0  ;;  %v2109_v10 = vmax.f32 %v2107_v41, 0.0 }
0x182f   :  { %v2191_v9 = vmul.f32 %v2189_v56, %v3638_v34  ;;  %v2192_v26 = vmul.f32 %v2190_v25, %v3634_v23  ;;  %v5470_v56 = vld [vmem:[%s5999_s7 + $0x338] sm:$0xff]  ;;  %v5477_v25 = vld [vmem:[%s5999_s7 + $0x330] sm:$0xff] }
0x1830   :  { %2349 = vmatpush.msrb.mxu0 %v5470_v56 }
0x1831   :  { %v2193_v6 = vadd.f32 %v2192_v26, %v2191_v9  ;;  %v5484_v9 = vld [vmem:[%s5999_s7 + $0x328] sm:$0xff]  ;;  %v5491_v26 = vld [vmem:[%s5999_s7 + $0x320] sm:$0xff] }
0x1832   :  { %2350 = vmatpush.msrb.mxu0 %v5477_v25 }
0x1833   :  { %v2194_v58 = vrot.slane %v2193_v6, 4 }
0x1834   :  { %2351 = vmatpush.msrb.mxu0 %v5484_v9 }
0x1835   :  { %v2195_v47 = vadd.f32 %v2194_v58, %v2193_v6  ;;  %v5498_v6 = vld [vmem:[%s5999_s7 + $0x318] sm:$0xff]  ;;  %v5505_v58 = vld [vmem:[%s5999_s7 + $0x310] sm:$0xff] }
0x1836   :  { %2352 = vmatpush.msrb.mxu0 %v5491_v26 }
0x1837   :  { %v2196_v44 = vrot.slane %v2195_v47, 2 }
0x1838   :  { %2353 = vmatpush.msrb.mxu0 %v5498_v6 }
0x1839   :  { %v2197_v35 = vadd.f32 %v2196_v44, %v2195_v47  ;;  %v5510_v47 = vld [vmem:[%s5999_s7 + $0x308] sm:$0xff]  ;;  %v5517_v44 = vld [vmem:[%s5999_s7 + $0x300] sm:$0xff] }
0x183a   :  { %2354 = vmatpush.msrb.mxu0 %v5505_v58 }
0x183b   :  { %v2198_v28 = vrot.slane %v2197_v35, 1 }
0x183c   :  { %2355 = vmatpush.msrb.mxu0 %v5510_v47 }
0x183d   :  { %v2199_v15 = vadd.f32 %v2198_v28, %v2197_v35  ;;  %v5528_v28 = vld [vmem:[%s6000_s8 + $0x68] sm:$0xff] }
0x183e   :  { %2356 = vmatpush.msrb.mxu0 %v5517_v44  ;;  %2379 = vmatpush.msra.mxu1 %v5528_v28 }
0x183f   :  { %2216 = vmatmul.f32.vlgmr.msrb.gmra.mxu3 %v2199_v15  ;;  %v5533_v15 = vld [vmem:[%s6000_s8 + $0x60] sm:$0xff] }
0x1840   :  { %2437 = vmatpush.msra.mxu3 %v5528_v28  ;;  %2538 = vmatpush.msra.mxu0 %v5528_v28 }
0x1841   :  { %2380 = vmatpush.msra.mxu1 %v5533_v15 }
0x1842   :  { %2438 = vmatpush.msra.mxu3 %v5533_v15  ;;  %2539 = vmatpush.msra.mxu0 %v5533_v15 }
0x1843   :  { %2399 = vmatpush.msrb.mxu1 %v5414_v48 }
0x1844   :  { %2468 = vmatpush.msrb.mxu3 %v5290_v40 }
0x1845   :  { %2400 = vmatpush.msrb.mxu1 %v5421_v21 }
0x1846   :  { %2469 = vmatpush.msrb.mxu3 %v5295_v42 }
0x1847   :  { %2401 = vmatpush.msrb.mxu1 %v5428_v4 }
0x1848   :  { %2470 = vmatpush.msrb.mxu3 %v5301_v50 }
0x1849   :  { %2402 = vmatpush.msrb.mxu1 %v5435_v62 }
0x184a   :  { %2471 = vmatpush.msrb.mxu3 %v5307_v13 }
0x184b   :  { %2403 = vmatpush.msrb.mxu1 %v5442_v22 }
0x184c   :  { %2472 = vmatpush.msrb.mxu3 %v5313_v7 }
0x184d   :  { %2404 = vmatpush.msrb.mxu1 %v5449_v46 }
0x184e   :  { %2473 = vmatpush.msrb.mxu3 %v5319_v57 }
0x184f   :  { %2405 = vmatpush.msrb.mxu1 %v5456_v18 }
0x1850   :  { %2474 = vmatpush.msrb.mxu3 %v5325_v54 }
0x1851   :  { %2406 = vmatpush.msrb.mxu1 %v5463_v33 }
0x1852   :  { %2475 = vmatpush.msrb.mxu3 %v5335_v52 }
0x1853   :  { %2407 = vmatpush.msrb.mxu1 %v5470_v56 }
0x1854   :  { %2476 = vmatpush.msrb.mxu3 %v5345_v60 }
0x1855   :  { %2408 = vmatpush.msrb.mxu1 %v5477_v25 }
0x1856   :  { %2477 = vmatpush.msrb.mxu3 %v5353_v29 }
0x1857   :  { %2409 = vmatpush.msrb.mxu1 %v5484_v9 }
0x1858   :  { %2478 = vmatpush.msrb.mxu3 %v5360_v45 }
0x1859   :  { %2410 = vmatpush.msrb.mxu1 %v5491_v26 }
0x185a   :  { %2479 = vmatpush.msrb.mxu3 %v5366_v20 }
0x185b   :  { %2411 = vmatpush.msrb.mxu1 %v5498_v6 }
0x185c   :  { %2480 = vmatpush.msrb.mxu3 %v5372_v1 }
0x185d   :  { %2412 = vmatpush.msrb.mxu1 %v5505_v58 }
0x185e   :  { %2481 = vmatpush.msrb.mxu3 %v5377_v53 }
0x185f   :  { %2413 = vmatpush.msrb.mxu1 %v5510_v47 }
0x1860   :  { %2482 = vmatpush.msrb.mxu3 %v5383_v27 }
0x1861   :  { %2414 = vmatpush.msrb.mxu1 %v5517_v44 }
0x1862   :  { %2483 = vmatpush.msrb.mxu3 %v5389_v14 }
0x18c2   :  { %v2217_v0 = vpop.f32.mrf.mxu3 }
0x18c3   :  { %v2220_v24 = vmul.f32 %v2217_v0, %v3700_v17 }
0x18c5   :  { %3193 = vmatmul.msk.f32.vlgmr.msra.gmra.mxu2 %vm126_vm1, %v2220_v24 }
0x18c6   :  { %2500 = vmatpush.msra.mxu2 %v5414_v48 }
0x18c8   :  { %2501 = vmatpush.msra.mxu2 %v5421_v21 }
0x18ca   :  { %2502 = vmatpush.msra.mxu2 %v5428_v4 }
0x18cc   :  { %2503 = vmatpush.msra.mxu2 %v5435_v62 }
0x18cd   :  { %2325 = vmatmul.f32.vlgmr.msrb.gmra.mxu2 %v2108_v32 }
0x18ce   :  { %2504 = vmatpush.msra.mxu2 %v5442_v22 }
0x18d0   :  { %2505 = vmatpush.msra.mxu2 %v5449_v46 }
0x18d2   :  { %2506 = vmatpush.msra.mxu2 %v5456_v18 }
0x18d4   :  { %2507 = vmatpush.msra.mxu2 %v5463_v33 }
0x18d5   :  { %2328 = vmatmul.f32.gmra.mxu2 %v2109_v10 }
0x18d6   :  { %2508 = vmatpush.msra.mxu2 %v5470_v56 }
0x18d8   :  { %2509 = vmatpush.msra.mxu2 %v5477_v25 }
0x18da   :  { %2510 = vmatpush.msra.mxu2 %v5484_v9 }
0x18dc   :  { %2511 = vmatpush.msra.mxu2 %v5491_v26 }
0x18de   :  { %2512 = vmatpush.msra.mxu2 %v5498_v6 }
0x18e0   :  { %2513 = vmatpush.msra.mxu2 %v5505_v58 }
0x18e2   :  { %2514 = vmatpush.msra.mxu2 %v5510_v47 }
0x18e4   :  { %2515 = vmatpush.msra.mxu2 %v5517_v44 }
0x1948   :  { %v5519_v35 = vpop.f32.mrf.mxu2 }
0x1949   :  { %v2242_v32 = vadd.f32 1e-05, %v5519_v35 }
0x194b   :  { %3340 = vrsqrt.f32 %v2242_v32  ;;  %vm2250_vm14 = vweird.f32 %v2242_v32 }
0x1950   :  { %v2326_v3 = vpop.f32.mrf.mxu2 }
0x1951   :  { %v2327_v40 = vadd.f32 %v5548_v55, %v2326_v3  ;;  %v3341_v5 = vpop.eup %3340 }
0x1952   :  { %v2245_v41 = vmul.f32 %v3341_v5, %v2242_v32  ;;  %vm2251_vm13 = vweird.f32 %v3341_v5 }
0x1953   :  { %v2332_v12 = vmul.f32 %v2327_v40, %v3538_v31  ;;  %vm2252_vm15 = vmor %vm2250_vm14, %vm2251_vm13 }
0x1954   :  { %v2246_v10 = vmul.f32 %v3341_v5, %v2245_v41 }
0x1958   :  { %v2329_v42 = vpop.f32.mrf.mxu2 }
0x1959   :  { %v2330_v38 = vadd.f32 %v5548_v55, %v2329_v42 }
0x195b   :  { %v2333_v50 = vmul.f32 %v2330_v38, %v3552_v39 }
0x195d   :  { %v2334_v13 = vadd.f32 %v2333_v50, %v2332_v12 }
0x195f   :  { %v2335_v7 = vrot.slane %v2334_v13, 4 }
0x1961   :  { %v2336_v59 = vadd.f32 %v2335_v7, %v2334_v13 }
0x1963   :  { %v2337_v57 = vrot.slane %v2336_v59, 2 }
0x1965   :  { %v2338_v54 = vadd.f32 %v2337_v57, %v2336_v59  ;;  %v5635_v59 = vld [vmem:[%s6003_s3 + $0x370] sm:$0xff]  ;;  %v5641_v57 = vld [vmem:[%s6003_s3 + $0x368] sm:$0xff] }
0x1967   :  { %v2339_v52 = vrot.slane %v2338_v54, 1 }
0x1969   :  { %v2340_v60 = vadd.f32 %v2339_v52, %v2338_v54  ;;  %v5647_v54 = vld [vmem:[%s6003_s3 + $0x360] sm:$0xff]  ;;  %v5653_v52 = vld [vmem:[%s6003_s3 + $0x358] sm:$0xff] }
0x196b   :  { %2357 = vmatmul.f32.vlgmr.msrb.gmra.mxu0 %v2340_v60  ;;  %v5659_v60 = vld [vmem:[%s6003_s3 + $0x350] sm:$0xff] }
0x196c   :  { %2558 = vmatpush.msrb.mxu0 %v5414_v48  ;;  %v2247_v48 = vmul.f32 0.5, %v2246_v10 }
0x196e   :  { %2559 = vmatpush.msrb.mxu0 %v5421_v21  ;;  %v2248_v21 = vsub.f32 1.5, %v2247_v48 }
0x1970   :  { %2560 = vmatpush.msrb.mxu0 %v5428_v4  ;;  %v2249_v4 = vmul.f32 %v3341_v5, %v2248_v21 }
0x1972   :  { %2561 = vmatpush.msrb.mxu0 %v5435_v62  ;;  %v2253_v62 = vsel %vm2252_vm15, %v3341_v5, %v2249_v4  ;;  %v5700_v4 = vld [vmem:[%s6003_s3 + $0x328] sm:$0xff] }
0x1974   :  { %2562 = vmatpush.msrb.mxu0 %v5442_v22  ;;  %v2254_v22 = vperm.slane %v2253_v62, 0  ;;  %v5706_v62 = vld [vmem:[%s6003_s3 + $0x320] sm:$0xff] }
0x1976   :  { %2563 = vmatpush.msrb.mxu0 %v5449_v46  ;;  %v2255_v46 = vmul.f32 %v2254_v22, %v5328_v43 }
0x1978   :  { %2564 = vmatpush.msrb.mxu0 %v5456_v18 }
0x197a   :  { %2565 = vmatpush.msrb.mxu0 %v5463_v33 }
0x197c   :  { %2566 = vmatpush.msrb.mxu0 %v5470_v56  ;;  %v2257_v56 = vmul.f32 %v5397_v63, %v2255_v46  ;;  %v5712_v46 = vld [vmem:[%s6003_s3 + $0x318] sm:$0xff] }
0x197e   :  { %2567 = vmatpush.msrb.mxu0 %v5477_v25  ;;  %v2259_v25 = vadd.f32 %v5404_v11, %v2257_v56 }
0x1980   :  { %2568 = vmatpush.msrb.mxu0 %v5484_v9  ;;  %v2256_v9 = vmul.f32 %v2254_v22, %v5330_v49 }
0x1982   :  { %2569 = vmatpush.msrb.mxu0 %v5491_v26  ;;  %v2261_v26 = vmax.f32 %v2259_v25, 0.0  ;;  %v5729_v25 = vld [vmem:[%s6003_s3 + $0x300] sm:$0xff] }
0x1984   :  { %2570 = vmatpush.msrb.mxu0 %v5498_v6  ;;  %v2258_v6 = vmul.f32 %v5397_v63, %v2256_v9 }
0x1986   :  { %2571 = vmatpush.msrb.mxu0 %v5505_v58  ;;  %v2260_v58 = vadd.f32 %v5404_v11, %v2258_v6 }
0x1988   :  { %2572 = vmatpush.msrb.mxu0 %v5510_v47  ;;  %v2262_v47 = vmax.f32 %v2260_v58, 0.0 }
0x198a   :  { %2573 = vmatpush.msrb.mxu0 %v5517_v44 }
0x19e8   :  { %v2358_v29 = vpop.f32.mrf.mxu0 }
0x19e9   :  { %v2361_v45 = vmul.f32 %v2358_v29, %v3600_v2 }
0x19eb   :  { %3231 = vmatmul.msk.f32.vlgmr.msra.gmra.mxu1 %vm126_vm1, %v2361_v45 }
0x19ec   :  { %2596 = vmatpush.msra.mxu1 %v5528_v28 }
0x19ee   :  { %2597 = vmatpush.msra.mxu1 %v5533_v15 }
0x1a68   :  { %v2382_v20 = vpop.f32.mrf.mxu1 }
0x1a69   :  { %v2385_v1 = vperm.slane %v2382_v20, 0  ;;  %v5665_v20 = vld [vmem:[%s6003_s3 + $0x348] sm:$0xff] }
0x1a6b   :  { %v5602_v53 = vsub.f32 %v2332_v12, %v2385_v1  ;;  %v5604_v27 = vsub.f32 %v2333_v50, %v2385_v1 }
0x1a6d   :  { %v2388_v14 = vmul.f32 %v5602_v53, %v5602_v53  ;;  %v2389_v16 = vmul.f32 %v5604_v27, %v5604_v27 }
0x1a6f   :  { %v2390_v19 = vmul.f32 %v2388_v14, %v3538_v31  ;;  %v2391_v37 = vmul.f32 %v2389_v16, %v3552_v39  ;;  %v5675_v16 = vld [vmem:[%s6003_s3 + $0x340] sm:$0xff] }
0x1a71   :  { %v2392_v36 = vadd.f32 %v2391_v37, %v2390_v19 }
0x1a73   :  { %v2393_v30 = vrot.slane %v2392_v36, 4 }
0x1a75   :  { %v2394_v0 = vadd.f32 %v2393_v30, %v2392_v36  ;;  %v5685_v36 = vld [vmem:[%s6003_s3 + $0x338] sm:$0xff] }
0x1a77   :  { %v2395_v24 = vrot.slane %v2394_v0, 2 }
0x1a79   :  { %v2396_v51 = vadd.f32 %v2395_v24, %v2394_v0  ;;  %v5693_v24 = vld [vmem:[%s6003_s3 + $0x330] sm:$0xff] }
0x1a7b   :  { %v2397_v61 = vrot.slane %v2396_v51, 1 }
0x1a7d   :  { %v2398_v8 = vadd.f32 %v2397_v61, %v2396_v51 }
0x1a7f   :  { %2415 = vmatmul.f32.vlgmr.msrb.gmra.mxu1 %v2398_v8 }
0x1afc   :  { %v2416_v18 = vpop.f32.mrf.mxu1 }
0x1afd   :  { %v2419_v33 = vmul.f32 %v2416_v18, %v3600_v2  ;;  %v5717_v18 = vld [vmem:[%s6003_s3 + $0x310] sm:$0xff] }
0x1aff   :  { %3232 = vmatmul.msk.f32.vlgmr.msra.gmra.mxu3 %vm126_vm1, %v2419_v33  ;;  %v5723_v33 = vld [vmem:[%s6003_s3 + $0x308] sm:$0xff] }
0x1b07   :  { %2484 = vmatmul.f32.vlgmr.msrb.gmra.mxu3 %v2261_v26 }
0x1b0f   :  { %2487 = vmatmul.f32.gmra.mxu3 %v2262_v47 }
0x1b82   :  { %v2440_v43 = vpop.f32.mrf.mxu3 }
0x1b83   :  { %v2441_v48 = vadd.f32 1e-05, %v2440_v43 }
0x1b85   :  { %3342 = vrsqrt.f32 %v2441_v48  ;;  %vm2449_vm2 = vweird.f32 %v2441_v48 }
0x1b8a   :  { %v2485_v44 = vpop.f32.mrf.mxu3 }
0x1b8b   :  { %v2486_v35 = vadd.f32 %v5548_v55, %v2485_v44  ;;  %v3343_v21 = vpop.eup %3342  ;;  %v5737_v44 = vld [vmem:[%s6001_s5 + $0x6] ss:$0 sm:$0xff] }
0x1b8c   :  { %v2444_v22 = vmul.f32 %v3343_v21, %v2441_v48  ;;  %vm2450_vm0 = vweird.f32 %v3343_v21 }
0x1b8d   :  { %v2491_v3 = vmul.f32 %v2486_v35, %v3638_v34  ;;  %vm2451_vm3 = vmor %vm2449_vm2, %vm2450_vm0 }
0x1b8e   :  { %v2445_v56 = vmul.f32 %v3343_v21, %v2444_v22 }
0x1b90   :  { %v2446_v9 = vmul.f32 0.5, %v2445_v56 }
0x1b92   :  { %v2488_v28 = vpop.f32.mrf.mxu3  ;;  %v2447_v26 = vsub.f32 1.5, %v2446_v9 }
0x1b93   :  { %v2489_v15 = vadd.f32 %v5548_v55, %v2488_v28  ;;  %v5630_v55 = vld [vmem:[%s6003_s3 + $0x378] sm:$0xff] }
0x1b94   :  { %2667 = vmatpush.msrb.mxu1 %v5630_v55  ;;  %v2448_v6 = vmul.f32 %v3343_v21, %v2447_v26 }
0x1b95   :  { %v2492_v40 = vmul.f32 %v2489_v15, %v3634_v23 }
0x1b96   :  { %2668 = vmatpush.msrb.mxu1 %v5635_v59  ;;  %v2452_v58 = vsel %vm2451_vm3, %v3343_v21, %v2448_v6  ;;  %v5888_v21 = vld [vmem:[%s5998_s4 + $0x7] ss:$0 sm:$0xff] }
0x1b97   :  { %v2493_v49 = vadd.f32 %v2492_v40, %v2491_v3  ;;  %v2453_v47 = vperm.slane %v2452_v58, 0 }
0x1b98   :  { %2669 = vmatpush.msrb.mxu1 %v5641_v57 }
0x1b99   :  { %v2494_v42 = vrot.slane %v2493_v49, 4  ;;  %v2454_v43 = vmul.f32 %v2453_v47, %v5602_v53  ;;  %v2455_v53 = vmul.f32 %v2453_v47, %v5604_v27  ;;  %v5761_v27 = vld [vmem:[%s5999_s7 + $0x3f0] sm:$0xff] }
0x1b9a   :  { %2670 = vmatpush.msrb.mxu1 %v5647_v54 }
0x1b9b   :  { %v2495_v38 = vadd.f32 %v2494_v42, %v2493_v49  ;;  %v2459_v15 = vmul.f32 %v5737_v44, %v2454_v43  ;;  %v2460_v42 = vmul.f32 %v5737_v44, %v2455_v53 }
0x1b9c   :  { %2671 = vmatpush.msrb.mxu1 %v5653_v52 }
0x1b9d   :  { %v2496_v63 = vrot.slane %v2495_v38, 2 }
0x1b9e   :  { %2672 = vmatpush.msrb.mxu1 %v5659_v60 }
0x1b9f   :  { %v2497_v12 = vadd.f32 %v2496_v63, %v2495_v38 }
0x1ba0   :  { %2673 = vmatpush.msrb.mxu1 %v5665_v20 }
0x1ba1   :  { %v2498_v50 = vrot.slane %v2497_v12, 1 }
0x1ba2   :  { %2674 = vmatpush.msrb.mxu1 %v5675_v16 }
0x1ba3   :  { %v2499_v11 = vadd.f32 %v2498_v50, %v2497_v12  ;;  %v5754_v12 = vld [vmem:[%s5999_s7 + $0x3f8] sm:$0xff]  ;;  %v5768_v50 = vld [vmem:[%s5999_s7 + $0x3e8] sm:$0xff] }
0x1ba4   :  { %2675 = vmatpush.msrb.mxu1 %v5685_v36  ;;  %2699 = vmatpush.msra.mxu3 %v5754_v12 }
0x1ba5   :  { %2516 = vmatmul.f32.vlgmr.msra.gmra.mxu2 %v2499_v11  ;;  %v5775_v11 = vld [vmem:[%s5999_s7 + $0x3e0] sm:$0xff] }
0x1ba6   :  { %2676 = vmatpush.msrb.mxu1 %v5693_v24  ;;  %2700 = vmatpush.msra.mxu3 %v5761_v27 }
0x1ba8   :  { %2677 = vmatpush.msrb.mxu1 %v5700_v4  ;;  %2701 = vmatpush.msra.mxu3 %v5768_v50 }
0x1baa   :  { %2678 = vmatpush.msrb.mxu1 %v5706_v62  ;;  %2702 = vmatpush.msra.mxu3 %v5775_v11 }
0x1bac   :  { %2679 = vmatpush.msrb.mxu1 %v5712_v46 }
0x1bae   :  { %2680 = vmatpush.msrb.mxu1 %v5717_v18 }
0x1bb0   :  { %2681 = vmatpush.msrb.mxu1 %v5723_v33 }
0x1bb2   :  { %2682 = vmatpush.msrb.mxu1 %v5729_v25 }
0x1c28   :  { %v2517_v13 = vpop.f32.mrf.mxu2 }
0x1c29   :  { %v2520_v7 = vmul.f32 %v2517_v13, %v3700_v17  ;;  %v5782_v13 = vld [vmem:[%s5999_s7 + $0x3d8] sm:$0xff] }
0x1c2a   :  { %2703 = vmatpush.msra.mxu3 %v5782_v13 }
0x1c2b   :  { %3233 = vmatmul.msk.f32.vlgmr.msra.gmra.mxu0 %vm126_vm1, %v2520_v7  ;;  %v5789_v7 = vld [vmem:[%s5999_s7 + $0x3d0] sm:$0xff] }
0x1c2c   :  { %2704 = vmatpush.msra.mxu3 %v5789_v7 }
0x1ca8   :  { %v2541_v29 = vpop.f32.mrf.mxu0 }
0x1ca9   :  { %v2544_v45 = vperm.slane %v2541_v29, 0  ;;  %v5796_v29 = vld [vmem:[%s5999_s7 + $0x3c8] sm:$0xff] }
0x1caa   :  { %2705 = vmatpush.msra.mxu3 %v5796_v29 }
0x1cab   :  { %v5668_v1 = vsub.f32 %v2491_v3, %v2544_v45  ;;  %v5670_v14 = vsub.f32 %v2492_v40, %v2544_v45  ;;  %v5744_v3 = vld [vmem:[%s6002_s6 + $0x6] ss:$0 sm:$0xff] }
0x1cac   :  { %v2464_v40 = vadd.f32 %v5744_v3, %v2459_v15  ;;  %v2465_v38 = vadd.f32 %v5744_v3, %v2460_v42  ;;  %v5803_v45 = vld [vmem:[%s5999_s7 + $0x3c0] sm:$0xff] }
0x1cad   :  { %v2547_v19 = vmul.f32 %v5668_v1, %v5668_v1  ;;  %v2548_v37 = vmul.f32 %v5670_v14, %v5670_v14  ;;  %2706 = vmatpush.msra.mxu3 %v5803_v45 }
0x1cae   :  { %v2466_v49 = vmax.f32 %v2464_v40, 0.0  ;;  %v2467_v63 = vmax.f32 %v2465_v38, 0.0 }
0x1caf   :  { %v2549_v30 = vmul.f32 %v2547_v19, %v3638_v34  ;;  %v2550_v0 = vmul.f32 %v2548_v37, %v3634_v23  ;;  %v5810_v19 = vld [vmem:[%s5999_s7 + $0x3b8] sm:$0xff]  ;;  %v5817_v37 = vld [vmem:[%s5999_s7 + $0x3b0] sm:$0xff] }
0x1cb0   :  { %2707 = vmatpush.msra.mxu3 %v5810_v19 }
0x1cb1   :  { %v2551_v51 = vadd.f32 %v2550_v0, %v2549_v30  ;;  %v5824_v30 = vld [vmem:[%s5999_s7 + $0x3a8] sm:$0xff]  ;;  %v5831_v0 = vld [vmem:[%s5999_s7 + $0x3a0] sm:$0xff] }
0x1cb2   :  { %2708 = vmatpush.msra.mxu3 %v5817_v37 }
0x1cb3   :  { %v2552_v61 = vrot.slane %v2551_v51, 4 }
0x1cb4   :  { %2709 = vmatpush.msra.mxu3 %v5824_v30 }
0x1cb5   :  { %v2553_v8 = vadd.f32 %v2552_v61, %v2551_v51  ;;  %v5838_v51 = vld [vmem:[%s5999_s7 + $0x398] sm:$0xff]  ;;  %v5845_v61 = vld [vmem:[%s5999_s7 + $0x390] sm:$0xff] }
0x1cb6   :  { %2710 = vmatpush.msra.mxu3 %v5831_v0 }
0x1cb7   :  { %v2554_v32 = vrot.slane %v2553_v8, 2 }
0x1cb8   :  { %2711 = vmatpush.msra.mxu3 %v5838_v51 }
0x1cb9   :  { %v2555_v5 = vadd.f32 %v2554_v32, %v2553_v8  ;;  %v5850_v8 = vld [vmem:[%s5999_s7 + $0x388] sm:$0xff]  ;;  %v5857_v32 = vld [vmem:[%s5999_s7 + $0x380] sm:$0xff] }
0x1cba   :  { %2712 = vmatpush.msra.mxu3 %v5845_v61 }
0x1cbb   :  { %v2556_v41 = vrot.slane %v2555_v5, 1 }
0x1cbc   :  { %2713 = vmatpush.msra.mxu3 %v5850_v8 }
0x1cbd   :  { %v2557_v10 = vadd.f32 %v2556_v41, %v2555_v5  ;;  %v5868_v41 = vld [vmem:[%s6000_s8 + $0x78] sm:$0xff] }
0x1cbe   :  { %2714 = vmatpush.msra.mxu3 %v5857_v32  ;;  %2737 = vmatpush.msrb.mxu2 %v5868_v41 }
0x1cbf   :  { %2574 = vmatmul.f32.vlgmr.msrb.gmra.mxu0 %v2557_v10  ;;  %v5873_v10 = vld [vmem:[%s6000_s8 + $0x70] sm:$0xff] }
0x1cc0   :  { %2795 = vmatpush.msra.mxu0 %v5868_v41  ;;  %2896 = vmatpush.msrb.mxu3 %v5868_v41 }
0x1cc1   :  { %2738 = vmatpush.msrb.mxu2 %v5873_v10 }
0x1cc2   :  { %2796 = vmatpush.msra.mxu0 %v5873_v10  ;;  %2897 = vmatpush.msrb.mxu3 %v5873_v10 }
0x1cc3   :  { %2757 = vmatpush.msra.mxu2 %v5754_v12 }
0x1cc4   :  { %2826 = vmatpush.msrb.mxu0 %v5630_v55 }
0x1cc5   :  { %2758 = vmatpush.msra.mxu2 %v5761_v27 }
0x1cc6   :  { %2827 = vmatpush.msrb.mxu0 %v5635_v59 }
0x1cc7   :  { %2759 = vmatpush.msra.mxu2 %v5768_v50 }
0x1cc8   :  { %2828 = vmatpush.msrb.mxu0 %v5641_v57 }
0x1cc9   :  { %2760 = vmatpush.msra.mxu2 %v5775_v11 }
0x1cca   :  { %2829 = vmatpush.msrb.mxu0 %v5647_v54 }
0x1ccb   :  { %2761 = vmatpush.msra.mxu2 %v5782_v13 }
0x1ccc   :  { %2830 = vmatpush.msrb.mxu0 %v5653_v52 }
0x1ccd   :  { %2762 = vmatpush.msra.mxu2 %v5789_v7 }
0x1cce   :  { %2831 = vmatpush.msrb.mxu0 %v5659_v60 }
0x1ccf   :  { %2763 = vmatpush.msra.mxu2 %v5796_v29 }
0x1cd0   :  { %2832 = vmatpush.msrb.mxu0 %v5665_v20 }
0x1cd1   :  { %2764 = vmatpush.msra.mxu2 %v5803_v45 }
0x1cd2   :  { %2833 = vmatpush.msrb.mxu0 %v5675_v16 }
0x1cd3   :  { %2765 = vmatpush.msra.mxu2 %v5810_v19 }
0x1cd4   :  { %2834 = vmatpush.msrb.mxu0 %v5685_v36 }
0x1cd5   :  { %2766 = vmatpush.msra.mxu2 %v5817_v37 }
0x1cd6   :  { %2835 = vmatpush.msrb.mxu0 %v5693_v24 }
0x1cd7   :  { %2767 = vmatpush.msra.mxu2 %v5824_v30 }
0x1cd8   :  { %2836 = vmatpush.msrb.mxu0 %v5700_v4 }
0x1cd9   :  { %2768 = vmatpush.msra.mxu2 %v5831_v0 }
0x1cda   :  { %2837 = vmatpush.msrb.mxu0 %v5706_v62 }
0x1cdb   :  { %2769 = vmatpush.msra.mxu2 %v5838_v51 }
0x1cdc   :  { %2838 = vmatpush.msrb.mxu0 %v5712_v46 }
0x1cdd   :  { %2770 = vmatpush.msra.mxu2 %v5845_v61 }
0x1cde   :  { %2839 = vmatpush.msrb.mxu0 %v5717_v18 }
0x1cdf   :  { %2771 = vmatpush.msra.mxu2 %v5850_v8 }
0x1ce0   :  { %2840 = vmatpush.msrb.mxu0 %v5723_v33 }
0x1ce1   :  { %2772 = vmatpush.msra.mxu2 %v5857_v32 }
0x1ce2   :  { %2841 = vmatpush.msrb.mxu0 %v5729_v25 }
0x1d3c   :  { %v2575_v35 = vpop.f32.mrf.mxu0 }
0x1d3d   :  { %v2578_v28 = vmul.f32 %v2575_v35, %v3700_v17 }
0x1d3f   :  { %3234 = vmatmul.msk.f32.vlgmr.msra.gmra.mxu1 %vm126_vm1, %v2578_v28 }
0x1d40   :  { %2858 = vmatpush.msra.mxu1 %v5754_v12 }
0x1d42   :  { %2859 = vmatpush.msra.mxu1 %v5761_v27 }
0x1d44   :  { %2860 = vmatpush.msra.mxu1 %v5768_v50 }
0x1d46   :  { %2861 = vmatpush.msra.mxu1 %v5775_v11 }
0x1d47   :  { %2683 = vmatmul.f32.vlgmr.msrb.gmra.mxu1 %v2466_v49 }
0x1d48   :  { %2862 = vmatpush.msra.mxu1 %v5782_v13 }
0x1d4a   :  { %2863 = vmatpush.msra.mxu1 %v5789_v7 }
0x1d4c   :  { %2864 = vmatpush.msra.mxu1 %v5796_v29 }
0x1d4e   :  { %2865 = vmatpush.msra.mxu1 %v5803_v45 }
0x1d4f   :  { %2686 = vmatmul.f32.gmra.mxu1 %v2467_v63 }
0x1d50   :  { %2866 = vmatpush.msra.mxu1 %v5810_v19 }
0x1d52   :  { %2867 = vmatpush.msra.mxu1 %v5817_v37 }
0x1d54   :  { %2868 = vmatpush.msra.mxu1 %v5824_v30 }
0x1d56   :  { %2869 = vmatpush.msra.mxu1 %v5831_v0 }
0x1d58   :  { %2870 = vmatpush.msra.mxu1 %v5838_v51 }
0x1d5a   :  { %2871 = vmatpush.msra.mxu1 %v5845_v61 }
0x1d5c   :  { %2872 = vmatpush.msra.mxu1 %v5850_v8 }
0x1d5e   :  { %2873 = vmatpush.msra.mxu1 %v5857_v32 }
0x1dbc   :  { %v5859_v5 = vpop.f32.mrf.mxu1 }
0x1dbd   :  { %v2600_v49 = vadd.f32 1e-05, %v5859_v5 }
0x1dbf   :  { %3344 = vrsqrt.f32 %v2600_v49  ;;  %vm2608_vm5 = vweird.f32 %v2600_v49 }
0x1dc4   :  { %v2684_v48 = vpop.f32.mrf.mxu1 }
0x1dc5   :  { %v2685_v55 = vadd.f32 %v5888_v21, %v2684_v48  ;;  %v3345_v42 = vpop.eup %3344 }
0x1dc6   :  { %v2603_v38 = vmul.f32 %v3345_v42, %v2600_v49  ;;  %vm2609_vm4 = vweird.f32 %v3345_v42 }
0x1dc7   :  { %v2690_v56 = vmul.f32 %v2685_v55, %v3538_v31  ;;  %vm2610_vm6 = vmor %vm2608_vm5, %vm2609_vm4 }
0x1dc8   :  { %v2604_v63 = vmul.f32 %v3345_v42, %v2603_v38 }
0x1dcc   :  { %v2687_v59 = vpop.f32.mrf.mxu1 }
0x1dcd   :  { %v2688_v22 = vadd.f32 %v5888_v21, %v2687_v59 }
0x1dcf   :  { %v2691_v57 = vmul.f32 %v2688_v22, %v3552_v39 }
0x1dd1   :  { %v2692_v54 = vadd.f32 %v2691_v57, %v2690_v56 }
0x1dd3   :  { %v2693_v52 = vrot.slane %v2692_v54, 4 }
0x1dd5   :  { %v2694_v9 = vadd.f32 %v2693_v52, %v2692_v54  ;;  %v5960_v52 = vld [vmem:[%s6001_s5 + $0x7] ss:$0 sm:$0xff] }
0x1dd7   :  { %v2695_v60 = vrot.slane %v2694_v9, 2 }
0x1dd9   :  { %v2696_v20 = vadd.f32 %v2695_v60, %v2694_v9 }
0x1ddb   :  { %v2697_v16 = vrot.slane %v2696_v20, 1 }
0x1ddd   :  { %v2698_v36 = vadd.f32 %v2697_v16, %v2696_v20 }
0x1ddf   :  { %2715 = vmatmul.f32.vlgmr.msra.gmra.mxu3 %v2698_v36 }
0x1de0   :  { %2916 = vmatpush.msra.mxu3 %v5754_v12  ;;  %v2605_v12 = vmul.f32 0.5, %v2604_v63 }
0x1de2   :  { %2917 = vmatpush.msra.mxu3 %v5761_v27  ;;  %v2606_v27 = vsub.f32 1.5, %v2605_v12 }
0x1de4   :  { %2918 = vmatpush.msra.mxu3 %v5768_v50  ;;  %v2607_v50 = vmul.f32 %v3345_v42, %v2606_v27 }
0x1de6   :  { %2919 = vmatpush.msra.mxu3 %v5775_v11  ;;  %v2611_v11 = vsel %vm2610_vm6, %v3345_v42, %v2607_v50 }
0x1de8   :  { %2920 = vmatpush.msra.mxu3 %v5782_v13  ;;  %v2612_v13 = vperm.slane %v2611_v11, 0 }
0x1dea   :  { %2921 = vmatpush.msra.mxu3 %v5789_v7  ;;  %v2613_v7 = vmul.f32 %v2612_v13, %v5668_v1 }
0x1dec   :  { %2922 = vmatpush.msra.mxu3 %v5796_v29 }
0x1dee   :  { %2923 = vmatpush.msra.mxu3 %v5803_v45  ;;  %v2615_v45 = vmul.f32 %v5737_v44, %v2613_v7 }
0x1df0   :  { %2924 = vmatpush.msra.mxu3 %v5810_v19 }
0x1df2   :  { %2925 = vmatpush.msra.mxu3 %v5817_v37  ;;  %v2617_v37 = vadd.f32 %v5744_v3, %v2615_v45 }
0x1df4   :  { %2926 = vmatpush.msra.mxu3 %v5824_v30  ;;  %v2614_v30 = vmul.f32 %v2612_v13, %v5670_v14 }
0x1df6   :  { %2927 = vmatpush.msra.mxu3 %v5831_v0  ;;  %v2619_v0 = vmax.f32 %v2617_v37, 0.0 }
0x1df8   :  { %2928 = vmatpush.msra.mxu3 %v5838_v51  ;;  %v2616_v51 = vmul.f32 %v5737_v44, %v2614_v30 }
0x1dfa   :  { %2929 = vmatpush.msra.mxu3 %v5845_v61  ;;  %v2618_v61 = vadd.f32 %v5744_v3, %v2616_v51 }
0x1dfc   :  { %2930 = vmatpush.msra.mxu3 %v5850_v8  ;;  %v2620_v8 = vmax.f32 %v2618_v61, 0.0 }
0x1dfe   :  { %2931 = vmatpush.msra.mxu3 %v5857_v32 }
0x1e62   :  { %v2716_v24 = vpop.f32.mrf.mxu3 }
0x1e63   :  { %v2719_v4 = vmul.f32 %v2716_v24, %v3600_v2 }
0x1e65   :  { %3272 = vmatmul.msk.f32.vlgmr.msrb.gmra.mxu2 %vm126_vm1, %v2719_v4 }
0x1e66   :  { %2954 = vmatpush.msrb.mxu2 %v5868_v41 }
0x1e68   :  { %2955 = vmatpush.msrb.mxu2 %v5873_v10 }
0x1ee8   :  { %v2740_v62 = vpop.f32.mrf.mxu2 }
0x1ee9   :  { %v2743_v46 = vperm.slane %v2740_v62, 0 }
0x1eeb   :  { %v2744_v18 = vsub.f32 %v2690_v56, %v2743_v46  ;;  %v2745_v33 = vsub.f32 %v2691_v57, %v2743_v46 }
0x1eed   :  { %v2746_v25 = vmul.f32 %v2744_v18, %v2744_v18  ;;  %v2747_v26 = vmul.f32 %v2745_v33, %v2745_v33 }
0x1eef   :  { %v2748_v6 = vmul.f32 %v2746_v25, %v3538_v31  ;;  %v2749_v58 = vmul.f32 %v2747_v26, %v3552_v39 }
0x1ef1   :  { %v2750_v47 = vadd.f32 %v2749_v58, %v2748_v6 }
0x1ef3   :  { %v2751_v43 = vrot.slane %v2750_v47, 4 }
0x1ef5   :  { %v2752_v35 = vadd.f32 %v2751_v43, %v2750_v47 }
0x1ef7   :  { %v2753_v28 = vrot.slane %v2752_v35, 2 }
0x1ef9   :  { %v2754_v15 = vadd.f32 %v2753_v28, %v2752_v35 }
0x1efb   :  { %v2755_v40 = vrot.slane %v2754_v15, 1 }
0x1efd   :  { %v2756_v53 = vadd.f32 %v2755_v40, %v2754_v15 }
0x1eff   :  { %2773 = vmatmul.f32.vlgmr.msra.gmra.mxu2 %v2756_v53 }
0x1f82   :  { %v2774_v29 = vpop.f32.mrf.mxu2 }
0x1f83   :  { %v2777_v19 = vmul.f32 %v2774_v29, %v3600_v2 }
0x1f85   :  { %3273 = vmatmul.msk.f32.vlgmr.msra.gmra.mxu0 %vm126_vm1, %v2777_v19 }
0x1f8d   :  { %2842 = vmatmul.f32.vlgmr.msrb.gmra.mxu0 %v2619_v0 }
0x1f95   :  { %2845 = vmatmul.f32.gmra.mxu0 %v2620_v8 }
0x2002   :  { %v2798_v1 = vpop.f32.mrf.mxu0 }
0x2003   :  { %v2799_v32 = vadd.f32 1e-05, %v2798_v1 }
0x2005   :  { %3346 = vrsqrt.f32 %v2799_v32  ;;  %vm2807_vm8 = vweird.f32 %v2799_v32 }
0x200a   :  { %v2843_v5 = vpop.f32.mrf.mxu0 }
0x200b   :  { %v3347_v41 = vpop.eup %3346  ;;  %v2844_v55 = vadd.f32 %v5888_v21, %v2843_v5 }
0x200c   :  { %v2802_v2 = vmul.f32 %v3347_v41, %v2799_v32  ;;  %vm2808_vm7 = vweird.f32 %v3347_v41 }
0x200d   :  { %vm2809_vm9 = vmor %vm2807_vm8, %vm2808_vm7  ;;  %v2849_v3 = vmul.f32 %v2844_v55, %v3638_v34 }
0x200e   :  { %v2803_v10 = vmul.f32 %v3347_v41, %v2802_v2 }
0x2010   :  { %v2804_v48 = vmul.f32 0.5, %v2803_v10 }
0x2012   :  { %v2805_v59 = vsub.f32 1.5, %v2804_v48  ;;  %v2846_v14 = vpop.f32.mrf.mxu0 }
0x2013   :  { %v2847_v44 = vadd.f32 %v5888_v21, %v2846_v14  ;;  %v3313_v21 = vld [vmem:[%s6002_s6 + $0x7] ss:$0 sm:$0xff] }
0x2014   :  { %v2806_v22 = vmul.f32 %v3347_v41, %v2805_v59 }
0x2015   :  { %v2850_v56 = vmul.f32 %v2847_v44, %v3634_v23 }
0x2016   :  { %v2810_v57 = vsel %vm2809_vm9, %v3347_v41, %v2806_v22 }
0x2017   :  { %v2811_v54 = vperm.slane %v2810_v57, 0  ;;  %v2851_v9 = vadd.f32 %v2850_v56, %v2849_v3 }
0x2019   :  { %v2812_v60 = vmul.f32 %v2811_v54, %v2744_v18  ;;  %v2813_v20 = vmul.f32 %v2811_v54, %v2745_v33  ;;  %v2852_v16 = vrot.slane %v2851_v9, 4 }
0x201b   :  { %v2817_v36 = vmul.f32 %v5960_v52, %v2812_v60  ;;  %v2818_v24 = vmul.f32 %v5960_v52, %v2813_v20  ;;  %v2853_v4 = vadd.f32 %v2852_v16, %v2851_v9 }
0x201d   :  { %v2822_v62 = vadd.f32 %v3313_v21, %v2817_v36  ;;  %v2823_v46 = vadd.f32 %v3313_v21, %v2818_v24  ;;  %v2854_v25 = vrot.slane %v2853_v4, 2 }
0x201f   :  { %v2824_v26 = vmax.f32 %v2822_v62, 0.0  ;;  %v2825_v6 = vmax.f32 %v2823_v46, 0.0  ;;  %v2855_v58 = vadd.f32 %v2854_v25, %v2853_v4 }
0x2021   :  { %v2979_v18 = vmul.f32 %v2824_v26, %v3538_v31  ;;  %v2980_v33 = vmul.f32 %v2825_v6, %v3552_v39  ;;  %v2856_v47 = vrot.slane %v2855_v58, 1 }
0x2023   :  { %2982 = vst.msk [vmem:[%s6004_s9] sm:$0xff] %vm2981_vm10, %v2979_v18  ;;  %v2857_v43 = vadd.f32 %v2856_v47, %v2855_v58 }
0x2024   :  { %2983 = vst.msk [vmem:[%s6004_s9 + $0x8] sm:$0xff] %vm2981_vm10, %v2980_v33 }
0x2025   :  { %2874 = vmatmul.f32.vlgmr.msra.gmra.mxu1 %v2857_v43 }
0x20a2   :  { %v2875_v35 = vpop.f32.mrf.mxu1 }
0x20a3   :  { %v2878_v28 = vmul.f32 %v2875_v35, %v3700_v17 }
0x20a5   :  { %3274 = vmatmul.msk.f32.vlgmr.msrb.gmra.mxu3 %vm126_vm1, %v2878_v28 }
0x2128   :  { %v2899_v31 = vpop.f32.mrf.mxu3 }
0x2129   :  { %v2902_v39 = vperm.slane %v2899_v31, 0 }
0x212b   :  { %v2903_v15 = vsub.f32 %v2849_v3, %v2902_v39  ;;  %v2904_v40 = vsub.f32 %v2850_v56, %v2902_v39 }
0x212d   :  { %v2905_v53 = vmul.f32 %v2903_v15, %v2903_v15  ;;  %v2906_v49 = vmul.f32 %v2904_v40, %v2904_v40 }
0x212f   :  { %v2907_v42 = vmul.f32 %v2905_v53, %v3638_v34  ;;  %v2908_v38 = vmul.f32 %v2906_v49, %v3634_v23 }
0x2131   :  { %v2909_v63 = vadd.f32 %v2908_v38, %v2907_v42 }
0x2133   :  { %v2910_v12 = vrot.slane %v2909_v63, 4 }
0x2135   :  { %v2911_v27 = vadd.f32 %v2910_v12, %v2909_v63 }
0x2137   :  { %v2912_v50 = vrot.slane %v2911_v27, 2 }
0x2139   :  { %v2913_v11 = vadd.f32 %v2912_v50, %v2911_v27 }
0x213b   :  { %v2914_v13 = vrot.slane %v2913_v11, 1 }
0x213d   :  { %v2915_v7 = vadd.f32 %v2914_v13, %v2913_v11 }
0x213f   :  { %2932 = vmatmul.f32.vlgmr.msra.gmra.mxu3 %v2915_v7 }
0x21c2   :  { %v2933_v29 = vpop.f32.mrf.mxu3 }
0x21c3   :  { %v2936_v45 = vmul.f32 %v2933_v29, %v3700_v17 }
0x21c5   :  { %3275 = vmatmul.msk.f32.vlgmr.msrb.gmra.mxu2 %vm126_vm1, %v2936_v45 }
0x2248   :  { %v2957_v19 = vpop.f32.mrf.mxu2 }
0x2249   :  { %v2958_v37 = vadd.f32 1e-05, %v2957_v19 }
0x224b   :  { %3348 = vrsqrt.f32 %v2958_v37  ;;  %vm2966_vm12 = vweird.f32 %v2958_v37 }
0x2251   :  { %v3349_v30 = vpop.eup %3348 }
0x2252   :  { %v2961_v0 = vmul.f32 %v3349_v30, %v2958_v37  ;;  %vm2967_vm11 = vweird.f32 %v3349_v30 }
0x2253   :  { %vm2968_vm13 = vmor %vm2966_vm12, %vm2967_vm11 }
0x2254   :  { %v2962_v51 = vmul.f32 %v3349_v30, %v2961_v0 }
0x2256   :  { %v2963_v61 = vmul.f32 0.5, %v2962_v51 }
0x2258   :  { %v2964_v8 = vsub.f32 1.5, %v2963_v61 }
0x225a   :  { %v2965_v1 = vmul.f32 %v3349_v30, %v2964_v8 }
0x225c   :  { %v2969_v32 = vsel %vm2968_vm13, %v3349_v30, %v2965_v1 }
0x225d   :  { %v2970_v5 = vperm.slane %v2969_v32, 0 }
0x225f   :  { %v2971_v41 = vmul.f32 %v2970_v5, %v2903_v15  ;;  %v2972_v2 = vmul.f32 %v2970_v5, %v2904_v40 }
0x2261   :  { %v2973_v17 = vmul.f32 %v5960_v52, %v2971_v41  ;;  %v2974_v10 = vmul.f32 %v5960_v52, %v2972_v2 }
0x2263   :  { %v2975_v48 = vadd.f32 %v3313_v21, %v2973_v17  ;;  %v2976_v55 = vadd.f32 %v3313_v21, %v2974_v10 }
0x2265   :  { %v2977_v59 = vmax.f32 %v2975_v48, 0.0  ;;  %v2978_v14 = vmax.f32 %v2976_v55, 0.0 }
0x2267   :  { %v2984_v44 = vmul.f32 %v2977_v59, %v3638_v34  ;;  %v2985_v22 = vmul.f32 %v2978_v14, %v3634_v23 }
0x2269   :  { %3276 = vst.msk [vmem:[%s6004_s9 + $0x10] sm:$0xff] %vm2981_vm10, %v2984_v44 }
0x226a   :  { %3277 = vst.msk [vmem:[%s6004_s9 + $0x18] sm:$0xff] %vm2981_vm10, %v2985_v22 }

</bundles_post_ra>
